<compile_context>
chip_gen: v6e
topology: v6e:2x2x1
jax: 0.10.0
libtpu: 0.0.40
codegen_flags: <defaults>
</compile_context>

<pallas_src>
import math

import jax
import jax.numpy as jnp
from jax.experimental import pallas as pl
from jax.experimental.pallas import tpu as pltpu

NUM_HEADS = 4
LN_EPS = 1e-5
NEG_INF = -1e30


def _layer_norm(x, g, b):
    mu = jnp.mean(x, axis=-1, keepdims=True)
    xc = x - mu
    var = jnp.mean(xc * xc, axis=-1, keepdims=True)
    return xc * jax.lax.rsqrt(var + LN_EPS) * g + b


def _make_fused_kernel(n_tokens, n_pad, num_heads, head_dim):
    """Kernel over grid (B, num_layers); activations live in a VMEM scratch."""
    scale = 1.0 / math.sqrt(head_dim)
    model_dim = num_heads * head_dim

    def kernel(x_ref,
               ln1_g_ref, ln1_b_ref,
               wq_ref, wk_ref, wv_ref,
               bq_ref, bk_ref, bv_ref,
               wo_ref, bo_ref,
               ln2_g_ref, ln2_b_ref,
               w1_ref, b1_ref,
               w2_ref, b2_ref,
               out_ref,
               act_ref):
        layer = pl.program_id(1)

        # Load this batch element's tokens into the resident activation buffer
        # at the first layer only.
        @pl.when(layer == 0)
        def _():
            act_ref[...] = x_ref[0]

        x = act_ref[...]                                      # (n_pad, C) f32

        # ---------------- pre-norm multi-head self-attention ----------------
        xn = _layer_norm(x, ln1_g_ref[0], ln1_b_ref[0])
        xn_b = xn.astype(jnp.bfloat16)

        key_ok = None
        if n_pad != n_tokens:
            key_ok = (jax.lax.broadcasted_iota(jnp.int32, (n_pad, n_pad), 1)
                      < n_tokens)

        attn = jnp.zeros((n_pad, model_dim), jnp.float32)
        for h in range(num_heads):                 # static unroll; ref-indexed
            q_h = (jnp.dot(xn_b, wq_ref[0, h],
                           preferred_element_type=jnp.float32) + bq_ref[0, h])
            k_h = (jnp.dot(xn_b, wk_ref[0, h],
                           preferred_element_type=jnp.float32) + bk_ref[0, h])
            v_h = (jnp.dot(xn_b, wv_ref[0, h],
                           preferred_element_type=jnp.float32) + bv_ref[0, h])

            # scores = q @ k^T without an explicit transpose (NT dot_general)
            s = jax.lax.dot_general(
                q_h.astype(jnp.bfloat16), k_h.astype(jnp.bfloat16),
                (((1,), (1,)), ((), ())),
                preferred_element_type=jnp.float32) * scale   # (n_pad, n_pad)

            if key_ok is not None:
                s = jnp.where(key_ok, s, NEG_INF)             # mask padded keys
            s = s - jnp.max(s, axis=-1, keepdims=True)
            p = jnp.exp(s)
            p = p * pl.reciprocal(jnp.sum(p, axis=-1, keepdims=True),
                                  approx=True)

            o_h = jnp.dot(p.astype(jnp.bfloat16), v_h.astype(jnp.bfloat16),
                          preferred_element_type=jnp.float32)  # (n_pad, dh)
            # per-head output projection accumulate (replaces concat + Wo)
            attn = attn + jnp.dot(o_h.astype(jnp.bfloat16), wo_ref[0, h],
                                  preferred_element_type=jnp.float32)

        x = x + attn + bo_ref[0]

        # ---------------------------- pre-norm FFN ---------------------------
        xn2 = _layer_norm(x, ln2_g_ref[0], ln2_b_ref[0])
        h1 = jnp.dot(xn2.astype(jnp.bfloat16), w1_ref[0],
                     preferred_element_type=jnp.float32) + b1_ref[0]
        # tanh-approx GELU (exact-erf nn.GELU parity would need approximate=False)
        h1 = jax.nn.gelu(h1, approximate=True)
        y = jnp.dot(h1.astype(jnp.bfloat16), w2_ref[0],
                    preferred_element_type=jnp.float32) + b2_ref[0]
        x = x + y

        act_ref[...] = x

        @pl.when(layer == pl.num_programs(1) - 1)
        def _():
            out_ref[0] = x.astype(out_ref.dtype)

    return kernel


def run_reso_align_layers(x, packed, *, num_heads=NUM_HEADS):
    """x: (B, N, C) f32; packed: dict of layer-stacked params (see pack_*)."""
    B, N, C = x.shape
    L = packed["ln1_g"].shape[0]
    F = packed["w1"].shape[-1]
    dh = C // num_heads

    n_pad = ((N + 7) // 8) * 8          # pad token axis to a sublane multiple
    x_in = x if n_pad == N else jnp.pad(x, ((0, 0), (0, n_pad - N), (0, 0)))

    kernel = _make_fused_kernel(N, n_pad, num_heads, dh)

    def wspec(shape):
        # per-layer weight block: layer axis indexed by grid axis 1
        return pl.BlockSpec((1,) + shape,
                            lambda b, l: (l,) + (0,) * len(shape))

    in_specs = [
        pl.BlockSpec((1, n_pad, C), lambda b, l: (b, 0, 0)),        # tokens
        wspec((1, C)), wspec((1, C)),                               # ln1 g/b
        wspec((num_heads, C, dh)), wspec((num_heads, C, dh)),       # wq, wk
        wspec((num_heads, C, dh)),                                  # wv
        wspec((num_heads, 1, dh)), wspec((num_heads, 1, dh)),       # bq, bk
        wspec((num_heads, 1, dh)),                                  # bv
        wspec((num_heads, dh, C)), wspec((1, C)),                   # wo, bo
        wspec((1, C)), wspec((1, C)),                               # ln2 g/b
        wspec((C, F)), wspec((1, F)),                               # w1, b1
        wspec((F, C)), wspec((1, C)),                               # w2, b2
    ]

    out = pl.pallas_call(
        kernel,
        out_shape=jax.ShapeDtypeStruct((B, n_pad, C), jnp.float32),
        grid_spec=pltpu.PrefetchScalarGridSpec(
            num_scalar_prefetch=0,
            grid=(B, L),
            in_specs=in_specs,
            out_specs=pl.BlockSpec((1, n_pad, C), lambda b, l: (b, 0, 0)),
            scratch_shapes=[pltpu.VMEM((n_pad, C), jnp.float32)],
        ),
        compiler_params=pltpu.CompilerParams(
            dimension_semantics=("parallel", "arbitrary")),
    )(x_in,
      packed["ln1_g"], packed["ln1_b"],
      packed["wq"], packed["wk"], packed["wv"],
      packed["bq"], packed["bk"], packed["bv"],
      packed["wo"], packed["bo"],
      packed["ln2_g"], packed["ln2_b"],
      packed["w1"], packed["b1"],
      packed["w2"], packed["b2"])

    if n_pad != N:
        out = out[:, :N, :]
    return out


def init_layer_params(key, C, F):
    ks = jax.random.split(key, 6)
    std = 0.02
    return {
        "ln1_g": jnp.ones((C,), jnp.float32),
        "ln1_b": jnp.zeros((C,), jnp.float32),
        "wq": std * jax.random.normal(ks[0], (C, C), jnp.float32),
        "wk": std * jax.random.normal(ks[1], (C, C), jnp.float32),
        "wv": std * jax.random.normal(ks[2], (C, C), jnp.float32),
        "bq": jnp.zeros((C,), jnp.float32),
        "bk": jnp.zeros((C,), jnp.float32),
        "bv": jnp.zeros((C,), jnp.float32),
        "wo": std * jax.random.normal(ks[3], (C, C), jnp.float32),
        "bo": jnp.zeros((C,), jnp.float32),
        "ln2_g": jnp.ones((C,), jnp.float32),
        "ln2_b": jnp.zeros((C,), jnp.float32),
        "w1": std * jax.random.normal(ks[4], (C, F), jnp.float32),
        "b1": jnp.zeros((F,), jnp.float32),
        "w2": std * jax.random.normal(ks[5], (F, C), jnp.float32),
        "b2": jnp.zeros((C,), jnp.float32),
    }


def pack_layer_params(layer_list, num_heads):
    """Stack params along a leading layer axis and pre-split attention weights
    per head so the kernel never lane-slices or concatenates."""
    C = layer_list[0]["wq"].shape[0]
    dh = C // num_heads

    def stack(name):
        return jnp.stack([p[name] for p in layer_list], axis=0)

    def split_w(w):    # (C, C) -> (H, C, dh)
        return w.reshape(C, num_heads, dh).transpose(1, 0, 2)

    def split_b(b):    # (C,) -> (H, 1, dh)
        return b.reshape(num_heads, 1, dh)

    bf16 = jnp.bfloat16
    return {
        "ln1_g": stack("ln1_g")[:, None, :],
        "ln1_b": stack("ln1_b")[:, None, :],
        "wq": jnp.stack([split_w(p["wq"]) for p in layer_list]).astype(bf16),
        "wk": jnp.stack([split_w(p["wk"]) for p in layer_list]).astype(bf16),
        "wv": jnp.stack([split_w(p["wv"]) for p in layer_list]).astype(bf16),
        "bq": jnp.stack([split_b(p["bq"]) for p in layer_list]),
        "bk": jnp.stack([split_b(p["bk"]) for p in layer_list]),
        "bv": jnp.stack([split_b(p["bv"]) for p in layer_list]),
        "wo": jnp.stack([p["wo"].reshape(num_heads, dh, C)
                         for p in layer_list]).astype(bf16),
        "bo": stack("bo")[:, None, :],
        "ln2_g": stack("ln2_g")[:, None, :],
        "ln2_b": stack("ln2_b")[:, None, :],
        "w1": stack("w1").astype(bf16),
        "b1": stack("b1")[:, None, :],
        "w2": stack("w2").astype(bf16),
        "b2": stack("b2")[:, None, :],
    }


class ResolutionAlignTransformerLayerSequencePallas:
    """JAX/Pallas equivalent of the PyTorch module (dccm-disabled path)."""

    def __init__(self, key, num_layers, embed_dim, temporal_size,
                 comp_insert_layer=0, num_heads=NUM_HEADS):
        self.num_layers = num_layers
        self.embed_dims = embed_dim
        self.num_frames = temporal_size
        self.comp_insert_layer = comp_insert_layer
        self.num_heads = num_heads
        self.pre_norm = True
        # comp_insert_layer <= 0  =>  self.dccm = None (same as reference).
        self.dccm = None
        # TODO(synk): DiffContextAwareCompressionModule (comp_insert_layer > 0
        # multi-resolution branch) has no provided definition; it is disabled
        # here exactly as the reference does when comp_insert_layer <= 0.
        keys = jax.random.split(key, num_layers)
        layers = [init_layer_params(k, embed_dim, 4 * embed_dim) for k in keys]
        self.packed = pack_layer_params(layers, num_heads)

    def forward(self, query, key=None, value=None):
        B, N, c = query.shape
        T = self.num_frames
        P = (N - 1) // T
        H = W = int(math.isqrt(P))
        del H, W  # only used by the (disabled) multi-resolution branch
        # All transformer layers run fused inside a single pallas_call.
        return run_reso_align_layers(query, self.packed,
                                     num_heads=self.num_heads)


if __name__ == "__main__":
    key = jax.random.PRNGKey(0)
    k_model, k_input = jax.random.split(key)

    # small shapes consistent with the module: B=2, C=32, T=2, H=W=4
    B = 2
    embed_dim = 32
    T = 2
    Hs = Ws = 4
    N = 1 + Hs * Ws * T          # cls token + spatio-temporal tokens = 33
    num_layers = 2

    model = ResolutionAlignTransformerLayerSequencePallas(
        k_model, num_layers=num_layers, embed_dim=embed_dim,
        temporal_size=T, comp_insert_layer=0)

    query = jax.random.normal(k_input, (B, N, embed_dim), jnp.float32)

    out = model.forward(query)
    out = jax.block_until_ready(out)

    assert out.shape == (B, N, embed_dim)
    assert bool(jnp.all(jnp.isfinite(out)))
    print("KERNEL_OK")
</pallas_src>

<mosaic_0001>
module attributes {stable_mosaic.version = 11 : i64} {
  func.func @kernel(%arg0: i32, %arg1: i32, %arg2: memref<1x40x32xf32, #tpu.memory_space<vmem>>, %arg3: memref<1x1x32xf32, #tpu.memory_space<vmem>>, %arg4: memref<1x1x32xf32, #tpu.memory_space<vmem>>, %arg5: memref<1x4x32x8xbf16, #tpu.memory_space<vmem>>, %arg6: memref<1x4x32x8xbf16, #tpu.memory_space<vmem>>, %arg7: memref<1x4x32x8xbf16, #tpu.memory_space<vmem>>, %arg8: memref<1x4x1x8xf32, #tpu.memory_space<vmem>>, %arg9: memref<1x4x1x8xf32, #tpu.memory_space<vmem>>, %arg10: memref<1x4x1x8xf32, #tpu.memory_space<vmem>>, %arg11: memref<1x4x8x32xbf16, #tpu.memory_space<vmem>>, %arg12: memref<1x1x32xf32, #tpu.memory_space<vmem>>, %arg13: memref<1x1x32xf32, #tpu.memory_space<vmem>>, %arg14: memref<1x1x32xf32, #tpu.memory_space<vmem>>, %arg15: memref<1x32x128xbf16, #tpu.memory_space<vmem>>, %arg16: memref<1x1x128xf32, #tpu.memory_space<vmem>>, %arg17: memref<1x128x32xbf16, #tpu.memory_space<vmem>>, %arg18: memref<1x1x32xf32, #tpu.memory_space<vmem>>, %arg19: memref<1x40x32xf32, #tpu.memory_space<vmem>>, %arg20: memref<40x32xf32, #tpu.memory_space<vmem>>) attributes {dimension_semantics = [#tpu.dimension_semantics<parallel>, #tpu.dimension_semantics<arbitrary>], iteration_bounds = array<i64: 2, 2>, scalar_prefetch = 0 : i64, scratch_operands = 1 : i64, tpu.core_type = #tpu.core_type<tc>, window_params = [{transform_indices = @transform_0, window_bounds = array<i64: 1, 40, 32>}, {transform_indices = @transform_1, window_bounds = array<i64: 1, 1, 32>}, {transform_indices = @transform_2, window_bounds = array<i64: 1, 1, 32>}, {transform_indices = @transform_3, window_bounds = array<i64: 1, 4, 32, 8>}, {transform_indices = @transform_4, window_bounds = array<i64: 1, 4, 32, 8>}, {transform_indices = @transform_5, window_bounds = array<i64: 1, 4, 32, 8>}, {transform_indices = @transform_6, window_bounds = array<i64: 1, 4, 1, 8>}, {transform_indices = @transform_7, window_bounds = array<i64: 1, 4, 1, 8>}, {transform_indices = @transform_8, window_bounds = array<i64: 1, 4, 1, 8>}, {transform_indices = @transform_9, window_bounds = array<i64: 1, 4, 8, 32>}, {transform_indices = @transform_10, window_bounds = array<i64: 1, 1, 32>}, {transform_indices = @transform_11, window_bounds = array<i64: 1, 1, 32>}, {transform_indices = @transform_12, window_bounds = array<i64: 1, 1, 32>}, {transform_indices = @transform_13, window_bounds = array<i64: 1, 32, 128>}, {transform_indices = @transform_14, window_bounds = array<i64: 1, 1, 128>}, {transform_indices = @transform_15, window_bounds = array<i64: 1, 128, 32>}, {transform_indices = @transform_16, window_bounds = array<i64: 1, 1, 32>}, {transform_indices = @transform_17, window_bounds = array<i64: 1, 40, 32>}]} {
    %c0_i32 = arith.constant 0 : i32
    %0 = arith.cmpi eq, %arg1, %c0_i32 : i32
    %1 = arith.extui %0 : i1 to i32
    %c0_i32_0 = arith.constant 0 : i32
    %2 = arith.cmpi ne, %1, %c0_i32_0 : i32
    scf.if %2 {
      %c0_197 = arith.constant 0 : index
      %c0_198 = arith.constant 0 : index
      %c0_199 = arith.constant 0 : index
      %280 = vector.load %arg2[%c0_197, %c0_198, %c0_199] : memref<1x40x32xf32, #tpu.memory_space<vmem>>, vector<1x40x32xf32>
      %281 = vector.shape_cast %280 : vector<1x40x32xf32> to vector<40x32xf32>
      %c0_200 = arith.constant 0 : index
      %c0_201 = arith.constant 0 : index
      %282 = vector.load %arg20[%c0_200, %c0_201] : memref<40x32xf32, #tpu.memory_space<vmem>>, vector<40x32xf32>
      tpu.vector_store %arg20[%c0_200, %c0_201], %281 {strides = array<i32>} : memref<40x32xf32, #tpu.memory_space<vmem>>, vector<40x32xf32>,
    } else {
    }
    %c0 = arith.constant 0 : index
    %c0_1 = arith.constant 0 : index
    %3 = vector.load %arg20[%c0, %c0_1] : memref<40x32xf32, #tpu.memory_space<vmem>>, vector<40x32xf32>
    %c0_2 = arith.constant 0 : index
    %c0_3 = arith.constant 0 : index
    %c0_4 = arith.constant 0 : index
    %4 = vector.load %arg3[%c0_2, %c0_3, %c0_4] : memref<1x1x32xf32, #tpu.memory_space<vmem>>, vector<1x1x32xf32>
    %5 = vector.shape_cast %4 : vector<1x1x32xf32> to vector<1x32xf32>
    %c0_5 = arith.constant 0 : index
    %c0_6 = arith.constant 0 : index
    %c0_7 = arith.constant 0 : index
    %6 = vector.load %arg4[%c0_5, %c0_6, %c0_7] : memref<1x1x32xf32, #tpu.memory_space<vmem>>, vector<1x1x32xf32>
    %7 = vector.shape_cast %6 : vector<1x1x32xf32> to vector<1x32xf32>
    %cst = arith.constant dense<0.000000e+00> : vector<40xf32>
    %8 = vector.multi_reduction <add>, %3, %cst [1] : vector<40x32xf32> to vector<40xf32>
    %9 = vector.shape_cast %8 : vector<40xf32> to vector<40x1xf32>
    %cst_8 = arith.constant 3.200000e+01 : f32
    %10 = vector.broadcast %cst_8 : f32 to vector<40x1xf32>
    %11 = arith.divf %9, %10 : vector<40x1xf32>
    %12 = vector.broadcast %11 : vector<40x1xf32> to vector<40x32xf32>
    %13 = arith.subf %3, %12 : vector<40x32xf32>
    %14 = arith.mulf %13, %13 : vector<40x32xf32>
    %cst_9 = arith.constant dense<0.000000e+00> : vector<40xf32>
    %15 = vector.multi_reduction <add>, %14, %cst_9 [1] : vector<40x32xf32> to vector<40xf32>
    %16 = vector.shape_cast %15 : vector<40xf32> to vector<40x1xf32>
    %cst_10 = arith.constant 3.200000e+01 : f32
    %17 = vector.broadcast %cst_10 : f32 to vector<40x1xf32>
    %18 = arith.divf %16, %17 : vector<40x1xf32>
    %cst_11 = arith.constant 9.99999974E-6 : f32
    %19 = vector.broadcast %cst_11 : f32 to vector<40x1xf32>
    %20 = arith.addf %18, %19 : vector<40x1xf32>
    %21 = math.rsqrt %20 : vector<40x1xf32>
    %22 = vector.broadcast %21 : vector<40x1xf32> to vector<40x32xf32>
    %23 = arith.mulf %13, %22 : vector<40x32xf32>
    %24 = vector.broadcast %5 : vector<1x32xf32> to vector<40x32xf32>
    %25 = arith.mulf %23, %24 : vector<40x32xf32>
    %26 = vector.broadcast %7 : vector<1x32xf32> to vector<40x32xf32>
    %27 = arith.addf %25, %26 : vector<40x32xf32>
    %28 = arith.truncf %27 : vector<40x32xf32> to vector<40x32xbf16>
    %29 = tpu.iota {dimensions = array<i32: 1>} : vector<40x40xi32>
    %c33_i32 = arith.constant 33 : i32
    %30 = vector.broadcast %c33_i32 : i32 to vector<40x40xi32>
    %31 = arith.cmpi slt, %29, %30 : vector<40x40xi32>
    %cst_12 = arith.constant 0.000000e+00 : f32
    %32 = vector.broadcast %cst_12 : f32 to vector<40x32xf32>
    %c0_13 = arith.constant 0 : index
    %c0_14 = arith.constant 0 : index
    %c0_15 = arith.constant 0 : index
    %c0_16 = arith.constant 0 : index
    %33 = vector.load %arg5[%c0_13, %c0_14, %c0_15, %c0_16] : memref<1x4x32x8xbf16, #tpu.memory_space<vmem>>, vector<1x1x32x8xbf16>
    %34 = vector.shape_cast %33 : vector<1x1x32x8xbf16> to vector<32x8xbf16>
    %cst_17 = arith.constant dense<0.000000e+00> : vector<40x8xf32>
    %35 = tpu.matmul %28, %34, %cst_17 {dimension_numbers = #tpu.dot_dimension_numbers<[1], [0], [0], [1], [0, 0, 1, 1], [], []>} : vector<40x32xbf16>, vector<32x8xbf16>, vector<40x8xf32> -> vector<40x8xf32>
    %c0_18 = arith.constant 0 : index
    %c0_19 = arith.constant 0 : index
    %c0_20 = arith.constant 0 : index
    %c0_21 = arith.constant 0 : index
    %36 = vector.load %arg8[%c0_18, %c0_19, %c0_20, %c0_21] : memref<1x4x1x8xf32, #tpu.memory_space<vmem>>, vector<1x1x1x8xf32>
    %37 = vector.shape_cast %36 : vector<1x1x1x8xf32> to vector<1x8xf32>
    %38 = vector.broadcast %37 : vector<1x8xf32> to vector<40x8xf32>
    %39 = arith.addf %35, %38 : vector<40x8xf32>
    %c0_22 = arith.constant 0 : index
    %c0_23 = arith.constant 0 : index
    %c0_24 = arith.constant 0 : index
    %c0_25 = arith.constant 0 : index
    %40 = vector.load %arg6[%c0_22, %c0_23, %c0_24, %c0_25] : memref<1x4x32x8xbf16, #tpu.memory_space<vmem>>, vector<1x1x32x8xbf16>
    %41 = vector.shape_cast %40 : vector<1x1x32x8xbf16> to vector<32x8xbf16>
    %cst_26 = arith.constant dense<0.000000e+00> : vector<40x8xf32>
    %42 = tpu.matmul %28, %41, %cst_26 {dimension_numbers = #tpu.dot_dimension_numbers<[1], [0], [0], [1], [0, 0, 1, 1], [], []>} : vector<40x32xbf16>, vector<32x8xbf16>, vector<40x8xf32> -> vector<40x8xf32>
    %c0_27 = arith.constant 0 : index
    %c0_28 = arith.constant 0 : index
    %c0_29 = arith.constant 0 : index
    %c0_30 = arith.constant 0 : index
    %43 = vector.load %arg9[%c0_27, %c0_28, %c0_29, %c0_30] : memref<1x4x1x8xf32, #tpu.memory_space<vmem>>, vector<1x1x1x8xf32>
    %44 = vector.shape_cast %43 : vector<1x1x1x8xf32> to vector<1x8xf32>
    %45 = vector.broadcast %44 : vector<1x8xf32> to vector<40x8xf32>
    %46 = arith.addf %42, %45 : vector<40x8xf32>
    %c0_31 = arith.constant 0 : index
    %c0_32 = arith.constant 0 : index
    %c0_33 = arith.constant 0 : index
    %c0_34 = arith.constant 0 : index
    %47 = vector.load %arg7[%c0_31, %c0_32, %c0_33, %c0_34] : memref<1x4x32x8xbf16, #tpu.memory_space<vmem>>, vector<1x1x32x8xbf16>
    %48 = vector.shape_cast %47 : vector<1x1x32x8xbf16> to vector<32x8xbf16>
    %cst_35 = arith.constant dense<0.000000e+00> : vector<40x8xf32>
    %49 = tpu.matmul %28, %48, %cst_35 {dimension_numbers = #tpu.dot_dimension_numbers<[1], [0], [0], [1], [0, 0, 1, 1], [], []>} : vector<40x32xbf16>, vector<32x8xbf16>, vector<40x8xf32> -> vector<40x8xf32>
    %c0_36 = arith.constant 0 : index
    %c0_37 = arith.constant 0 : index
    %c0_38 = arith.constant 0 : index
    %c0_39 = arith.constant 0 : index
    %50 = vector.load %arg10[%c0_36, %c0_37, %c0_38, %c0_39] : memref<1x4x1x8xf32, #tpu.memory_space<vmem>>, vector<1x1x1x8xf32>
    %51 = vector.shape_cast %50 : vector<1x1x1x8xf32> to vector<1x8xf32>
    %52 = vector.broadcast %51 : vector<1x8xf32> to vector<40x8xf32>
    %53 = arith.addf %49, %52 : vector<40x8xf32>
    %54 = arith.truncf %39 : vector<40x8xf32> to vector<40x8xbf16>
    %55 = arith.truncf %46 : vector<40x8xf32> to vector<40x8xbf16>
    %cst_40 = arith.constant dense<0.000000e+00> : vector<40x40xf32>
    %56 = tpu.matmul %54, %55, %cst_40 {dimension_numbers = #tpu.dot_dimension_numbers<[1], [1], [0], [0], [0, 0, 1, 0], [], []>} : vector<40x8xbf16>, vector<40x8xbf16>, vector<40x40xf32> -> vector<40x40xf32>
    %cst_41 = arith.constant 0.353553385 : f32
    %57 = vector.broadcast %cst_41 : f32 to vector<40x40xf32>
    %58 = arith.mulf %56, %57 : vector<40x40xf32>
    %cst_42 = arith.constant -1.000000e+30 : f32
    %59 = vector.broadcast %cst_42 : f32 to vector<40x40xf32>
    %60 = arith.select %31, %58, %59 : vector<40x40xi1>, vector<40x40xf32>
    %cst_43 = arith.constant dense<0xFF800000> : vector<40xf32>
    %61 = vector.multi_reduction <maximumf>, %60, %cst_43 [1] : vector<40x40xf32> to vector<40xf32>
    %62 = vector.shape_cast %61 : vector<40xf32> to vector<40x1xf32>
    %63 = vector.broadcast %62 : vector<40x1xf32> to vector<40x40xf32>
    %64 = arith.subf %60, %63 : vector<40x40xf32>
    %65 = math.exp %64 : vector<40x40xf32>
    %cst_44 = arith.constant dense<0.000000e+00> : vector<40xf32>
    %66 = vector.multi_reduction <add>, %65, %cst_44 [1] : vector<40x40xf32> to vector<40xf32>
    %67 = vector.shape_cast %66 : vector<40xf32> to vector<40x1xf32>
    %68 = tpu.reciprocal %67 {approx = true} : vector<40x1xf32> -> vector<40x1xf32>
    %69 = vector.broadcast %68 : vector<40x1xf32> to vector<40x40xf32>
    %70 = arith.mulf %65, %69 : vector<40x40xf32>
    %71 = arith.truncf %70 : vector<40x40xf32> to vector<40x40xbf16>
    %72 = arith.truncf %53 : vector<40x8xf32> to vector<40x8xbf16>
    %cst_45 = arith.constant dense<0.000000e+00> : vector<40x8xf32>
    %73 = tpu.matmul %71, %72, %cst_45 {dimension_numbers = #tpu.dot_dimension_numbers<[1], [0], [0], [1], [0, 0, 1, 1], [], []>} : vector<40x40xbf16>, vector<40x8xbf16>, vector<40x8xf32> -> vector<40x8xf32>
    %74 = arith.truncf %73 : vector<40x8xf32> to vector<40x8xbf16>
    %c0_46 = arith.constant 0 : index
    %c0_47 = arith.constant 0 : index
    %c0_48 = arith.constant 0 : index
    %c0_49 = arith.constant 0 : index
    %75 = vector.load %arg11[%c0_46, %c0_47, %c0_48, %c0_49] : memref<1x4x8x32xbf16, #tpu.memory_space<vmem>>, vector<1x1x8x32xbf16>
    %76 = vector.shape_cast %75 : vector<1x1x8x32xbf16> to vector<8x32xbf16>
    %cst_50 = arith.constant dense<0.000000e+00> : vector<40x32xf32>
    %77 = tpu.matmul %74, %76, %cst_50 {dimension_numbers = #tpu.dot_dimension_numbers<[1], [0], [0], [1], [0, 0, 1, 1], [], []>} : vector<40x8xbf16>, vector<8x32xbf16>, vector<40x32xf32> -> vector<40x32xf32>
    %78 = arith.addf %32, %77 : vector<40x32xf32>
    %c0_51 = arith.constant 0 : index
    %c1 = arith.constant 1 : index
    %c0_52 = arith.constant 0 : index
    %c0_53 = arith.constant 0 : index
    %79 = vector.load %arg5[%c0_51, %c1, %c0_52, %c0_53] : memref<1x4x32x8xbf16, #tpu.memory_space<vmem>>, vector<1x1x32x8xbf16>
    %80 = vector.shape_cast %79 : vector<1x1x32x8xbf16> to vector<32x8xbf16>
    %cst_54 = arith.constant dense<0.000000e+00> : vector<40x8xf32>
    %81 = tpu.matmul %28, %80, %cst_54 {dimension_numbers = #tpu.dot_dimension_numbers<[1], [0], [0], [1], [0, 0, 1, 1], [], []>} : vector<40x32xbf16>, vector<32x8xbf16>, vector<40x8xf32> -> vector<40x8xf32>
    %c0_55 = arith.constant 0 : index
    %c1_56 = arith.constant 1 : index
    %c0_57 = arith.constant 0 : index
    %c0_58 = arith.constant 0 : index
    %82 = vector.load %arg8[%c0_55, %c1_56, %c0_57, %c0_58] : memref<1x4x1x8xf32, #tpu.memory_space<vmem>>, vector<1x1x1x8xf32>
    %83 = vector.shape_cast %82 : vector<1x1x1x8xf32> to vector<1x8xf32>
    %84 = vector.broadcast %83 : vector<1x8xf32> to vector<40x8xf32>
    %85 = arith.addf %81, %84 : vector<40x8xf32>
    %c0_59 = arith.constant 0 : index
    %c1_60 = arith.constant 1 : index
    %c0_61 = arith.constant 0 : index
    %c0_62 = arith.constant 0 : index
    %86 = vector.load %arg6[%c0_59, %c1_60, %c0_61, %c0_62] : memref<1x4x32x8xbf16, #tpu.memory_space<vmem>>, vector<1x1x32x8xbf16>
    %87 = vector.shape_cast %86 : vector<1x1x32x8xbf16> to vector<32x8xbf16>
    %cst_63 = arith.constant dense<0.000000e+00> : vector<40x8xf32>
    %88 = tpu.matmul %28, %87, %cst_63 {dimension_numbers = #tpu.dot_dimension_numbers<[1], [0], [0], [1], [0, 0, 1, 1], [], []>} : vector<40x32xbf16>, vector<32x8xbf16>, vector<40x8xf32> -> vector<40x8xf32>
    %c0_64 = arith.constant 0 : index
    %c1_65 = arith.constant 1 : index
    %c0_66 = arith.constant 0 : index
    %c0_67 = arith.constant 0 : index
    %89 = vector.load %arg9[%c0_64, %c1_65, %c0_66, %c0_67] : memref<1x4x1x8xf32, #tpu.memory_space<vmem>>, vector<1x1x1x8xf32>
    %90 = vector.shape_cast %89 : vector<1x1x1x8xf32> to vector<1x8xf32>
    %91 = vector.broadcast %90 : vector<1x8xf32> to vector<40x8xf32>
    %92 = arith.addf %88, %91 : vector<40x8xf32>
    %c0_68 = arith.constant 0 : index
    %c1_69 = arith.constant 1 : index
    %c0_70 = arith.constant 0 : index
    %c0_71 = arith.constant 0 : index
    %93 = vector.load %arg7[%c0_68, %c1_69, %c0_70, %c0_71] : memref<1x4x32x8xbf16, #tpu.memory_space<vmem>>, vector<1x1x32x8xbf16>
    %94 = vector.shape_cast %93 : vector<1x1x32x8xbf16> to vector<32x8xbf16>
    %cst_72 = arith.constant dense<0.000000e+00> : vector<40x8xf32>
    %95 = tpu.matmul %28, %94, %cst_72 {dimension_numbers = #tpu.dot_dimension_numbers<[1], [0], [0], [1], [0, 0, 1, 1], [], []>} : vector<40x32xbf16>, vector<32x8xbf16>, vector<40x8xf32> -> vector<40x8xf32>
    %c0_73 = arith.constant 0 : index
    %c1_74 = arith.constant 1 : index
    %c0_75 = arith.constant 0 : index
    %c0_76 = arith.constant 0 : index
    %96 = vector.load %arg10[%c0_73, %c1_74, %c0_75, %c0_76] : memref<1x4x1x8xf32, #tpu.memory_space<vmem>>, vector<1x1x1x8xf32>
    %97 = vector.shape_cast %96 : vector<1x1x1x8xf32> to vector<1x8xf32>
    %98 = vector.broadcast %97 : vector<1x8xf32> to vector<40x8xf32>
    %99 = arith.addf %95, %98 : vector<40x8xf32>
    %100 = arith.truncf %85 : vector<40x8xf32> to vector<40x8xbf16>
    %101 = arith.truncf %92 : vector<40x8xf32> to vector<40x8xbf16>
    %cst_77 = arith.constant dense<0.000000e+00> : vector<40x40xf32>
    %102 = tpu.matmul %100, %101, %cst_77 {dimension_numbers = #tpu.dot_dimension_numbers<[1], [1], [0], [0], [0, 0, 1, 0], [], []>} : vector<40x8xbf16>, vector<40x8xbf16>, vector<40x40xf32> -> vector<40x40xf32>
    %cst_78 = arith.constant 0.353553385 : f32
    %103 = vector.broadcast %cst_78 : f32 to vector<40x40xf32>
    %104 = arith.mulf %102, %103 : vector<40x40xf32>
    %cst_79 = arith.constant -1.000000e+30 : f32
    %105 = vector.broadcast %cst_79 : f32 to vector<40x40xf32>
    %106 = arith.select %31, %104, %105 : vector<40x40xi1>, vector<40x40xf32>
    %cst_80 = arith.constant dense<0xFF800000> : vector<40xf32>
    %107 = vector.multi_reduction <maximumf>, %106, %cst_80 [1] : vector<40x40xf32> to vector<40xf32>
    %108 = vector.shape_cast %107 : vector<40xf32> to vector<40x1xf32>
    %109 = vector.broadcast %108 : vector<40x1xf32> to vector<40x40xf32>
    %110 = arith.subf %106, %109 : vector<40x40xf32>
    %111 = math.exp %110 : vector<40x40xf32>
    %cst_81 = arith.constant dense<0.000000e+00> : vector<40xf32>
    %112 = vector.multi_reduction <add>, %111, %cst_81 [1] : vector<40x40xf32> to vector<40xf32>
    %113 = vector.shape_cast %112 : vector<40xf32> to vector<40x1xf32>
    %114 = tpu.reciprocal %113 {approx = true} : vector<40x1xf32> -> vector<40x1xf32>
    %115 = vector.broadcast %114 : vector<40x1xf32> to vector<40x40xf32>
    %116 = arith.mulf %111, %115 : vector<40x40xf32>
    %117 = arith.truncf %116 : vector<40x40xf32> to vector<40x40xbf16>
    %118 = arith.truncf %99 : vector<40x8xf32> to vector<40x8xbf16>
    %cst_82 = arith.constant dense<0.000000e+00> : vector<40x8xf32>
    %119 = tpu.matmul %117, %118, %cst_82 {dimension_numbers = #tpu.dot_dimension_numbers<[1], [0], [0], [1], [0, 0, 1, 1], [], []>} : vector<40x40xbf16>, vector<40x8xbf16>, vector<40x8xf32> -> vector<40x8xf32>
    %120 = arith.truncf %119 : vector<40x8xf32> to vector<40x8xbf16>
    %c0_83 = arith.constant 0 : index
    %c1_84 = arith.constant 1 : index
    %c0_85 = arith.constant 0 : index
    %c0_86 = arith.constant 0 : index
    %121 = vector.load %arg11[%c0_83, %c1_84, %c0_85, %c0_86] : memref<1x4x8x32xbf16, #tpu.memory_space<vmem>>, vector<1x1x8x32xbf16>
    %122 = vector.shape_cast %121 : vector<1x1x8x32xbf16> to vector<8x32xbf16>
    %cst_87 = arith.constant dense<0.000000e+00> : vector<40x32xf32>
    %123 = tpu.matmul %120, %122, %cst_87 {dimension_numbers = #tpu.dot_dimension_numbers<[1], [0], [0], [1], [0, 0, 1, 1], [], []>} : vector<40x8xbf16>, vector<8x32xbf16>, vector<40x32xf32> -> vector<40x32xf32>
    %124 = arith.addf %78, %123 : vector<40x32xf32>
    %c0_88 = arith.constant 0 : index
    %c2 = arith.constant 2 : index
    %c0_89 = arith.constant 0 : index
    %c0_90 = arith.constant 0 : index
    %125 = vector.load %arg5[%c0_88, %c2, %c0_89, %c0_90] : memref<1x4x32x8xbf16, #tpu.memory_space<vmem>>, vector<1x1x32x8xbf16>
    %126 = vector.shape_cast %125 : vector<1x1x32x8xbf16> to vector<32x8xbf16>
    %cst_91 = arith.constant dense<0.000000e+00> : vector<40x8xf32>
    %127 = tpu.matmul %28, %126, %cst_91 {dimension_numbers = #tpu.dot_dimension_numbers<[1], [0], [0], [1], [0, 0, 1, 1], [], []>} : vector<40x32xbf16>, vector<32x8xbf16>, vector<40x8xf32> -> vector<40x8xf32>
    %c0_92 = arith.constant 0 : index
    %c2_93 = arith.constant 2 : index
    %c0_94 = arith.constant 0 : index
    %c0_95 = arith.constant 0 : index
    %128 = vector.load %arg8[%c0_92, %c2_93, %c0_94, %c0_95] : memref<1x4x1x8xf32, #tpu.memory_space<vmem>>, vector<1x1x1x8xf32>
    %129 = vector.shape_cast %128 : vector<1x1x1x8xf32> to vector<1x8xf32>
    %130 = vector.broadcast %129 : vector<1x8xf32> to vector<40x8xf32>
    %131 = arith.addf %127, %130 : vector<40x8xf32>
    %c0_96 = arith.constant 0 : index
    %c2_97 = arith.constant 2 : index
    %c0_98 = arith.constant 0 : index
    %c0_99 = arith.constant 0 : index
    %132 = vector.load %arg6[%c0_96, %c2_97, %c0_98, %c0_99] : memref<1x4x32x8xbf16, #tpu.memory_space<vmem>>, vector<1x1x32x8xbf16>
    %133 = vector.shape_cast %132 : vector<1x1x32x8xbf16> to vector<32x8xbf16>
    %cst_100 = arith.constant dense<0.000000e+00> : vector<40x8xf32>
    %134 = tpu.matmul %28, %133, %cst_100 {dimension_numbers = #tpu.dot_dimension_numbers<[1], [0], [0], [1], [0, 0, 1, 1], [], []>} : vector<40x32xbf16>, vector<32x8xbf16>, vector<40x8xf32> -> vector<40x8xf32>
    %c0_101 = arith.constant 0 : index
    %c2_102 = arith.constant 2 : index
    %c0_103 = arith.constant 0 : index
    %c0_104 = arith.constant 0 : index
    %135 = vector.load %arg9[%c0_101, %c2_102, %c0_103, %c0_104] : memref<1x4x1x8xf32, #tpu.memory_space<vmem>>, vector<1x1x1x8xf32>
    %136 = vector.shape_cast %135 : vector<1x1x1x8xf32> to vector<1x8xf32>
    %137 = vector.broadcast %136 : vector<1x8xf32> to vector<40x8xf32>
    %138 = arith.addf %134, %137 : vector<40x8xf32>
    %c0_105 = arith.constant 0 : index
    %c2_106 = arith.constant 2 : index
    %c0_107 = arith.constant 0 : index
    %c0_108 = arith.constant 0 : index
    %139 = vector.load %arg7[%c0_105, %c2_106, %c0_107, %c0_108] : memref<1x4x32x8xbf16, #tpu.memory_space<vmem>>, vector<1x1x32x8xbf16>
    %140 = vector.shape_cast %139 : vector<1x1x32x8xbf16> to vector<32x8xbf16>
    %cst_109 = arith.constant dense<0.000000e+00> : vector<40x8xf32>
    %141 = tpu.matmul %28, %140, %cst_109 {dimension_numbers = #tpu.dot_dimension_numbers<[1], [0], [0], [1], [0, 0, 1, 1], [], []>} : vector<40x32xbf16>, vector<32x8xbf16>, vector<40x8xf32> -> vector<40x8xf32>
    %c0_110 = arith.constant 0 : index
    %c2_111 = arith.constant 2 : index
    %c0_112 = arith.constant 0 : index
    %c0_113 = arith.constant 0 : index
    %142 = vector.load %arg10[%c0_110, %c2_111, %c0_112, %c0_113] : memref<1x4x1x8xf32, #tpu.memory_space<vmem>>, vector<1x1x1x8xf32>
    %143 = vector.shape_cast %142 : vector<1x1x1x8xf32> to vector<1x8xf32>
    %144 = vector.broadcast %143 : vector<1x8xf32> to vector<40x8xf32>
    %145 = arith.addf %141, %144 : vector<40x8xf32>
    %146 = arith.truncf %131 : vector<40x8xf32> to vector<40x8xbf16>
    %147 = arith.truncf %138 : vector<40x8xf32> to vector<40x8xbf16>
    %cst_114 = arith.constant dense<0.000000e+00> : vector<40x40xf32>
    %148 = tpu.matmul %146, %147, %cst_114 {dimension_numbers = #tpu.dot_dimension_numbers<[1], [1], [0], [0], [0, 0, 1, 0], [], []>} : vector<40x8xbf16>, vector<40x8xbf16>, vector<40x40xf32> -> vector<40x40xf32>
    %cst_115 = arith.constant 0.353553385 : f32
    %149 = vector.broadcast %cst_115 : f32 to vector<40x40xf32>
    %150 = arith.mulf %148, %149 : vector<40x40xf32>
    %cst_116 = arith.constant -1.000000e+30 : f32
    %151 = vector.broadcast %cst_116 : f32 to vector<40x40xf32>
    %152 = arith.select %31, %150, %151 : vector<40x40xi1>, vector<40x40xf32>
    %cst_117 = arith.constant dense<0xFF800000> : vector<40xf32>
    %153 = vector.multi_reduction <maximumf>, %152, %cst_117 [1] : vector<40x40xf32> to vector<40xf32>
    %154 = vector.shape_cast %153 : vector<40xf32> to vector<40x1xf32>
    %155 = vector.broadcast %154 : vector<40x1xf32> to vector<40x40xf32>
    %156 = arith.subf %152, %155 : vector<40x40xf32>
    %157 = math.exp %156 : vector<40x40xf32>
    %cst_118 = arith.constant dense<0.000000e+00> : vector<40xf32>
    %158 = vector.multi_reduction <add>, %157, %cst_118 [1] : vector<40x40xf32> to vector<40xf32>
    %159 = vector.shape_cast %158 : vector<40xf32> to vector<40x1xf32>
    %160 = tpu.reciprocal %159 {approx = true} : vector<40x1xf32> -> vector<40x1xf32>
    %161 = vector.broadcast %160 : vector<40x1xf32> to vector<40x40xf32>
    %162 = arith.mulf %157, %161 : vector<40x40xf32>
    %163 = arith.truncf %162 : vector<40x40xf32> to vector<40x40xbf16>
    %164 = arith.truncf %145 : vector<40x8xf32> to vector<40x8xbf16>
    %cst_119 = arith.constant dense<0.000000e+00> : vector<40x8xf32>
    %165 = tpu.matmul %163, %164, %cst_119 {dimension_numbers = #tpu.dot_dimension_numbers<[1], [0], [0], [1], [0, 0, 1, 1], [], []>} : vector<40x40xbf16>, vector<40x8xbf16>, vector<40x8xf32> -> vector<40x8xf32>
    %166 = arith.truncf %165 : vector<40x8xf32> to vector<40x8xbf16>
    %c0_120 = arith.constant 0 : index
    %c2_121 = arith.constant 2 : index
    %c0_122 = arith.constant 0 : index
    %c0_123 = arith.constant 0 : index
    %167 = vector.load %arg11[%c0_120, %c2_121, %c0_122, %c0_123] : memref<1x4x8x32xbf16, #tpu.memory_space<vmem>>, vector<1x1x8x32xbf16>
    %168 = vector.shape_cast %167 : vector<1x1x8x32xbf16> to vector<8x32xbf16>
    %cst_124 = arith.constant dense<0.000000e+00> : vector<40x32xf32>
    %169 = tpu.matmul %166, %168, %cst_124 {dimension_numbers = #tpu.dot_dimension_numbers<[1], [0], [0], [1], [0, 0, 1, 1], [], []>} : vector<40x8xbf16>, vector<8x32xbf16>, vector<40x32xf32> -> vector<40x32xf32>
    %170 = arith.addf %124, %169 : vector<40x32xf32>
    %c0_125 = arith.constant 0 : index
    %c3 = arith.constant 3 : index
    %c0_126 = arith.constant 0 : index
    %c0_127 = arith.constant 0 : index
    %171 = vector.load %arg5[%c0_125, %c3, %c0_126, %c0_127] : memref<1x4x32x8xbf16, #tpu.memory_space<vmem>>, vector<1x1x32x8xbf16>
    %172 = vector.shape_cast %171 : vector<1x1x32x8xbf16> to vector<32x8xbf16>
    %cst_128 = arith.constant dense<0.000000e+00> : vector<40x8xf32>
    %173 = tpu.matmul %28, %172, %cst_128 {dimension_numbers = #tpu.dot_dimension_numbers<[1], [0], [0], [1], [0, 0, 1, 1], [], []>} : vector<40x32xbf16>, vector<32x8xbf16>, vector<40x8xf32> -> vector<40x8xf32>
    %c0_129 = arith.constant 0 : index
    %c3_130 = arith.constant 3 : index
    %c0_131 = arith.constant 0 : index
    %c0_132 = arith.constant 0 : index
    %174 = vector.load %arg8[%c0_129, %c3_130, %c0_131, %c0_132] : memref<1x4x1x8xf32, #tpu.memory_space<vmem>>, vector<1x1x1x8xf32>
    %175 = vector.shape_cast %174 : vector<1x1x1x8xf32> to vector<1x8xf32>
    %176 = vector.broadcast %175 : vector<1x8xf32> to vector<40x8xf32>
    %177 = arith.addf %173, %176 : vector<40x8xf32>
    %c0_133 = arith.constant 0 : index
    %c3_134 = arith.constant 3 : index
    %c0_135 = arith.constant 0 : index
    %c0_136 = arith.constant 0 : index
    %178 = vector.load %arg6[%c0_133, %c3_134, %c0_135, %c0_136] : memref<1x4x32x8xbf16, #tpu.memory_space<vmem>>, vector<1x1x32x8xbf16>
    %179 = vector.shape_cast %178 : vector<1x1x32x8xbf16> to vector<32x8xbf16>
    %cst_137 = arith.constant dense<0.000000e+00> : vector<40x8xf32>
    %180 = tpu.matmul %28, %179, %cst_137 {dimension_numbers = #tpu.dot_dimension_numbers<[1], [0], [0], [1], [0, 0, 1, 1], [], []>} : vector<40x32xbf16>, vector<32x8xbf16>, vector<40x8xf32> -> vector<40x8xf32>
    %c0_138 = arith.constant 0 : index
    %c3_139 = arith.constant 3 : index
    %c0_140 = arith.constant 0 : index
    %c0_141 = arith.constant 0 : index
    %181 = vector.load %arg9[%c0_138, %c3_139, %c0_140, %c0_141] : memref<1x4x1x8xf32, #tpu.memory_space<vmem>>, vector<1x1x1x8xf32>
    %182 = vector.shape_cast %181 : vector<1x1x1x8xf32> to vector<1x8xf32>
    %183 = vector.broadcast %182 : vector<1x8xf32> to vector<40x8xf32>
    %184 = arith.addf %180, %183 : vector<40x8xf32>
    %c0_142 = arith.constant 0 : index
    %c3_143 = arith.constant 3 : index
    %c0_144 = arith.constant 0 : index
    %c0_145 = arith.constant 0 : index
    %185 = vector.load %arg7[%c0_142, %c3_143, %c0_144, %c0_145] : memref<1x4x32x8xbf16, #tpu.memory_space<vmem>>, vector<1x1x32x8xbf16>
    %186 = vector.shape_cast %185 : vector<1x1x32x8xbf16> to vector<32x8xbf16>
    %cst_146 = arith.constant dense<0.000000e+00> : vector<40x8xf32>
    %187 = tpu.matmul %28, %186, %cst_146 {dimension_numbers = #tpu.dot_dimension_numbers<[1], [0], [0], [1], [0, 0, 1, 1], [], []>} : vector<40x32xbf16>, vector<32x8xbf16>, vector<40x8xf32> -> vector<40x8xf32>
    %c0_147 = arith.constant 0 : index
    %c3_148 = arith.constant 3 : index
    %c0_149 = arith.constant 0 : index
    %c0_150 = arith.constant 0 : index
    %188 = vector.load %arg10[%c0_147, %c3_148, %c0_149, %c0_150] : memref<1x4x1x8xf32, #tpu.memory_space<vmem>>, vector<1x1x1x8xf32>
    %189 = vector.shape_cast %188 : vector<1x1x1x8xf32> to vector<1x8xf32>
    %190 = vector.broadcast %189 : vector<1x8xf32> to vector<40x8xf32>
    %191 = arith.addf %187, %190 : vector<40x8xf32>
    %192 = arith.truncf %177 : vector<40x8xf32> to vector<40x8xbf16>
    %193 = arith.truncf %184 : vector<40x8xf32> to vector<40x8xbf16>
    %cst_151 = arith.constant dense<0.000000e+00> : vector<40x40xf32>
    %194 = tpu.matmul %192, %193, %cst_151 {dimension_numbers = #tpu.dot_dimension_numbers<[1], [1], [0], [0], [0, 0, 1, 0], [], []>} : vector<40x8xbf16>, vector<40x8xbf16>, vector<40x40xf32> -> vector<40x40xf32>
    %cst_152 = arith.constant 0.353553385 : f32
    %195 = vector.broadcast %cst_152 : f32 to vector<40x40xf32>
    %196 = arith.mulf %194, %195 : vector<40x40xf32>
    %cst_153 = arith.constant -1.000000e+30 : f32
    %197 = vector.broadcast %cst_153 : f32 to vector<40x40xf32>
    %198 = arith.select %31, %196, %197 : vector<40x40xi1>, vector<40x40xf32>
    %cst_154 = arith.constant dense<0xFF800000> : vector<40xf32>
    %199 = vector.multi_reduction <maximumf>, %198, %cst_154 [1] : vector<40x40xf32> to vector<40xf32>
    %200 = vector.shape_cast %199 : vector<40xf32> to vector<40x1xf32>
    %201 = vector.broadcast %200 : vector<40x1xf32> to vector<40x40xf32>
    %202 = arith.subf %198, %201 : vector<40x40xf32>
    %203 = math.exp %202 : vector<40x40xf32>
    %cst_155 = arith.constant dense<0.000000e+00> : vector<40xf32>
    %204 = vector.multi_reduction <add>, %203, %cst_155 [1] : vector<40x40xf32> to vector<40xf32>
    %205 = vector.shape_cast %204 : vector<40xf32> to vector<40x1xf32>
    %206 = tpu.reciprocal %205 {approx = true} : vector<40x1xf32> -> vector<40x1xf32>
    %207 = vector.broadcast %206 : vector<40x1xf32> to vector<40x40xf32>
    %208 = arith.mulf %203, %207 : vector<40x40xf32>
    %209 = arith.truncf %208 : vector<40x40xf32> to vector<40x40xbf16>
    %210 = arith.truncf %191 : vector<40x8xf32> to vector<40x8xbf16>
    %cst_156 = arith.constant dense<0.000000e+00> : vector<40x8xf32>
    %211 = tpu.matmul %209, %210, %cst_156 {dimension_numbers = #tpu.dot_dimension_numbers<[1], [0], [0], [1], [0, 0, 1, 1], [], []>} : vector<40x40xbf16>, vector<40x8xbf16>, vector<40x8xf32> -> vector<40x8xf32>
    %212 = arith.truncf %211 : vector<40x8xf32> to vector<40x8xbf16>
    %c0_157 = arith.constant 0 : index
    %c3_158 = arith.constant 3 : index
    %c0_159 = arith.constant 0 : index
    %c0_160 = arith.constant 0 : index
    %213 = vector.load %arg11[%c0_157, %c3_158, %c0_159, %c0_160] : memref<1x4x8x32xbf16, #tpu.memory_space<vmem>>, vector<1x1x8x32xbf16>
    %214 = vector.shape_cast %213 : vector<1x1x8x32xbf16> to vector<8x32xbf16>
    %cst_161 = arith.constant dense<0.000000e+00> : vector<40x32xf32>
    %215 = tpu.matmul %212, %214, %cst_161 {dimension_numbers = #tpu.dot_dimension_numbers<[1], [0], [0], [1], [0, 0, 1, 1], [], []>} : vector<40x8xbf16>, vector<8x32xbf16>, vector<40x32xf32> -> vector<40x32xf32>
    %216 = arith.addf %170, %215 : vector<40x32xf32>
    %217 = arith.addf %3, %216 : vector<40x32xf32>
    %c0_162 = arith.constant 0 : index
    %c0_163 = arith.constant 0 : index
    %c0_164 = arith.constant 0 : index
    %218 = vector.load %arg12[%c0_162, %c0_163, %c0_164] : memref<1x1x32xf32, #tpu.memory_space<vmem>>, vector<1x1x32xf32>
    %219 = vector.shape_cast %218 : vector<1x1x32xf32> to vector<1x32xf32>
    %220 = vector.broadcast %219 : vector<1x32xf32> to vector<40x32xf32>
    %221 = arith.addf %217, %220 : vector<40x32xf32>
    %c0_165 = arith.constant 0 : index
    %c0_166 = arith.constant 0 : index
    %c0_167 = arith.constant 0 : index
    %222 = vector.load %arg13[%c0_165, %c0_166, %c0_167] : memref<1x1x32xf32, #tpu.memory_space<vmem>>, vector<1x1x32xf32>
    %223 = vector.shape_cast %222 : vector<1x1x32xf32> to vector<1x32xf32>
    %c0_168 = arith.constant 0 : index
    %c0_169 = arith.constant 0 : index
    %c0_170 = arith.constant 0 : index
    %224 = vector.load %arg14[%c0_168, %c0_169, %c0_170] : memref<1x1x32xf32, #tpu.memory_space<vmem>>, vector<1x1x32xf32>
    %225 = vector.shape_cast %224 : vector<1x1x32xf32> to vector<1x32xf32>
    %cst_171 = arith.constant dense<0.000000e+00> : vector<40xf32>
    %226 = vector.multi_reduction <add>, %221, %cst_171 [1] : vector<40x32xf32> to vector<40xf32>
    %227 = vector.shape_cast %226 : vector<40xf32> to vector<40x1xf32>
    %cst_172 = arith.constant 3.200000e+01 : f32
    %228 = vector.broadcast %cst_172 : f32 to vector<40x1xf32>
    %229 = arith.divf %227, %228 : vector<40x1xf32>
    %230 = vector.broadcast %229 : vector<40x1xf32> to vector<40x32xf32>
    %231 = arith.subf %221, %230 : vector<40x32xf32>
    %232 = arith.mulf %231, %231 : vector<40x32xf32>
    %cst_173 = arith.constant dense<0.000000e+00> : vector<40xf32>
    %233 = vector.multi_reduction <add>, %232, %cst_173 [1] : vector<40x32xf32> to vector<40xf32>
    %234 = vector.shape_cast %233 : vector<40xf32> to vector<40x1xf32>
    %cst_174 = arith.constant 3.200000e+01 : f32
    %235 = vector.broadcast %cst_174 : f32 to vector<40x1xf32>
    %236 = arith.divf %234, %235 : vector<40x1xf32>
    %cst_175 = arith.constant 9.99999974E-6 : f32
    %237 = vector.broadcast %cst_175 : f32 to vector<40x1xf32>
    %238 = arith.addf %236, %237 : vector<40x1xf32>
    %239 = math.rsqrt %238 : vector<40x1xf32>
    %240 = vector.broadcast %239 : vector<40x1xf32> to vector<40x32xf32>
    %241 = arith.mulf %231, %240 : vector<40x32xf32>
    %242 = vector.broadcast %223 : vector<1x32xf32> to vector<40x32xf32>
    %243 = arith.mulf %241, %242 : vector<40x32xf32>
    %244 = vector.broadcast %225 : vector<1x32xf32> to vector<40x32xf32>
    %245 = arith.addf %243, %244 : vector<40x32xf32>
    %246 = arith.truncf %245 : vector<40x32xf32> to vector<40x32xbf16>
    %c0_176 = arith.constant 0 : index
    %c0_177 = arith.constant 0 : index
    %c0_178 = arith.constant 0 : index
    %247 = vector.load %arg15[%c0_176, %c0_177, %c0_178] : memref<1x32x128xbf16, #tpu.memory_space<vmem>>, vector<1x32x128xbf16>
    %248 = vector.shape_cast %247 : vector<1x32x128xbf16> to vector<32x128xbf16>
    %cst_179 = arith.constant dense<0.000000e+00> : vector<40x128xf32>
    %249 = tpu.matmul %246, %248, %cst_179 {dimension_numbers = #tpu.dot_dimension_numbers<[1], [0], [0], [1], [0, 0, 1, 1], [], []>} : vector<40x32xbf16>, vector<32x128xbf16>, vector<40x128xf32> -> vector<40x128xf32>
    %c0_180 = arith.constant 0 : index
    %c0_181 = arith.constant 0 : index
    %c0_182 = arith.constant 0 : index
    %250 = vector.load %arg16[%c0_180, %c0_181, %c0_182] : memref<1x1x128xf32, #tpu.memory_space<vmem>>, vector<1x1x128xf32>
    %251 = vector.shape_cast %250 : vector<1x1x128xf32> to vector<1x128xf32>
    %252 = vector.broadcast %251 : vector<1x128xf32> to vector<40x128xf32>
    %253 = arith.addf %249, %252 : vector<40x128xf32>
    %254 = arith.mulf %253, %253 : vector<40x128xf32>
    %255 = arith.mulf %253, %254 : vector<40x128xf32>
    %cst_183 = arith.constant 4.471500e-02 : f32
    %256 = vector.broadcast %cst_183 : f32 to vector<40x128xf32>
    %257 = arith.mulf %256, %255 : vector<40x128xf32>
    %258 = arith.addf %253, %257 : vector<40x128xf32>
    %cst_184 = arith.constant 0.797884583 : f32
    %259 = vector.broadcast %cst_184 : f32 to vector<40x128xf32>
    %260 = arith.mulf %259, %258 : vector<40x128xf32>
    %261 = math.tanh %260 : vector<40x128xf32>
    %cst_185 = arith.constant 1.000000e+00 : f32
    %262 = vector.broadcast %cst_185 : f32 to vector<40x128xf32>
    %263 = arith.addf %262, %261 : vector<40x128xf32>
    %cst_186 = arith.constant 5.000000e-01 : f32
    %264 = vector.broadcast %cst_186 : f32 to vector<40x128xf32>
    %265 = arith.mulf %264, %263 : vector<40x128xf32>
    %266 = arith.mulf %253, %265 : vector<40x128xf32>
    %267 = arith.truncf %266 : vector<40x128xf32> to vector<40x128xbf16>
    %c0_187 = arith.constant 0 : index
    %c0_188 = arith.constant 0 : index
    %c0_189 = arith.constant 0 : index
    %268 = vector.load %arg17[%c0_187, %c0_188, %c0_189] : memref<1x128x32xbf16, #tpu.memory_space<vmem>>, vector<1x128x32xbf16>
    %269 = vector.shape_cast %268 : vector<1x128x32xbf16> to vector<128x32xbf16>
    %cst_190 = arith.constant dense<0.000000e+00> : vector<40x32xf32>
    %270 = tpu.matmul %267, %269, %cst_190 {dimension_numbers = #tpu.dot_dimension_numbers<[1], [0], [0], [1], [0, 0, 1, 1], [], []>} : vector<40x128xbf16>, vector<128x32xbf16>, vector<40x32xf32> -> vector<40x32xf32>
    %c0_191 = arith.constant 0 : index
    %c0_192 = arith.constant 0 : index
    %c0_193 = arith.constant 0 : index
    %271 = vector.load %arg18[%c0_191, %c0_192, %c0_193] : memref<1x1x32xf32, #tpu.memory_space<vmem>>, vector<1x1x32xf32>
    %272 = vector.shape_cast %271 : vector<1x1x32xf32> to vector<1x32xf32>
    %273 = vector.broadcast %272 : vector<1x32xf32> to vector<40x32xf32>
    %274 = arith.addf %270, %273 : vector<40x32xf32>
    %275 = arith.addf %221, %274 : vector<40x32xf32>
    %c0_194 = arith.constant 0 : index
    %c0_195 = arith.constant 0 : index
    %276 = vector.load %arg20[%c0_194, %c0_195] : memref<40x32xf32, #tpu.memory_space<vmem>>, vector<40x32xf32>
    tpu.vector_store %arg20[%c0_194, %c0_195], %275 {strides = array<i32>} : memref<40x32xf32, #tpu.memory_space<vmem>>, vector<40x32xf32>,
    %c1_i32 = arith.constant 1 : i32
    %277 = arith.cmpi eq, %arg1, %c1_i32 : i32
    %278 = arith.extui %277 : i1 to i32
    %c0_i32_196 = arith.constant 0 : i32
    %279 = arith.cmpi ne, %278, %c0_i32_196 : i32
    scf.if %279 {
      %c0_197 = arith.constant 0 : index
      %c0_198 = arith.constant 0 : index
      %c0_199 = arith.constant 0 : index
      %280 = vector.load %arg19[%c0_197, %c0_198, %c0_199] : memref<1x40x32xf32, #tpu.memory_space<vmem>>, vector<1x40x32xf32>
      %281 = vector.shape_cast %280 : vector<1x40x32xf32> to vector<40x32xf32>
      %282 = vector.shape_cast %275 : vector<40x32xf32> to vector<1x40x32xf32>
      tpu.vector_store %arg19[%c0_197, %c0_198, %c0_199], %282 {strides = array<i32>} : memref<1x40x32xf32, #tpu.memory_space<vmem>>, vector<1x40x32xf32>,
    } else {
    }
    return
  }
  func.func @transform_0(%arg0: i32, %arg1: i32) -> (i32, i32, i32) {
    %c0_i32 = arith.constant 0 : i32
    %c0_i32_0 = arith.constant 0 : i32
    %c0_i32_1 = arith.constant 0 : i32
    return %arg0, %c0_i32, %c0_i32_0 : i32, i32, i32
  }
  func.func @transform_1(%arg0: i32, %arg1: i32) -> (i32, i32, i32) {
    %c0_i32 = arith.constant 0 : i32
    %c0_i32_0 = arith.constant 0 : i32
    %c0_i32_1 = arith.constant 0 : i32
    return %arg1, %c0_i32, %c0_i32_0 : i32, i32, i32
  }
  func.func @transform_2(%arg0: i32, %arg1: i32) -> (i32, i32, i32) {
    %c0_i32 = arith.constant 0 : i32
    %c0_i32_0 = arith.constant 0 : i32
    %c0_i32_1 = arith.constant 0 : i32
    return %arg1, %c0_i32, %c0_i32_0 : i32, i32, i32
  }
  func.func @transform_3(%arg0: i32, %arg1: i32) -> (i32, i32, i32, i32) {
    %c0_i32 = arith.constant 0 : i32
    %c0_i32_0 = arith.constant 0 : i32
    %c0_i32_1 = arith.constant 0 : i32
    %c0_i32_2 = arith.constant 0 : i32
    return %arg1, %c0_i32, %c0_i32_0, %c0_i32_1 : i32, i32, i32, i32
  }
  func.func @transform_4(%arg0: i32, %arg1: i32) -> (i32, i32, i32, i32) {
    %c0_i32 = arith.constant 0 : i32
    %c0_i32_0 = arith.constant 0 : i32
    %c0_i32_1 = arith.constant 0 : i32
    %c0_i32_2 = arith.constant 0 : i32
    return %arg1, %c0_i32, %c0_i32_0, %c0_i32_1 : i32, i32, i32, i32
  }
  func.func @transform_5(%arg0: i32, %arg1: i32) -> (i32, i32, i32, i32) {
    %c0_i32 = arith.constant 0 : i32
    %c0_i32_0 = arith.constant 0 : i32
    %c0_i32_1 = arith.constant 0 : i32
    %c0_i32_2 = arith.constant 0 : i32
    return %arg1, %c0_i32, %c0_i32_0, %c0_i32_1 : i32, i32, i32, i32
  }
  func.func @transform_6(%arg0: i32, %arg1: i32) -> (i32, i32, i32, i32) {
    %c0_i32 = arith.constant 0 : i32
    %c0_i32_0 = arith.constant 0 : i32
    %c0_i32_1 = arith.constant 0 : i32
    %c0_i32_2 = arith.constant 0 : i32
    return %arg1, %c0_i32, %c0_i32_0, %c0_i32_1 : i32, i32, i32, i32
  }
  func.func @transform_7(%arg0: i32, %arg1: i32) -> (i32, i32, i32, i32) {
    %c0_i32 = arith.constant 0 : i32
    %c0_i32_0 = arith.constant 0 : i32
    %c0_i32_1 = arith.constant 0 : i32
    %c0_i32_2 = arith.constant 0 : i32
    return %arg1, %c0_i32, %c0_i32_0, %c0_i32_1 : i32, i32, i32, i32
  }
  func.func @transform_8(%arg0: i32, %arg1: i32) -> (i32, i32, i32, i32) {
    %c0_i32 = arith.constant 0 : i32
    %c0_i32_0 = arith.constant 0 : i32
    %c0_i32_1 = arith.constant 0 : i32
    %c0_i32_2 = arith.constant 0 : i32
    return %arg1, %c0_i32, %c0_i32_0, %c0_i32_1 : i32, i32, i32, i32
  }
  func.func @transform_9(%arg0: i32, %arg1: i32) -> (i32, i32, i32, i32) {
    %c0_i32 = arith.constant 0 : i32
    %c0_i32_0 = arith.constant 0 : i32
    %c0_i32_1 = arith.constant 0 : i32
    %c0_i32_2 = arith.constant 0 : i32
    return %arg1, %c0_i32, %c0_i32_0, %c0_i32_1 : i32, i32, i32, i32
  }
  func.func @transform_10(%arg0: i32, %arg1: i32) -> (i32, i32, i32) {
    %c0_i32 = arith.constant 0 : i32
    %c0_i32_0 = arith.constant 0 : i32
    %c0_i32_1 = arith.constant 0 : i32
    return %arg1, %c0_i32, %c0_i32_0 : i32, i32, i32
  }
  func.func @transform_11(%arg0: i32, %arg1: i32) -> (i32, i32, i32) {
    %c0_i32 = arith.constant 0 : i32
    %c0_i32_0 = arith.constant 0 : i32
    %c0_i32_1 = arith.constant 0 : i32
    return %arg1, %c0_i32, %c0_i32_0 : i32, i32, i32
  }
  func.func @transform_12(%arg0: i32, %arg1: i32) -> (i32, i32, i32) {
    %c0_i32 = arith.constant 0 : i32
    %c0_i32_0 = arith.constant 0 : i32
    %c0_i32_1 = arith.constant 0 : i32
    return %arg1, %c0_i32, %c0_i32_0 : i32, i32, i32
  }
  func.func @transform_13(%arg0: i32, %arg1: i32) -> (i32, i32, i32) {
    %c0_i32 = arith.constant 0 : i32
    %c0_i32_0 = arith.constant 0 : i32
    %c0_i32_1 = arith.constant 0 : i32
    return %arg1, %c0_i32, %c0_i32_0 : i32, i32, i32
  }
  func.func @transform_14(%arg0: i32, %arg1: i32) -> (i32, i32, i32) {
    %c0_i32 = arith.constant 0 : i32
    %c0_i32_0 = arith.constant 0 : i32
    %c0_i32_1 = arith.constant 0 : i32
    return %arg1, %c0_i32, %c0_i32_0 : i32, i32, i32
  }
  func.func @transform_15(%arg0: i32, %arg1: i32) -> (i32, i32, i32) {
    %c0_i32 = arith.constant 0 : i32
    %c0_i32_0 = arith.constant 0 : i32
    %c0_i32_1 = arith.constant 0 : i32
    return %arg1, %c0_i32, %c0_i32_0 : i32, i32, i32
  }
  func.func @transform_16(%arg0: i32, %arg1: i32) -> (i32, i32, i32) {
    %c0_i32 = arith.constant 0 : i32
    %c0_i32_0 = arith.constant 0 : i32
    %c0_i32_1 = arith.constant 0 : i32
    return %arg1, %c0_i32, %c0_i32_0 : i32, i32, i32
  }
  func.func @transform_17(%arg0: i32, %arg1: i32) -> (i32, i32, i32) {
    %c0_i32 = arith.constant 0 : i32
    %c0_i32_0 = arith.constant 0 : i32
    %c0_i32_1 = arith.constant 0 : i32
    return %arg0, %c0_i32, %c0_i32_0 : i32, i32, i32
  }
}

</mosaic_0001>

<bundles_post_ra>
// kernel: tpu_custom_call.1
= control target key start
LH: loop header
LB: loop body
LE: loop exit
PB: predicated region body
PF: predicated region fallthrough
CT: control target
= control target key end

     0   :  { %s4839_s24 = smov 0   ;;  %s4841_s25 = smov 0   ;;  %s5728_s0 = inlined_call_operand.vmem [shape: f32[2,40,32], index: 0, kind: input, shape index: {}]   ;;  %s5729_s1 = inlined_call_operand.vmem [shape: f32[2,1,32], index: 1, kind: input, shape index: {}]   ;;  %s5730_s2 = inlined_call_operand.vmem [shape: f32[2,1,32], index: 2, kind: input, shape index: {}]   ;;  %s5731_s3 = inlined_call_operand.vmem [shape: bf16[2,4,32,8], index: 3, kind: input, shape index: {}]   ;;  %s5732_s4 = inlined_call_operand.vmem [shape: bf16[2,4,32,8], index: 4, kind: input, shape index: {}]   ;;  %s5733_s5 = inlined_call_operand.vmem [shape: bf16[2,4,32,8], index: 5, kind: input, shape index: {}]   ;;  %s5734_s6 = inlined_call_operand.vmem [shape: f32[2,4,1,8], index: 6, kind: input, shape index: {}]   ;;  %s5735_s7 = inlined_call_operand.vmem [shape: f32[2,4,1,8], index: 7, kind: input, shape index: {}]   ;;  %s5736_s8 = inlined_call_operand.vmem [shape: f32[2,4,1,8], index: 8, kind: input, shape index: {}]   ;;  %s5737_s9 = inlined_call_operand.vmem [shape: bf16[2,4,8,32], index: 9, kind: input, shape index: {}]   ;;  %s5738_s10 = inlined_call_operand.vmem [shape: f32[2,1,32], index: 10, kind: input, shape index: {}]   ;;  %s5739_s11 = inlined_call_operand.vmem [shape: f32[2,1,32], index: 11, kind: input, shape index: {}]   ;;  %s5740_s12 = inlined_call_operand.vmem [shape: f32[2,1,32], index: 12, kind: input, shape index: {}]   ;;  %s5741_s13 = inlined_call_operand.vmem [shape: bf16[2,32,128], index: 13, kind: input, shape index: {}]   ;;  %s5742_s14 = inlined_call_operand.vmem [shape: f32[2,1,128], index: 14, kind: input, shape index: {}]   ;;  %s5743_s15 = inlined_call_operand.vmem [shape: bf16[2,128,32], index: 15, kind: input, shape index: {}]   ;;  %s5744_s16 = inlined_call_operand.vmem [shape: f32[2,1,32], index: 16, kind: input, shape index: {}]   ;;  %s5745_s17 = inlined_call_operand.vmem [shape: f32[2,40,32], index: 17, kind: output, shape index: {}]  }
   0x1   :  { %5752 = sst [smem:[#allocation11_spill]] %s5728_s0  ;;  %s4843_s26 = smov 0  }
   0x2   :  { %5753 = sst [smem:[#allocation12_spill]] %s5729_s1  ;;  %s4845_s27 = smov 0  }
   0x3   :  { %5754 = sst [smem:[#allocation13_spill]] %s5730_s2  ;;  %s4847_s28 = smov 0  }
   0x4   :  { %5755 = sst [smem:[#allocation14_spill]] %s5731_s3 }
   0x5   :  { %5756 = sst [smem:[#allocation15_spill]] %s5732_s4 }
   0x6   :  { %5757 = sst [smem:[#allocation16_spill]] %s5733_s5 }
   0x7   :  { %5758 = sst [smem:[#allocation17_spill]] %s5734_s6 }
   0x8   :  { %5759 = sst [smem:[#allocation18_spill]] %s5735_s7 }
   0x9   :  { %5760 = sst [smem:[#allocation19_spill]] %s5736_s8 }
   0xa   :  { %5761 = sst [smem:[#allocation20_spill]] %s5737_s9 }
   0xb   :  { %5762 = sst [smem:[#allocation21_spill]] %s5739_s11 }
   0xc   :  { %5763 = sst [smem:[#allocation22_spill]] %s5740_s12 }
   0xd   :  { %5764 = sst [smem:[#allocation23_spill]] %s5743_s15 }
   0xe   :  { %5765 = sst [smem:[#allocation24_spill]] %s5744_s16 }
   0xf   :  { %5766 = sst [smem:[#allocation25_spill]] %s5745_s17 }
  0x10 LB: > { %5767 = sst [smem:[#allocation3_spill]] %s4729_s24  ;;  %s36_s29 = sadd.s32 1, %s4737_s26  ;;  %s4745_s28 = sphi %s4847_s28, %s27_s28   ;;  %s4741_s27 = sphi %s4845_s27, %s5808_s27   ;;  %s4737_s26 = sphi %s4843_s26, %s5807_s26   ;;  %s4733_s25 = sphi %s4841_s25, %s5806_s25   ;;  %s4729_s24 = sphi %s4839_s24, %s5805_s24  }
  0x11   : > { %5768 = sst [smem:[#allocation4_spill]] %s4737_s26  ;;  %s39_s0 = sadd.s32 1, %s4741_s27 }
  0x12   : > { %5769 = sst [smem:[#allocation5_spill]] %s4741_s27  ;;  %p37_p0 = scmp.ge.s32.totalorder %s36_s29, 2 }
  0x13   : > { %5770 = sst [smem:[#allocation6_spill]] %s4745_s28  ;;  %p3735_p1 = scmp.ge.s32.totalorder %s4745_s28, 1 }
  0x14   : > { %p642_p2 = scmp.lt.s32.totalorder %s4745_s28, 5  ;;  %s5810_s29 = smov (%p37_p0, %s36_s29), 0 }
  0x15   : > { %5771 = sst [smem:[#allocation7_spill]] %s5810_s29  ;;  %s5812_s0 = smov (!%p37_p0, %s39_s0), %s4741_s27 }
  0x16   : > { %p643_p3 = pnand %p3735_p1, %p642_p2  ;;  %p41_p4 = scmp.ge.s32.totalorder %s5812_s0, 2 }
  0x18   : > { %s5814_s0 = smov (%p41_p4, %s5812_s0), 0  ;;  %646 = sbr.rel (%p643_p3) target bundleno = 4982 (0x1376), region = 88 }
  0x19   : > { %5772 = sst [smem:[#allocation8_spill]] %s5814_s0 }
  0x1d   : > { %p757_p5 = scmp.lt.s32.totalorder %s4733_s25, 1  ;;  %p762_p6 = scmp.lt.s32.totalorder %s4729_s24, 1 }
  0x1e   : > { %s5775_s26 = sld [smem:[#allocation11_spill]] }
  0x1f   : > { %s5816_s25 = smov (!%p757_p5, %s4733_s25), 1  ;;  %s5776_s3 = sld [smem:[#allocation14_spill]] }
  0x20   : > { %s4873_s30 = scalar_select %p762_p6, %s4729_s24, 1 }
  0x21   : > { %s4515_s18 = smul.u32 40, %s5816_s25  ;;  %s5777_s4 = sld [smem:[#allocation15_spill]] }
  0x22   : > { %s3933_s24 = sshll.u32 %s4873_s30, 6  ;;  %s5778_s5 = sld [smem:[#allocation16_spill]] }
  0x23   : > { %s3743_s27 = sshll.u32 %s4873_s30, 2  ;;  %s5779_s6 = sld [smem:[#allocation17_spill]] }
  0x24   : > { %s761_s28 = scalar_lea.vmem %s5775_s26, %s4515_s18  ;;  %s5781_s7 = sld [smem:[#allocation18_spill]] }
  0x25   : > { %s4890_s25 = scalar_lea.vmem %s5776_s3, %s3933_s24  ;;  %s5782_s8 = sld [smem:[#allocation19_spill]] }
  0x26   : > { %s5783_s9 = sld [smem:[#allocation20_spill]] }
  0x27   : > { %s4895_s1 = scalar_lea.vmem %s5777_s4, %s3933_s24  ;;  %s3936_s4 = sshll.u32 %s4873_s30, 4 }
  0x28   : > { %s4900_s23 = scalar_lea.vmem %s5778_s5, %s3933_s24  ;;  %s5787_s29 = sld [smem:[#allocation23_spill]] }
  0x29   : > { %s4906_s0 = scalar_lea.vmem %s5779_s6, %s3743_s27  ;;  %s5788_s16 = sld [smem:[#allocation24_spill]] }
  0x2a   : > { %5780 = sst [smem:[#allocation9_spill]] %s4906_s0  ;;  %s4911_s21 = scalar_lea.vmem %s5781_s7, %s3743_s27 }
  0x2b   : > { %s4916_s19 = scalar_lea.vmem %s5782_s8, %s3743_s27  ;;  %s4939_s8 = scalar_lea.vmem %s5741_s13, %s3936_s4 }
  0x2c   : > { %s4922_s5 = scalar_lea.vmem %s5783_s9, %s3936_s4  ;;  %s816_s9 = scalar_lea.vmem %s5742_s14, %s4873_s30 }
  0x2d   : > { %5784 = sst [smem:[#allocation10_spill]] %s4922_s5 }
  0x2e   : > { %s4948_s26 = scalar_lea.vmem %s5787_s29, %s3933_s24  ;;  %s5789_s3 = sld [smem:[#allocation25_spill]] }
  0x2f   : > { %s824_s11 = scalar_lea.vmem %s5788_s16, %s4873_s30  ;;  %s5790_s4 = sld [smem:[#allocation3_spill]] }
  0x34   : > { %s4957_s12 = scalar_lea.vmem %s5789_s3, %s4515_s18 }
  0x35   : > { %p3753_p7 = scmp.ne.s32.totalorder %s5790_s4, 0 }
  0x37   : > { %834 = sbr.rel (%p3753_p7) target bundleno = 64 (0x40), region = 92 }
  0x3c   : > { %v835_v0 = vld [vmem:[%s761_s28] sm:$0xff]  ;;  %vm840_vm0 = vcmask 261120   ;;  %v836_v1 = vld [vmem:[%s761_s28 + $0x8] sm:$0xff]  ;;  %v837_v2 = vld [vmem:[%s761_s28 + $0x10] sm:$0xff] }
  0x3d   : > { %841 = vst.msk [vmem:[#allocation2] sm:$0xff] %vm840_vm0, %v835_v0  ;;  %842 = vst.msk [vmem:[#allocation2 + $0x8] sm:$0xff] %vm840_vm0, %v836_v1  ;;  %v838_v3 = vld [vmem:[%s761_s28 + $0x18] sm:$0xff]  ;;  %v839_v4 = vld [vmem:[%s761_s28 + $0x20] sm:$0xff] }
  0x3e   : > { %843 = vst.msk [vmem:[#allocation2 + $0x10] sm:$0xff] %vm840_vm0, %v837_v2  ;;  %844 = vst.msk [vmem:[#allocation2 + $0x18] sm:$0xff] %vm840_vm0, %v838_v3 }
  0x3f   : > { %845 = vst.msk [vmem:[#allocation2 + $0x20] sm:$0xff] %vm840_vm0, %v839_v4 }
  0x40 PF: > { %vm853_vm1 = vcmask 261120   ;;  %v4558_v40 = vld [vmem:[%s4890_s25 + $0x8] sm:$0xff]   ;;  %v4747_v42 = vmov 0.0   ;;  %v4560_v43 = vld [vmem:[%s4890_s25] sm:$0xff]   ;;  %vm4748_vm2 = vmmov 0   ;;  %s5791_s28 = sld [smem:[#allocation12_spill]] }
  0x41   : > { %v4559_v41 = vld [vmem:[%s4895_s1 + $0x8] sm:$0xff]   ;;  %4079 = vmatprep.subr.bf16.mxu0 %v4747_v42  ;;  %4095 = vmatprep.subr.bf16.mxu1 %v4747_v42  ;;  %v4561_v44 = vld [vmem:[%s4895_s1] sm:$0xff]   ;;  %s5793_s27 = sld [smem:[#allocation13_spill]]  ;;  %vm1200_vm3 = vcmask 64512   ;;  %vm1356_vm4 = vcmask 1043456   ;;  %vm1285_vm6 = vcmask 326656  }
  0x42   : > { %4080 = vmatpush3.bf16.msra.mxu0 %v4558_v40  ;;  %4096 = vmatpush3.bf16.msra.mxu1 %v4559_v41  ;;  %s5795_s20 = sld [smem:[#allocation9_spill]] }
  0x43   : > { %4081 = vmatprep.subr.bf16.mxu0 %v4747_v42  ;;  %4097 = vmatprep.subr.bf16.mxu1 %v4747_v42  ;;  %s5796_s22 = sld [smem:[#allocation10_spill]] }
  0x44   : > { %v846_v5 = vld [vmem:[#allocation2] sm:$0xff]  ;;  %v847_v7 = vld [vmem:[#allocation2 + $0x8] sm:$0xff]  ;;  %4083 = vmatprep.mubr.msk.bf16.mxu0 %vm4748_vm2, %v4747_v42  ;;  %4099 = vmatprep.mubr.msk.bf16.mxu1 %vm4748_vm2, %v4747_v42  ;;  %s5800_s0 = sld [smem:[#allocation22_spill]] }
  0x45   : > { %v848_v6 = vld [vmem:[#allocation2 + $0x10] sm:$0xff]  ;;  %v854_v8 = vsel %vm853_vm1, %v846_v5, 0.0  ;;  %v857_v10 = vsel %vm853_vm1, %v847_v7, 0.0  ;;  %v849_v11 = vld [vmem:[#allocation2 + $0x18] sm:$0xff] }
  0x46   : > { %v860_v9 = vsel %vm853_vm1, %v848_v6, 0.0  ;;  %v850_v12 = vld [vmem:[#allocation2 + $0x20] sm:$0xff]  ;;  %855 = vadd.xlane.f32.xlu0 %v854_v8  ;;  %v863_v13 = vsel %vm853_vm1, %v849_v11, 0.0  ;;  %4082 = vmatpush3.bf16.msra.mxu0 %v4560_v43  ;;  %s5792_s18 = scalar_lea.vmem %s5791_s28, %s4873_s30 }
  0x47   : > { %861 = vadd.xlane.f32.xlu1 %v860_v9  ;;  %v866_v14 = vsel %vm853_vm1, %v850_v12, 0.0  ;;  %4098 = vmatpush3.bf16.msra.mxu1 %v4561_v44  ;;  %v3754_v62 = vld [vmem:[%s5792_s18] ss:$0 sm:$0xff]  ;;  %s5794_s15 = scalar_lea.vmem %s5793_s27, %s4873_s30 }
  0x48   : > { %4111 = vmatprep.subr.bf16.mxu0 %v4747_v42  ;;  %4127 = vmatprep.subr.bf16.mxu1 %v4747_v42  ;;  %v3755_v3 = vld [vmem:[%s5794_s15] ss:$0 sm:$0xff] }
  0x4a   : > { %858 = vadd.xlane.f32.xlu0 %v857_v10  ;;  %s5801_s7 = scalar_lea.vmem %s5800_s0, %s4873_s30 }
  0x4b   : > { %864 = vadd.xlane.f32.xlu1 %v863_v13 }
  0x4e   : > { %867 = vadd.xlane.f32.xlu0 %v866_v14 }
  0xcf   : > { %v856_v15 = vpop.xlane.xlu0 %855 }
  0xd0   : > { %v862_v16 = vpop.xlane.xlu1 %861  ;;  %v870_v17 = vmul.f32 0.03125, %v856_v15 }
  0xd1   : > { %v872_v18 = vmul.f32 0.03125, %v862_v16 }
  0xd2   : > { %v4965_v19 = vsub.f32 %v846_v5, %v870_v17  ;;  %v4563_v17 = vld [vmem:[%s4900_s23] sm:$0xff]  }
  0xd3   : > { %v4967_v20 = vsub.f32 %v848_v6, %v872_v18  ;;  %v859_v21 = vpop.xlane.xlu0 %858 }
  0xd4   : > { %v865_v22 = vpop.xlane.xlu1 %864  ;;  %v871_v23 = vmul.f32 0.03125, %v859_v21  ;;  %v880_v25 = vmul.f32 %v4965_v19, %v4965_v19 }
  0xd5   : > { %v873_v24 = vmul.f32 0.03125, %v865_v22  ;;  %v882_v26 = vmul.f32 %v4967_v20, %v4967_v20 }
  0xd6   : > { %v876_v27 = vsub.f32 %v847_v7, %v871_v23  ;;  %v885_v29 = vsel %vm853_vm1, %v880_v25, 0.0 }
  0xd7   : > { %v4973_v28 = vsub.f32 %v849_v11, %v873_v24  ;;  %886 = vadd.xlane.f32.xlu1 %v885_v29  ;;  %v868_v30 = vpop.xlane.xlu0 %867  ;;  %v891_v32 = vsel %vm853_vm1, %v882_v26, 0.0 }
  0xd8   : > { %v874_v31 = vmul.f32 0.03125, %v868_v30  ;;  %v881_v33 = vmul.f32 %v876_v27, %v876_v27 }
  0xd9   : > { %v883_v34 = vmul.f32 %v4973_v28, %v4973_v28 }
  0xda   : > { %v4979_v35 = vsub.f32 %v850_v12, %v874_v31  ;;  %v888_v36 = vsel %vm853_vm1, %v881_v33, 0.0  ;;  %v4562_v12 = vld [vmem:[%s4900_s23 + $0x8] sm:$0xff]  }
  0xdb   : > { %892 = vadd.xlane.f32.xlu1 %v891_v32  ;;  %889 = vadd.xlane.f32.xlu0 %v888_v36  ;;  %v894_v37 = vsel %vm853_vm1, %v883_v34, 0.0 }
  0xdc   : > { %v884_v38 = vmul.f32 %v4979_v35, %v4979_v35 }
  0xde   : > { %v897_v39 = vsel %vm853_vm1, %v884_v38, 0.0 }
  0xdf   : > { %895 = vadd.xlane.f32.xlu0 %v894_v37  ;;  %898 = vadd.xlane.f32.xlu1 %v897_v39  ;;  %v3762_v39 = vld [vmem:[%s4911_s21] ss:$0 sm:$0xff] }
 0x160   : > { %v887_v45 = vpop.xlane.xlu1 %886 }
 0x161   : > { %v900_v46 = vmul.f32 0.03125, %v887_v45 }
 0x163   : > { %v905_v47 = vadd.f32 1e-05, %v900_v46 }
 0x164   : > { %v893_v48 = vpop.xlane.xlu1 %892  ;;  %v890_v49 = vpop.xlane.xlu0 %889 }
 0x165   : > { %4592 = vrsqrt.f32 %v905_v47  ;;  %v902_v50 = vmul.f32 0.03125, %v893_v48  ;;  %v901_v51 = vmul.f32 0.03125, %v890_v49 }
 0x167   : > { %v906_v52 = vadd.f32 1e-05, %v901_v51  ;;  %v907_v53 = vadd.f32 1e-05, %v902_v50 }
 0x168   : > { %v899_v54 = vpop.xlane.xlu1 %898  ;;  %v896_v55 = vpop.xlane.xlu0 %895 }
 0x169   : > { %v903_v56 = vmul.f32 0.03125, %v896_v55  ;;  %4594 = vrsqrt.f32 %v906_v52  ;;  %v904_v57 = vmul.f32 0.03125, %v899_v54 }
 0x16a   : > { %4596 = vrsqrt.f32 %v907_v53 }
 0x16b   : > { %v908_v58 = vadd.f32 1e-05, %v903_v56  ;;  %v909_v59 = vadd.f32 1e-05, %v904_v57 }
 0x16d   : > { %4598 = vrsqrt.f32 %v908_v58 }
 0x16e   : > { %4600 = vrsqrt.f32 %v909_v59 }
 0x172   : > { %v4593_v60 = vpop.eup %4592 }
 0x173   : > { %v915_v61 = vmul.f32 %v4593_v60, %v4965_v19 }
 0x175   : > { %v926_v0 = vmul.f32 %v3754_v62, %v915_v61 }
 0x176   : > { %v4595_v63 = vpop.eup %4594 }
 0x177   : > { %v916_v1 = vmul.f32 %v4595_v63, %v876_v27  ;;  %v4597_v2 = vpop.eup %4596  ;;  %v937_v6 = vadd.f32 %v3755_v3, %v926_v0 }
 0x178   : > { %v917_v7 = vmul.f32 %v4597_v2, %v4967_v20 }
 0x179   : > { %v927_v4 = vmul.f32 %v3754_v62, %v916_v1 }
 0x17a   : > { %v4599_v5 = vpop.eup %4598  ;;  %v928_v14 = vmul.f32 %v3754_v62, %v917_v7 }
 0x17b   : > { %v938_v8 = vadd.f32 %v3755_v3, %v927_v4  ;;  %v918_v9 = vmul.f32 %v4599_v5, %v4973_v28  ;;  %v4601_v13 = vpop.eup %4600 }
 0x17c   : > { %v919_v15 = vmul.f32 %v4601_v13, %v4979_v35  ;;  %v939_v18 = vadd.f32 %v3755_v3, %v928_v14  ;;  %v4564_v14 = vld [vmem:[%s4890_s25 + $0x18] sm:$0xff]  }
 0x17d   : > { %v5013_v10 = vpack.c.bf16 %v938_v8, %v937_v6  ;;  %v929_v11 = vmul.f32 %v3754_v62, %v918_v9  ;;  %v3768_v6 = vld [vmem:[%s4916_s19] ss:$0 sm:$0xff] }
 0x17e   : > { %v930_v19 = vmul.f32 %v3754_v62, %v919_v15 }
 0x17f   : > { %4084 = vmatmul.mubr.msk.bf16.vlgmr.msra.gmra.mxu0 %vm853_vm1, %v5013_v10  ;;  %4100 = vmatmul.mubr.msk.bf16.vlgmr.msra.gmra.mxu1 %vm853_vm1, %v5013_v10  ;;  %v940_v16 = vadd.f32 %v3755_v3, %v929_v11 }
 0x180   : > { %4087 = vmatprep.mubr.msk.bf16.mxu0 %vm4748_vm2, %v4747_v42  ;;  %4103 = vmatprep.mubr.msk.bf16.mxu1 %vm4748_vm2, %v4747_v42  ;;  %v941_v21 = vadd.f32 %v3755_v3, %v930_v19  ;;  %v3756_v3 = vld [vmem:[%s5795_s20] ss:$0 sm:$0xff] }
 0x181   : > { %4112 = vmatpush3.bf16.msra.mxu0 %v4562_v12  ;;  %v5027_v20 = vpack.c.bf16 %v940_v16, %v939_v18 }
 0x182   : > { %4113 = vmatprep.subr.bf16.mxu0 %v4747_v42  ;;  %v5038_v22 = vpack.c.bf16 %v941_v21, %v941_v21 }
 0x185   : > { %4114 = vmatpush3.bf16.msra.mxu0 %v4563_v17 }
 0x186   : > { %4145 = vmatprep.subr.bf16.mxu0 %v4747_v42 }
 0x187   : > { %4088 = vmatmul.mubr.msk.bf16.gmra.mxu0 %vm853_vm1, %v5027_v20  ;;  %4104 = vmatmul.mubr.msk.bf16.gmra.mxu1 %vm853_vm1, %v5027_v20 }
 0x188   : > { %4091 = vmatprep.mubr.msk.bf16.mxu0 %vm4748_vm2, %v4747_v42  ;;  %4107 = vmatprep.mubr.msk.bf16.mxu1 %vm4748_vm2, %v4747_v42 }
 0x18f   : > { %4092 = vmatmul.mubr.msk.bf16.gmra.mxu0 %vm853_vm1, %v5038_v22  ;;  %4108 = vmatmul.mubr.msk.bf16.gmra.mxu1 %vm853_vm1, %v5038_v22 }
 0x190   : > { %4115 = vmatprep.mubr.msk.bf16.mxu0 %vm4748_vm2, %v4747_v42  ;;  %4133 = vmatprep.mubr.msk.bf16.mxu1 %vm4748_vm2, %v4747_v42 }
 0x197   : > { %4116 = vmatmul.mubr.msk.bf16.vlgmr.msra.gmra.mxu0 %vm853_vm1, %v5013_v10 }
 0x198   : > { %4119 = vmatprep.mubr.msk.bf16.mxu0 %vm4748_vm2, %v4747_v42 }
 0x19f   : > { %4120 = vmatmul.mubr.msk.bf16.gmra.mxu0 %vm853_vm1, %v5027_v20 }
 0x1a0   : > { %4123 = vmatprep.mubr.msk.bf16.mxu0 %vm4748_vm2, %v4747_v42 }
 0x1a7   : > { %4124 = vmatmul.mubr.msk.bf16.gmra.mxu0 %vm853_vm1, %v5038_v22 }
 0x1a8   : > { %4151 = vmatprep.mubr.msk.bf16.mxu0 %vm4748_vm2, %v4747_v42 }
 0x23f   : > { %v1014_v23 = vpop.f32.mrf.mxu0  ;;  %v1093_v24 = vpop.f32.mrf.mxu1 }
 0x240   : > { %v1094_v61 = vadd.f32 %v3762_v39, %v1093_v24  ;;  %v1015_v8 = vadd.f32 %v3756_v3, %v1014_v23  ;;  %v4565_v23 = vld [vmem:[%s4890_s25 + $0x10] sm:$0xff]  }
 0x241   : > { %v4085_v25 = vpop.f32.mrf.mxu0  ;;  %v4101_v26 = vpop.f32.mrf.mxu1 }
 0x243   : > { %v1017_v27 = vpop.f32.mrf.mxu0  ;;  %v1096_v28 = vpop.f32.mrf.mxu1 }
 0x244   : > { %v1097_v58 = vadd.f32 %v3762_v39, %v1096_v28  ;;  %v1018_v5 = vadd.f32 %v3756_v3, %v1017_v27 }
 0x245   : > { %v4086_v29 = vpop.f32.mrf.mxu0  ;;  %v4102_v30 = vpop.f32.mrf.mxu1 }
 0x246   : > { %v1197_v63 = vpack.c.bf16 %v1097_v58, %v1094_v61  ;;  %v1194_v12 = vpack.c.bf16 %v1018_v5, %v1015_v8 }
 0x247   : > { %v5060_v31 = vpop.f32.mrf.mxu0  ;;  %v1101_v32 = vpop.f32.mrf.mxu1 }
 0x248   : > { %v1102_v53 = vadd.f32 %v3762_v39, %v1101_v32  ;;  %v1211_v2 = vsel %vm1200_vm3, %v1197_v63, 0  ;;  %v1023_v26 = vadd.f32 %v3756_v3, %v5060_v31  ;;  %v4566_v32 = vld [vmem:[%s4900_s23 + $0x18] sm:$0xff]  }
 0x249   : > { %v4089_v33 = vpop.f32.mrf.mxu0  ;;  %v4105_v34 = vpop.f32.mrf.mxu1 }
 0x24a   : > { %v4567_v33 = vld [vmem:[%s4900_s23 + $0x10] sm:$0xff]   ;;  %v945_v34 = vlaneseq }
 0x24b   : > { %v1025_v35 = vpop.f32.mrf.mxu0  ;;  %v1104_v36 = vpop.f32.mrf.mxu1 }
 0x24c   : > { %v1105_v49 = vadd.f32 %v3762_v39, %v1104_v36  ;;  %v1026_v21 = vadd.f32 %v3756_v3, %v1025_v35  ;;  %v5120_v35 = vand.u32 127, %v945_v34 }
 0x24d   : > { %v4090_v37 = vpop.f32.mrf.mxu0  ;;  %v4106_v38 = vpop.f32.mrf.mxu1 }
 0x24e   : > { %v1198_v55 = vpack.c.bf16 %v1105_v49, %v1102_v53  ;;  %v1195_v28 = vpack.c.bf16 %v1026_v21, %v1023_v26  ;;  %vm947_vm5 = vcmp.lt.s32.totalorder %v5120_v35, 33 }
 0x24f   : > { %v5063_v40 = vpop.f32.mrf.mxu0  ;;  %v1109_v41 = vpop.f32.mrf.mxu1 }
 0x250   : > { %v1110_v43 = vadd.f32 %v3762_v39, %v1109_v41  ;;  %v1214_v59 = vsel %vm1200_vm3, %v1198_v55, 0  ;;  %v1031_v30 = vadd.f32 %v3756_v3, %v5063_v40 }
 0x251   : > { %v4093_v44 = vpop.f32.mrf.mxu0  ;;  %v4109_v45 = vpop.f32.mrf.mxu1 }
 0x252   : > { %v1199_v46 = vpack.c.bf16 %v1110_v43, %v1110_v43  ;;  %v1196_v31 = vpack.c.bf16 %v1031_v30, %v1031_v30  ;;  %v3807_v30 = vld [vmem:[%s4916_s19 + $0x1] ss:$0 sm:$0xff] }
 0x253   : > { %v1033_v47 = vpop.f32.mrf.mxu0  ;;  %v1112_v48 = vpop.f32.mrf.mxu1 }
 0x254   : > { %v1217_v50 = vsel %vm1200_vm3, %v1199_v46, 0 }
 0x255   : > { %v4094_v51 = vpop.f32.mrf.mxu0  ;;  %v4110_v52 = vpop.f32.mrf.mxu1  ;;  %4128 = vmatpush3.bf16.xpose.msra.mxu1 %v1217_v50 }
 0x256   : > { %4129 = vmatprep.subr.bf16.mxu1 %v4747_v42 }
 0x257   : > { %v1172_v54 = vpop.f32.mrf.mxu0 }
 0x258   : > { %v1173_v27 = vadd.f32 %v3768_v6, %v1172_v54 }
 0x259   : > { %v4117_v56 = vpop.f32.mrf.mxu0 }
 0x25b   : > { %v1175_v57 = vpop.f32.mrf.mxu0 }
 0x25c   : > { %v1176_v24 = vadd.f32 %v3768_v6, %v1175_v57 }
 0x25d   : > { %v4118_v60 = vpop.f32.mrf.mxu0  ;;  %4130 = vmatpush3.bf16.xpose.msra.mxu1 %v1214_v59 }
 0x25e   : > { %4131 = vmatprep.subr.bf16.mxu1 %v4747_v42  ;;  %v1344_v29 = vpack.c.bf16 %v1176_v24, %v1173_v27 }
 0x25f   : > { %v1180_v62 = vpop.f32.mrf.mxu0 }
 0x260   : > { %v1181_v18 = vadd.f32 %v3768_v6, %v1180_v62 }
 0x261   : > { %v4121_v0 = vpop.f32.mrf.mxu0 }
 0x263   : > { %v1183_v1 = vpop.f32.mrf.mxu0 }
 0x264   : > { %v1184_v15 = vadd.f32 %v3768_v6, %v1183_v1  ;;  %v5154_v1 = vld [vmem:[%s5795_s20 + $0x1] ss:$0 sm:$0xff] }
 0x265   : > { %v4122_v4 = vpop.f32.mrf.mxu0  ;;  %4132 = vmatpush3.bf16.xpose.msra.mxu1 %v1211_v2 }
 0x266   : > { %4163 = vmatprep.subr.bf16.mxu1 %v4747_v42  ;;  %v1345_v25 = vpack.c.bf16 %v1184_v15, %v1181_v18 }
 0x267   : > { %v1188_v7 = vpop.f32.mrf.mxu0 }
 0x268   : > { %v1189_v9 = vadd.f32 %v3768_v6, %v1188_v7 }
 0x269   : > { %v4125_v11 = vpop.f32.mrf.mxu0 }
 0x26a   : > { %v1346_v13 = vpack.c.bf16 %v1189_v9, %v1189_v9 }
 0x26b   : > { %v1191_v16 = vpop.f32.mrf.mxu0 }
 0x26c   : > { %v1358_v17 = vsel %vm1356_vm4, %v1346_v13, 0  ;;  %4134 = vmatmul.mubr.msk.bf16.vlgmr.msra.gmra.mxu1 %vm1200_vm3, %v1194_v12 }
 0x26d   : > { %v4126_v19 = vpop.f32.mrf.mxu0  ;;  %4146 = vmatpush3.bf16.msra.mxu0 %v1358_v17  ;;  %4137 = vmatprep.mubr.msk.bf16.mxu1 %vm4748_vm2, %v4747_v42 }
 0x26e   : > { %4147 = vmatprep.subr.bf16.mxu0 %v4747_v42  ;;  %4164 = vmatpush3.bf16.msra.mxu1 %v4564_v14 }
 0x26f   : > { %4165 = vmatprep.subr.bf16.mxu1 %v4747_v42 }
 0x271   : > { %4148 = vmatpush3.bf16.msra.mxu0 %v1345_v25 }
 0x272   : > { %4149 = vmatprep.subr.bf16.mxu0 %v4747_v42  ;;  %4166 = vmatpush3.bf16.msra.mxu1 %v4565_v23 }
 0x273   : > { %4195 = vmatprep.subr.bf16.mxu1 %v4747_v42 }
 0x274   : > { %4138 = vmatmul.mubr.msk.bf16.gmra.mxu1 %vm1200_vm3, %v1195_v28 }
 0x275   : > { %4150 = vmatpush3.bf16.msra.mxu0 %v1344_v29  ;;  %4141 = vmatprep.mubr.msk.bf16.mxu1 %vm4748_vm2, %v4747_v42 }
 0x276   : > { %4179 = vmatprep.subr.bf16.mxu0 %v4747_v42 }
 0x27c   : > { %4142 = vmatmul.mubr.msk.bf16.gmra.mxu1 %vm1200_vm3, %v1196_v31 }
 0x27d   : > { %4167 = vmatprep.mubr.msk.bf16.mxu1 %vm4748_vm2, %v4747_v42 }
 0x284   : > { %4168 = vmatmul.mubr.msk.bf16.vlgmr.msra.gmra.mxu1 %vm853_vm1, %v5013_v10 }
 0x285   : > { %4171 = vmatprep.mubr.msk.bf16.mxu1 %vm4748_vm2, %v4747_v42  ;;  %4196 = vmatpush3.bf16.msra.mxu1 %v4566_v32 }
 0x286   : > { %4197 = vmatprep.subr.bf16.mxu1 %v4747_v42 }
 0x289   : > { %4198 = vmatpush3.bf16.msra.mxu1 %v4567_v33 }
 0x28a   : > { %4229 = vmatprep.subr.bf16.mxu1 %v4747_v42 }
 0x28c   : > { %4172 = vmatmul.mubr.msk.bf16.gmra.mxu1 %vm853_vm1, %v5027_v20 }
 0x28d   : > { %4175 = vmatprep.mubr.msk.bf16.mxu1 %vm4748_vm2, %v4747_v42 }
 0x294   : > { %4176 = vmatmul.mubr.msk.bf16.gmra.mxu1 %vm853_vm1, %v5038_v22 }
 0x295   : > { %4199 = vmatprep.mubr.msk.bf16.mxu1 %vm4748_vm2, %v4747_v42 }
 0x29c   : > { %4200 = vmatmul.mubr.msk.bf16.vlgmr.msra.gmra.mxu1 %vm853_vm1, %v5013_v10 }
 0x29d   : > { %4203 = vmatprep.mubr.msk.bf16.mxu1 %vm4748_vm2, %v4747_v42 }
 0x2a4   : > { %4204 = vmatmul.mubr.msk.bf16.gmra.mxu1 %vm853_vm1, %v5027_v20 }
 0x2a5   : > { %4207 = vmatprep.mubr.msk.bf16.mxu1 %vm4748_vm2, %v4747_v42 }
 0x2ac   : > { %4208 = vmatmul.mubr.msk.bf16.gmra.mxu1 %vm853_vm1, %v5038_v22 }
 0x2ad   : > { %4235 = vmatprep.mubr.msk.bf16.mxu1 %vm4748_vm2, %v4747_v42 }
 0x32c   : > { %v1253_v36 = vpop.f32.mrf.mxu1 }
 0x32d   : > { %v1275_v37 = vmul.f32 0.35355338, %v1253_v36 }
 0x32e   : > { %v4135_v38 = vpop.f32.mrf.mxu1 }
 0x32f   : > { %v5125_v39 = vsel %vm947_vm5, %v1275_v37, -1e+30 }
 0x330   : > { %v1256_v40 = vpop.f32.mrf.mxu1  ;;  %v1286_v41 = vsel %vm1285_vm6, %v5125_v39, -inf }
 0x331   : > { %v1276_v43 = vmul.f32 0.35355338, %v1256_v40  ;;  %1287 = vmax.xlane.f32.xlu0 %v1286_v41 }
 0x332   : > { %v4136_v44 = vpop.f32.mrf.mxu1 }
 0x333   : > { %v5131_v45 = vsel %vm947_vm5, %v1276_v43, -1e+30 }
 0x334   : > { %v1261_v46 = vpop.f32.mrf.mxu1  ;;  %v1289_v47 = vsel %vm1285_vm6, %v5131_v45, -inf }
 0x335   : > { %v1277_v48 = vmul.f32 0.35355338, %v1261_v46  ;;  %1290 = vmax.xlane.f32.xlu1 %v1289_v47 }
 0x336   : > { %v4139_v49 = vpop.f32.mrf.mxu1 }
 0x337   : > { %v5137_v50 = vsel %vm947_vm5, %v1277_v48, -1e+30 }
 0x338   : > { %v1264_v51 = vpop.f32.mrf.mxu1  ;;  %v1292_v52 = vsel %vm1285_vm6, %v5137_v50, -inf }
 0x339   : > { %v1278_v53 = vmul.f32 0.35355338, %v1264_v51  ;;  %1293 = vmax.xlane.f32.xlu0 %v1292_v52 }
 0x33a   : > { %v4140_v54 = vpop.f32.mrf.mxu1 }
 0x33b   : > { %v5143_v55 = vsel %vm947_vm5, %v1278_v53, -1e+30 }
 0x33c   : > { %v1269_v56 = vpop.f32.mrf.mxu1  ;;  %v1295_v57 = vsel %vm1285_vm6, %v5143_v55, -inf }
 0x33d   : > { %v1279_v58 = vmul.f32 0.35355338, %v1269_v56  ;;  %1296 = vmax.xlane.f32.xlu1 %v1295_v57 }
 0x33e   : > { %v4143_v59 = vpop.f32.mrf.mxu1 }
 0x33f   : > { %v5149_v60 = vsel %vm947_vm5, %v1279_v58, -1e+30 }
 0x340   : > { %v1272_v61 = vpop.f32.mrf.mxu1  ;;  %v1298_v62 = vsel %vm1285_vm6, %v5149_v60, -inf }
 0x341   : > { %1299 = vmax.xlane.f32.xlu0 %v1298_v62 }
 0x342   : > { %v4144_v63 = vpop.f32.mrf.mxu1 }
 0x344   : > { %v1479_v0 = vpop.f32.mrf.mxu1 }
 0x345   : > { %v5157_v4 = vadd.f32 %v5154_v1, %v1479_v0 }
 0x346   : > { %v4169_v2 = vpop.f32.mrf.mxu1 }
 0x348   : > { %v1482_v3 = vpop.f32.mrf.mxu1 }
 0x349   : > { %v5160_v5 = vadd.f32 %v5154_v1, %v1482_v3 }
 0x34a   : > { %v4170_v6 = vpop.f32.mrf.mxu1 }
 0x34b   : > { %v1663_v7 = vpack.c.bf16 %v5160_v5, %v5157_v4 }
 0x34c   : > { %v1487_v8 = vpop.f32.mrf.mxu1 }
 0x34d   : > { %v5165_v12 = vadd.f32 %v5154_v1, %v1487_v8 }
 0x34e   : > { %v4173_v9 = vpop.f32.mrf.mxu1 }
 0x350   : > { %v1490_v11 = vpop.f32.mrf.mxu1 }
 0x351   : > { %v5168_v13 = vadd.f32 %v5154_v1, %v1490_v11 }
 0x352   : > { %v4174_v14 = vpop.f32.mrf.mxu1 }
 0x353   : > { %v1664_v15 = vpack.c.bf16 %v5168_v13, %v5165_v12 }
 0x354   : > { %v5172_v16 = vpop.f32.mrf.mxu1 }
 0x356   : > { %v4177_v17 = vpop.f32.mrf.mxu1 }
 0x358   : > { %v1498_v18 = vpop.f32.mrf.mxu1 }
 0x35a   : > { %v4178_v19 = vpop.f32.mrf.mxu1 }
 0x35c   : > { %v1641_v21 = vpop.f32.mrf.mxu1 }
 0x35d   : > { %v1642_v46 = vadd.f32 %v3807_v30, %v1641_v21 }
 0x35e   : > { %v4201_v23 = vpop.f32.mrf.mxu1 }
 0x360   : > { %v1644_v24 = vpop.f32.mrf.mxu1 }
 0x361   : > { %v1645_v43 = vadd.f32 %v3807_v30, %v1644_v24 }
 0x362   : > { %v4202_v25 = vpop.f32.mrf.mxu1 }
 0x363   : > { %v1811_v47 = vpack.c.bf16 %v1645_v43, %v1642_v46 }
 0x364   : > { %v1649_v26 = vpop.f32.mrf.mxu1 }
 0x365   : > { %v1650_v40 = vadd.f32 %v3807_v30, %v1649_v26 }
 0x366   : > { %v4205_v27 = vpop.f32.mrf.mxu1 }
 0x367   : > { %v4568_v27 = vld [vmem:[%s4895_s1 + $0x18] sm:$0xff]  }
 0x368   : > { %v1652_v28 = vpop.f32.mrf.mxu1 }
 0x369   : > { %v1653_v36 = vadd.f32 %v3807_v30, %v1652_v28 }
 0x36a   : > { %v4206_v29 = vpop.f32.mrf.mxu1 }
 0x36b   : > { %v1812_v44 = vpack.c.bf16 %v1653_v36, %v1650_v40 }
 0x36c   : > { %v1657_v31 = vpop.f32.mrf.mxu1 }
 0x36d   : > { %v1658_v32 = vadd.f32 %v3807_v30, %v1657_v31  ;;  %v4569_v30 = vld [vmem:[%s4895_s1 + $0x10] sm:$0xff]  }
 0x36e   : > { %v4209_v33 = vpop.f32.mrf.mxu1 }
 0x36f   : > { %v1813_v34 = vpack.c.bf16 %v1658_v32, %v1658_v32 }
 0x370   : > { %v1660_v37 = vpop.f32.mrf.mxu1 }
 0x371   : > { %v1824_v38 = vsel %vm1356_vm4, %v1813_v34, 0 }
 0x372   : > { %v4210_v41 = vpop.f32.mrf.mxu1  ;;  %4230 = vmatpush3.bf16.msra.mxu1 %v1824_v38 }
 0x373   : > { %4231 = vmatprep.subr.bf16.mxu1 %v4747_v42 }
 0x376   : > { %4232 = vmatpush3.bf16.msra.mxu1 %v1812_v44 }
 0x377   : > { %4233 = vmatprep.subr.bf16.mxu1 %v4747_v42 }
 0x37a   : > { %4234 = vmatpush3.bf16.msra.mxu1 %v1811_v47 }
 0x37b   : > { %4261 = vmatprep.subr.bf16.mxu1 %v4747_v42 }
 0x3ba   : > { %v1288_v48 = vpop.xlane.xlu0 %1287 }
 0x3bb   : > { %v1301_v49 = vsub.f32 %v5125_v39, %v1288_v48 }
 0x3bd   : > { %v1306_v51 = vmul.f32 1.442695, %v1301_v49 }
 0x3be   : > { %v1291_v52 = vpop.xlane.xlu1 %1290 }
 0x3bf   : > { %4602 = vpow2.f32 %v1306_v51  ;;  %v1302_v53 = vsub.f32 %v5131_v45, %v1291_v52 }
 0x3c1   : > { %v1308_v54 = vmul.f32 1.442695, %v1302_v53 }
 0x3c2   : > { %v1294_v56 = vpop.xlane.xlu0 %1293 }
 0x3c3   : > { %4604 = vpow2.f32 %v1308_v54  ;;  %v1303_v57 = vsub.f32 %v5137_v50, %v1294_v56 }
 0x3c5   : > { %v1310_v58 = vmul.f32 1.442695, %v1303_v57 }
 0x3c6   : > { %v1297_v59 = vpop.xlane.xlu1 %1296 }
 0x3c7   : > { %4606 = vpow2.f32 %v1310_v58  ;;  %v1304_v61 = vsub.f32 %v5143_v55, %v1297_v59 }
 0x3c9   : > { %v1312_v62 = vmul.f32 1.442695, %v1304_v61 }
 0x3ca   : > { %v1300_v63 = vpop.xlane.xlu0 %1299 }
 0x3cb   : > { %4608 = vpow2.f32 %v1312_v62  ;;  %v1305_v39 = vsub.f32 %v5149_v60, %v1300_v63 }
 0x3cc   : > { %v4603_v0 = vpop.eup %4602 }
 0x3cd   : > { %v1314_v2 = vmul.f32 1.442695, %v1305_v39  ;;  %v1316_v3 = vsel %vm1285_vm6, %v4603_v0, 0.0 }
 0x3ce   : > { %1317 = vadd.xlane.f32.xlu1 %v1316_v3  ;;  %v3796_v3 = vld [vmem:[%s4911_s21 + $0x1] ss:$0 sm:$0xff] }
 0x3cf   : > { %4610 = vpow2.f32 %v1314_v2 }
 0x3d0   : > { %v4605_v45 = vpop.eup %4604 }
 0x3d1   : > { %v1319_v6 = vsel %vm1285_vm6, %v4605_v45, 0.0 }
 0x3d2   : > { %1320 = vadd.xlane.f32.xlu0 %v1319_v6 }
 0x3d4   : > { %v4607_v50 = vpop.eup %4606 }
 0x3d5   : > { %v1322_v8 = vsel %vm1285_vm6, %v4607_v50, 0.0 }
 0x3d6   : > { %1323 = vadd.xlane.f32.xlu1 %v1322_v8 }
 0x3d8   : > { %v4609_v55 = vpop.eup %4608 }
 0x3d9   : > { %v1325_v9 = vsel %vm1285_vm6, %v4609_v55, 0.0 }
 0x3da   : > { %1326 = vadd.xlane.f32.xlu0 %v1325_v9 }
 0x3dc   : > { %v4611_v11 = vpop.eup %4610 }
 0x3dd   : > { %v1328_v60 = vsel %vm1285_vm6, %v4611_v11, 0.0 }
 0x3de   : > { %1329 = vadd.xlane.f32.xlu1 %v1328_v60 }
 0x457   : > { %v1318_v14 = vpop.xlane.xlu1 %1317 }
 0x458   : > { %4612 = vrcp.f32 %v1318_v14 }
 0x45b   : > { %v1321_v17 = vpop.xlane.xlu0 %1320 }
 0x45c   : > { %4614 = vrcp.f32 %v1321_v17 }
 0x45f   : > { %v1324_v18 = vpop.xlane.xlu1 %1323 }
 0x460   : > { %4616 = vrcp.f32 %v1324_v18 }
 0x463   : > { %v1327_v19 = vpop.xlane.xlu0 %1326 }
 0x464   : > { %4618 = vrcp.f32 %v1327_v19 }
 0x465   : > { %v4613_v21 = vpop.eup %4612 }
 0x466   : > { %v1336_v25 = vmul.f32 %v4613_v21, %v4603_v0 }
 0x467   : > { %v1330_v23 = vpop.xlane.xlu1 %1329 }
 0x468   : > { %4620 = vrcp.f32 %v1330_v23 }
 0x469   : > { %v4615_v24 = vpop.eup %4614 }
 0x46a   : > { %v1337_v26 = vmul.f32 %v4615_v24, %v4605_v45 }
 0x46c   : > { %v1341_v28 = vpack.c.bf16 %v1337_v26, %v1336_v25  ;;  %v1496_v25 = vadd.f32 %v5154_v1, %v5172_v16 }
 0x46d   : > { %v4617_v29 = vpop.eup %4616 }
 0x46e   : > { %4152 = vmatmul.mubr.msk.bf16.vlgmr.msra.gmra.mxu0 %vm1285_vm6, %v1341_v28  ;;  %v1338_v32 = vmul.f32 %v4617_v29, %v4607_v50  ;;  %v1665_v26 = vpack.c.bf16 %v1496_v25, %v1496_v25 }
 0x46f   : > { %4180 = vmatpush3.bf16.msra.mxu0 %v4568_v27  ;;  %4155 = vmatprep.mubr.msk.bf16.mxu0 %vm4748_vm2, %v4747_v42 }
 0x470   : > { %4181 = vmatprep.subr.bf16.mxu0 %v4747_v42 }
 0x471   : > { %v4619_v31 = vpop.eup %4618 }
 0x472   : > { %v1339_v33 = vmul.f32 %v4619_v31, %v4609_v55 }
 0x473   : > { %4182 = vmatpush3.bf16.msra.mxu0 %v4569_v30 }
 0x474   : > { %v1342_v34 = vpack.c.bf16 %v1339_v33, %v1338_v32  ;;  %4211 = vmatprep.subr.bf16.mxu0 %v4747_v42 }
 0x475   : > { %v4621_v36 = vpop.eup %4620 }
 0x476   : > { %4156 = vmatmul.mubr.msk.bf16.gmra.mxu0 %vm1285_vm6, %v1342_v34  ;;  %v1340_v37 = vmul.f32 %v4621_v36, %v4611_v11 }
 0x477   : > { %4159 = vmatprep.mubr.msk.bf16.mxu0 %vm4748_vm2, %v4747_v42 }
 0x478   : > { %v1343_v38 = vpack.c.bf16 %v1340_v37, %v1340_v37 }
 0x47e   : > { %4160 = vmatmul.mubr.msk.bf16.gmra.mxu0 %vm1285_vm6, %v1343_v38 }
 0x47f   : > { %4183 = vmatprep.mubr.msk.bf16.mxu0 %vm4748_vm2, %v4747_v42 }
 0x486   : > { %4184 = vmatmul.mubr.msk.bf16.vlgmr.msra.gmra.mxu0 %vm853_vm1, %v5013_v10 }
 0x487   : > { %4187 = vmatprep.mubr.msk.bf16.mxu0 %vm4748_vm2, %v4747_v42 }
 0x48e   : > { %4188 = vmatmul.mubr.msk.bf16.gmra.mxu0 %vm853_vm1, %v5027_v20 }
 0x48f   : > { %4191 = vmatprep.mubr.msk.bf16.mxu0 %vm4748_vm2, %v4747_v42 }
 0x496   : > { %4192 = vmatmul.mubr.msk.bf16.gmra.mxu0 %vm853_vm1, %v5038_v22 }
 0x497   : > { %4217 = vmatprep.mubr.msk.bf16.mxu0 %vm4748_vm2, %v4747_v42 }
 0x52e   : > { %v5214_v40 = vpop.f32.mrf.mxu0 }
 0x530   : > { %v4153_v41 = vpop.f32.mrf.mxu0 }
 0x532   : > { %v5216_v43 = vpop.f32.mrf.mxu0 }
 0x533   : > { %v1416_v44 = vpack.c.bf16 %v5216_v43, %v5214_v40 }
 0x534   : > { %v4154_v46 = vpop.f32.mrf.mxu0 }
 0x536   : > { %v5220_v47 = vpop.f32.mrf.mxu0 }
 0x538   : > { %v4157_v48 = vpop.f32.mrf.mxu0 }
 0x53a   : > { %v5222_v49 = vpop.f32.mrf.mxu0 }
 0x53b   : > { %v1417_v51 = vpack.c.bf16 %v5222_v49, %v5220_v47  ;;  %v4572_v49 = vld [vmem:[%s4890_s25 + $0x28] sm:$0xff]  }
 0x53c   : > { %v4158_v52 = vpop.f32.mrf.mxu0 }
 0x53e   : > { %v5226_v53 = vpop.f32.mrf.mxu0 }
 0x53f   : > { %v1418_v40 = vpack.c.bf16 %v5226_v53, %v5226_v53 }
 0x540   : > { %v4161_v54 = vpop.f32.mrf.mxu0 }
 0x542   : > { %v1413_v56 = vpop.f32.mrf.mxu0 }
 0x544   : > { %v4162_v57 = vpop.f32.mrf.mxu0 }
 0x546   : > { %v1560_v58 = vpop.f32.mrf.mxu0 }
 0x547   : > { %v1561_v21 = vadd.f32 %v3796_v3, %v1560_v58 }
 0x548   : > { %v4185_v59 = vpop.f32.mrf.mxu0 }
 0x54a   : > { %v1563_v61 = vpop.f32.mrf.mxu0 }
 0x54b   : > { %v1564_v18 = vadd.f32 %v3796_v3, %v1563_v61 }
 0x54c   : > { %v4186_v62 = vpop.f32.mrf.mxu0 }
 0x54d   : > { %v1666_v23 = vpack.c.bf16 %v1564_v18, %v1561_v21 }
 0x54e   : > { %v1568_v63 = vpop.f32.mrf.mxu0 }
 0x54f   : > { %v1569_v14 = vadd.f32 %v3796_v3, %v1568_v63  ;;  %v1679_v24 = vsel %vm1200_vm3, %v1666_v23, 0 }
 0x550   : > { %v4189_v39 = vpop.f32.mrf.mxu0 }
 0x552   : > { %v1571_v0 = vpop.f32.mrf.mxu0 }
 0x553   : > { %v1572_v9 = vadd.f32 %v3796_v3, %v1571_v0 }
 0x554   : > { %v4190_v2 = vpop.f32.mrf.mxu0 }
 0x555   : > { %v1667_v17 = vpack.c.bf16 %v1572_v9, %v1569_v14 }
 0x556   : > { %v1576_v45 = vpop.f32.mrf.mxu0 }
 0x557   : > { %v1577_v6 = vadd.f32 %v3796_v3, %v1576_v45  ;;  %v1682_v19 = vsel %vm1200_vm3, %v1667_v17, 0 }
 0x558   : > { %v4193_v50 = vpop.f32.mrf.mxu0 }
 0x559   : > { %v1668_v8 = vpack.c.bf16 %v1577_v6, %v1577_v6 }
 0x55a   : > { %v1579_v55 = vpop.f32.mrf.mxu0 }
 0x55b   : > { %v1685_v11 = vsel %vm1200_vm3, %v1668_v8, 0 }
 0x55c   : > { %v4194_v60 = vpop.f32.mrf.mxu0  ;;  %4212 = vmatpush3.bf16.xpose.msra.mxu0 %v1685_v11 }
 0x55d   : > { %4213 = vmatprep.subr.bf16.mxu0 %v4747_v42 }
 0x564   : > { %4214 = vmatpush3.bf16.xpose.msra.mxu0 %v1682_v19 }
 0x565   : > { %4215 = vmatprep.subr.bf16.mxu0 %v4747_v42 }
 0x56c   : > { %4216 = vmatpush3.bf16.xpose.msra.mxu0 %v1679_v24 }
 0x56d   : > { %4247 = vmatprep.subr.bf16.mxu0 %v4747_v42 }
 0x573   : > { %4218 = vmatmul.mubr.msk.bf16.vlgmr.msra.gmra.mxu0 %vm1200_vm3, %v1663_v7 }
 0x574   : > { %4221 = vmatprep.mubr.msk.bf16.mxu0 %vm4748_vm2, %v4747_v42 }
 0x57b   : > { %4222 = vmatmul.mubr.msk.bf16.gmra.mxu0 %vm1200_vm3, %v1664_v15 }
 0x57c   : > { %4225 = vmatprep.mubr.msk.bf16.mxu0 %vm4748_vm2, %v4747_v42 }
 0x583   : > { %4226 = vmatmul.mubr.msk.bf16.gmra.mxu0 %vm1200_vm3, %v1665_v26 }
 0x584   : > { %4249 = vmatprep.mubr.msk.bf16.mxu0 %vm4748_vm2, %v4747_v42 }
 0x633   : > { %v1721_v4 = vpop.f32.mrf.mxu0 }
 0x634   : > { %v1743_v5 = vmul.f32 0.35355338, %v1721_v4  ;;  %v3819_v4 = vld [vmem:[%s5796_s22 + $0x4] sm:$0xf] }
 0x635   : > { %v4219_v7 = vpop.f32.mrf.mxu0 }
 0x636   : > { %v1748_v12 = vsel %vm947_vm5, %v1743_v5, -1e+30  ;;  %v1897_v5 = vsel %vm1356_vm4, %v3819_v4, 0 }
 0x637   : > { %v1724_v13 = vpop.f32.mrf.mxu0  ;;  %v1753_v15 = vsel %vm1285_vm6, %v1748_v12, -inf  ;;  %4248 = vmatpush3.bf16.msra.mxu0 %v1897_v5 }
 0x638   : > { %v1744_v27 = vmul.f32 0.35355338, %v1724_v13  ;;  %1754 = vmax.xlane.f32.xlu0 %v1753_v15  ;;  %4275 = vmatprep.subr.bf16.mxu0 %v4747_v42 }
 0x639   : > { %v4220_v28 = vpop.f32.mrf.mxu0 }
 0x63a   : > { %v1749_v1 = vsel %vm947_vm5, %v1744_v27, -1e+30 }
 0x63b   : > { %v1729_v16 = vpop.f32.mrf.mxu0  ;;  %v1756_v29 = vsel %vm1285_vm6, %v1749_v1, -inf }
 0x63c   : > { %v1745_v30 = vmul.f32 0.35355338, %v1729_v16  ;;  %1757 = vmax.xlane.f32.xlu1 %v1756_v29  ;;  %v1419_v16 = vld [vmem:[%s5796_s22] sm:$0xf] }
 0x63d   : > { %v4223_v31 = vpop.f32.mrf.mxu0 }
 0x63e   : > { %v1750_v32 = vsel %vm947_vm5, %v1745_v30, -1e+30 }
 0x63f   : > { %v1732_v33 = vpop.f32.mrf.mxu0  ;;  %v1759_v34 = vsel %vm1285_vm6, %v1750_v32, -inf }
 0x640   : > { %v1746_v36 = vmul.f32 0.35355338, %v1732_v33  ;;  %1760 = vmax.xlane.f32.xlu0 %v1759_v34 }
 0x641   : > { %v4224_v37 = vpop.f32.mrf.mxu0 }
 0x642   : > { %v1751_v38 = vsel %vm947_vm5, %v1746_v36, -1e+30 }
 0x643   : > { %v1737_v41 = vpop.f32.mrf.mxu0  ;;  %v1762_v46 = vsel %vm1285_vm6, %v1751_v38, -inf }
 0x644   : > { %v1747_v48 = vmul.f32 0.35355338, %v1737_v41  ;;  %1763 = vmax.xlane.f32.xlu1 %v1762_v46 }
 0x645   : > { %v4227_v52 = vpop.f32.mrf.mxu0 }
 0x646   : > { %v1752_v54 = vsel %vm947_vm5, %v1747_v48, -1e+30  ;;  %v4570_v52 = vld [vmem:[%s4895_s1 + $0x28] sm:$0xff]  }
 0x647   : > { %v1740_v56 = vpop.f32.mrf.mxu0  ;;  %v1765_v57 = vsel %vm1285_vm6, %v1752_v54, -inf }
 0x648   : > { %1766 = vmax.xlane.f32.xlu0 %v1765_v57  ;;  %v4573_v57 = vld [vmem:[%s4890_s25 + $0x20] sm:$0xff]  }
 0x649   : > { %v4228_v58 = vpop.f32.mrf.mxu0 }
 0x6c1   : > { %v1755_v59 = vpop.xlane.xlu0 %1754 }
 0x6c2   : > { %v1768_v61 = vsub.f32 %v1748_v12, %v1755_v59 }
 0x6c4   : > { %v1773_v62 = vmul.f32 1.442695, %v1768_v61 }
 0x6c5   : > { %v1758_v63 = vpop.xlane.xlu1 %1757 }
 0x6c6   : > { %4622 = vpow2.f32 %v1773_v62  ;;  %v1769_v39 = vsub.f32 %v1749_v1, %v1758_v63 }
 0x6c8   : > { %v1775_v0 = vmul.f32 1.442695, %v1769_v39 }
 0x6c9   : > { %v1761_v2 = vpop.xlane.xlu0 %1760 }
 0x6ca   : > { %4624 = vpow2.f32 %v1775_v0  ;;  %v1770_v3 = vsub.f32 %v1750_v32, %v1761_v2  ;;  %v1965_v32 = vsel %vm1356_vm4, %v1419_v16, 0 }
 0x6cc   : > { %v1777_v45 = vmul.f32 1.442695, %v1770_v3 }
 0x6cd   : > { %v1764_v6 = vpop.xlane.xlu1 %1763 }
 0x6ce   : > { %4626 = vpow2.f32 %v1777_v45  ;;  %v1771_v50 = vsub.f32 %v1751_v38, %v1764_v6 }
 0x6d0   : > { %v1779_v8 = vmul.f32 1.442695, %v1771_v50 }
 0x6d1   : > { %v1767_v55 = vpop.xlane.xlu0 %1766 }
 0x6d2   : > { %4628 = vpow2.f32 %v1779_v8  ;;  %v1772_v9 = vsub.f32 %v1752_v54, %v1767_v55  ;;  %v4571_v54 = vld [vmem:[%s4895_s1 + $0x20] sm:$0xff]   ;;  %v4574_v8 = vld [vmem:[%s4900_s23 + $0x28] sm:$0xff]  }
 0x6d3   : > { %v4623_v11 = vpop.eup %4622 }
 0x6d4   : > { %v1781_v60 = vmul.f32 1.442695, %v1772_v9  ;;  %v1783_v14 = vsel %vm1285_vm6, %v4623_v11, 0.0 }
 0x6d5   : > { %1784 = vadd.xlane.f32.xlu1 %v1783_v14 }
 0x6d6   : > { %4630 = vpow2.f32 %v1781_v60 }
 0x6d7   : > { %v4625_v17 = vpop.eup %4624 }
 0x6d8   : > { %v1786_v18 = vsel %vm1285_vm6, %v4625_v17, 0.0 }
 0x6d9   : > { %1787 = vadd.xlane.f32.xlu0 %v1786_v18 }
 0x6db   : > { %v4627_v19 = vpop.eup %4626 }
 0x6dc   : > { %v1789_v21 = vsel %vm1285_vm6, %v4627_v19, 0.0 }
 0x6dd   : > { %1790 = vadd.xlane.f32.xlu1 %v1789_v21 }
 0x6df   : > { %v4629_v23 = vpop.eup %4628 }
 0x6e0   : > { %v1792_v24 = vsel %vm1285_vm6, %v4629_v23, 0.0 }
 0x6e1   : > { %1793 = vadd.xlane.f32.xlu0 %v1792_v24 }
 0x6e3   : > { %v4631_v25 = vpop.eup %4630 }
 0x6e4   : > { %v1795_v26 = vsel %vm1285_vm6, %v4631_v25, 0.0 }
 0x6e5   : > { %1796 = vadd.xlane.f32.xlu1 %v1795_v26 }
 0x75e   : > { %v1785_v7 = vpop.xlane.xlu1 %1784 }
 0x75f   : > { %4632 = vrcp.f32 %v1785_v7 }
 0x762   : > { %v1788_v12 = vpop.xlane.xlu0 %1787 }
 0x763   : > { %4634 = vrcp.f32 %v1788_v12 }
 0x766   : > { %v1791_v13 = vpop.xlane.xlu1 %1790 }
 0x767   : > { %4636 = vrcp.f32 %v1791_v13 }
 0x76a   : > { %v1794_v15 = vpop.xlane.xlu0 %1793 }
 0x76b   : > { %4638 = vrcp.f32 %v1794_v15  ;;  %v3842_v15 = vld [vmem:[%s4911_s21 + $0x2] ss:$0 sm:$0xff] }
 0x76c   : > { %v4633_v27 = vpop.eup %4632 }
 0x76d   : > { %v1803_v29 = vmul.f32 %v4633_v27, %v4623_v11  ;;  %v4575_v11 = vld [vmem:[%s4900_s23 + $0x20] sm:$0xff]  }
 0x76e   : > { %v1797_v28 = vpop.xlane.xlu1 %1796 }
 0x76f   : > { %4640 = vrcp.f32 %v1797_v28 }
 0x770   : > { %v4635_v1 = vpop.eup %4634 }
 0x771   : > { %v1804_v30 = vmul.f32 %v4635_v1, %v4625_v17 }
 0x773   : > { %v1808_v31 = vpack.c.bf16 %v1804_v30, %v1803_v29 }
 0x774   : > { %v4637_v33 = vpop.eup %4636 }
 0x775   : > { %4236 = vmatmul.mubr.msk.bf16.vlgmr.msra.gmra.mxu1 %vm1285_vm6, %v1808_v31  ;;  %v1805_v36 = vmul.f32 %v4637_v33, %v4627_v19 }
 0x776   : > { %4239 = vmatprep.mubr.msk.bf16.mxu1 %vm4748_vm2, %v4747_v42  ;;  %4262 = vmatpush3.bf16.msra.mxu1 %v1965_v32 }
 0x777   : > { %4291 = vmatprep.subr.bf16.mxu1 %v4747_v42 }
 0x778   : > { %v4639_v34 = vpop.eup %4638 }
 0x779   : > { %v1806_v37 = vmul.f32 %v4639_v34, %v4629_v23 }
 0x77b   : > { %v1809_v38 = vpack.c.bf16 %v1806_v37, %v1805_v36 }
 0x77c   : > { %v4641_v41 = vpop.eup %4640 }
 0x77d   : > { %4240 = vmatmul.mubr.msk.bf16.gmra.mxu1 %vm1285_vm6, %v1809_v38  ;;  %v1807_v46 = vmul.f32 %v4641_v41, %v4631_v25 }
 0x77e   : > { %4243 = vmatprep.mubr.msk.bf16.mxu1 %vm4748_vm2, %v4747_v42 }
 0x77f   : > { %v1810_v48 = vpack.c.bf16 %v1807_v46, %v1807_v46 }
 0x785   : > { %4244 = vmatmul.mubr.msk.bf16.gmra.mxu1 %vm1285_vm6, %v1810_v48 }
 0x786   : > { %4263 = vmatprep.mubr.msk.bf16.mxu1 %vm4748_vm2, %v4747_v42 }
 0x78d   : > { %4264 = vmatmul.mubr.msk.bf16.vlgmr.msra.gmra.mxu1 %vm1200_vm3, %v1416_v44 }
 0x78e   : > { %4267 = vmatprep.mubr.msk.bf16.mxu1 %vm4748_vm2, %v4747_v42  ;;  %4292 = vmatpush3.bf16.msra.mxu1 %v4570_v52 }
 0x78f   : > { %4293 = vmatprep.subr.bf16.mxu1 %v4747_v42 }
 0x792   : > { %4294 = vmatpush3.bf16.msra.mxu1 %v4571_v54 }
 0x793   : > { %4323 = vmatprep.subr.bf16.mxu1 %v4747_v42 }
 0x795   : > { %4268 = vmatmul.mubr.msk.bf16.gmra.mxu1 %vm1200_vm3, %v1417_v51 }
 0x796   : > { %4271 = vmatprep.mubr.msk.bf16.mxu1 %vm4748_vm2, %v4747_v42 }
 0x79d   : > { %4272 = vmatmul.mubr.msk.bf16.gmra.mxu1 %vm1200_vm3, %v1418_v40 }
 0x79e   : > { %4295 = vmatprep.mubr.msk.bf16.mxu1 %vm4748_vm2, %v4747_v42 }
 0x7a5   : > { %4296 = vmatmul.mubr.msk.bf16.vlgmr.msra.gmra.mxu1 %vm853_vm1, %v5013_v10 }
 0x7a6   : > { %4299 = vmatprep.mubr.msk.bf16.mxu1 %vm4748_vm2, %v4747_v42 }
 0x7ad   : > { %4300 = vmatmul.mubr.msk.bf16.gmra.mxu1 %vm853_vm1, %v5027_v20 }
 0x7ae   : > { %4303 = vmatprep.mubr.msk.bf16.mxu1 %vm4748_vm2, %v4747_v42 }
 0x7b5   : > { %4304 = vmatmul.mubr.msk.bf16.gmra.mxu1 %vm853_vm1, %v5038_v22 }
 0x7b6   : > { %4329 = vmatprep.mubr.msk.bf16.mxu1 %vm4748_vm2, %v4747_v42 }
 0x835   : > { %v1860_v43 = vpop.f32.mrf.mxu1 }
 0x837   : > { %v4237_v44 = vpop.f32.mrf.mxu1 }
 0x839   : > { %v1863_v47 = vpop.f32.mrf.mxu1 }
 0x83a   : > { %v1882_v51 = vpack.c.bf16 %v1863_v47, %v1860_v43 }
 0x83b   : > { %v4238_v53 = vpop.f32.mrf.mxu1 }
 0x83c   : > { %4250 = vmatmul.mubr.msk.bf16.vlgmr.msra.gmra.mxu0 %vm1200_vm3, %v1882_v51 }
 0x83d   : > { %v1868_v56 = vpop.f32.mrf.mxu1  ;;  %4276 = vmatpush3.bf16.msra.mxu0 %v4572_v49  ;;  %4253 = vmatprep.mubr.msk.bf16.mxu0 %vm4748_vm2, %v4747_v42 }
 0x83e   : > { %4277 = vmatprep.subr.bf16.mxu0 %v4747_v42 }
 0x83f   : > { %v4241_v58 = vpop.f32.mrf.mxu1 }
 0x841   : > { %v1871_v59 = vpop.f32.mrf.mxu1  ;;  %4278 = vmatpush3.bf16.msra.mxu0 %v4573_v57 }
 0x842   : > { %v1883_v61 = vpack.c.bf16 %v1871_v59, %v1868_v56  ;;  %4307 = vmatprep.subr.bf16.mxu0 %v4747_v42  ;;  %v3831_v59 = vld [vmem:[%s5795_s20 + $0x2] ss:$0 sm:$0xff] }
 0x843   : > { %v4242_v62 = vpop.f32.mrf.mxu1 }
 0x844   : > { %4254 = vmatmul.mubr.msk.bf16.gmra.mxu0 %vm1200_vm3, %v1883_v61 }
 0x845   : > { %v1876_v63 = vpop.f32.mrf.mxu1  ;;  %4257 = vmatprep.mubr.msk.bf16.mxu0 %vm4748_vm2, %v4747_v42 }
 0x846   : > { %v1884_v2 = vpack.c.bf16 %v1876_v63, %v1876_v63 }
 0x847   : > { %v4245_v39 = vpop.f32.mrf.mxu1 }
 0x849   : > { %v1879_v0 = vpop.f32.mrf.mxu1 }
 0x84b   : > { %v4246_v3 = vpop.f32.mrf.mxu1 }
 0x84c   : > { %4258 = vmatmul.mubr.msk.bf16.gmra.mxu0 %vm1200_vm3, %v1884_v2 }
 0x84d   : > { %v5331_v45 = vpop.f32.mrf.mxu1  ;;  %4279 = vmatprep.mubr.msk.bf16.mxu0 %vm4748_vm2, %v4747_v42 }
 0x84f   : > { %v4265_v6 = vpop.f32.mrf.mxu1 }
 0x851   : > { %v5335_v50 = vpop.f32.mrf.mxu1 }
 0x853   : > { %v4266_v55 = vpop.f32.mrf.mxu1 }
 0x854   : > { %4280 = vmatmul.mubr.msk.bf16.vlgmr.msra.gmra.mxu0 %vm853_vm1, %v5013_v10 }
 0x855   : > { %v5340_v9 = vpop.f32.mrf.mxu1  ;;  %4283 = vmatprep.mubr.msk.bf16.mxu0 %vm4748_vm2, %v4747_v42  ;;  %4308 = vmatpush3.bf16.msra.mxu0 %v4574_v8 }
 0x856   : > { %4309 = vmatprep.subr.bf16.mxu0 %v4747_v42 }
 0x857   : > { %v4269_v60 = vpop.f32.mrf.mxu1 }
 0x859   : > { %v5346_v14 = vpop.f32.mrf.mxu1  ;;  %4310 = vmatpush3.bf16.msra.mxu0 %v4575_v11 }
 0x85a   : > { %4341 = vmatprep.subr.bf16.mxu0 %v4747_v42 }
 0x85b   : > { %v4270_v17 = vpop.f32.mrf.mxu1 }
 0x85c   : > { %4284 = vmatmul.mubr.msk.bf16.gmra.mxu0 %vm853_vm1, %v5027_v20 }
 0x85d   : > { %v5351_v18 = vpop.f32.mrf.mxu1  ;;  %4287 = vmatprep.mubr.msk.bf16.mxu0 %vm4748_vm2, %v4747_v42 }
 0x85f   : > { %v4273_v19 = vpop.f32.mrf.mxu1 }
 0x861   : > { %v2020_v21 = vpop.f32.mrf.mxu1 }
 0x863   : > { %v4274_v23 = vpop.f32.mrf.mxu1 }
 0x864   : > { %4288 = vmatmul.mubr.msk.bf16.gmra.mxu0 %vm853_vm1, %v5038_v22 }
 0x865   : > { %v2163_v24 = vpop.f32.mrf.mxu1  ;;  %4311 = vmatprep.mubr.msk.bf16.mxu0 %vm4748_vm2, %v4747_v42 }
 0x866   : > { %v2164_v38 = vadd.f32 %v3842_v15, %v2163_v24 }
 0x867   : > { %v4297_v25 = vpop.f32.mrf.mxu1 }
 0x869   : > { %v2166_v26 = vpop.f32.mrf.mxu1 }
 0x86a   : > { %v2167_v36 = vadd.f32 %v3842_v15, %v2166_v26 }
 0x86b   : > { %v4298_v4 = vpop.f32.mrf.mxu1 }
 0x86c   : > { %4312 = vmatmul.mubr.msk.bf16.vlgmr.msra.gmra.mxu0 %vm853_vm1, %v5013_v10  ;;  %v2269_v41 = vpack.c.bf16 %v2167_v36, %v2164_v38 }
 0x86d   : > { %v2171_v5 = vpop.f32.mrf.mxu1  ;;  %4315 = vmatprep.mubr.msk.bf16.mxu0 %vm4748_vm2, %v4747_v42 }
 0x86e   : > { %v2172_v33 = vadd.f32 %v3842_v15, %v2171_v5  ;;  %v2282_v46 = vsel %vm1200_vm3, %v2269_v41, 0 }
 0x86f   : > { %v4301_v7 = vpop.f32.mrf.mxu1 }
 0x871   : > { %v2174_v12 = vpop.f32.mrf.mxu1 }
 0x872   : > { %v2175_v30 = vadd.f32 %v3842_v15, %v2174_v12 }
 0x873   : > { %v4302_v13 = vpop.f32.mrf.mxu1 }
 0x874   : > { %4316 = vmatmul.mubr.msk.bf16.gmra.mxu0 %vm853_vm1, %v5027_v20  ;;  %v2270_v34 = vpack.c.bf16 %v2175_v30, %v2172_v33 }
 0x875   : > { %v2179_v27 = vpop.f32.mrf.mxu1  ;;  %4319 = vmatprep.mubr.msk.bf16.mxu0 %vm4748_vm2, %v4747_v42 }
 0x876   : > { %v2180_v28 = vadd.f32 %v3842_v15, %v2179_v27  ;;  %v2285_v37 = vsel %vm1200_vm3, %v2270_v34, 0 }
 0x877   : > { %v4305_v1 = vpop.f32.mrf.mxu1 }
 0x878   : > { %v2271_v16 = vpack.c.bf16 %v2180_v28, %v2180_v28  ;;  %v3853_v1 = vld [vmem:[%s4916_s19 + $0x2] ss:$0 sm:$0xff] }
 0x879   : > { %v2182_v29 = vpop.f32.mrf.mxu1 }
 0x87a   : > { %v2288_v31 = vsel %vm1200_vm3, %v2271_v16, 0 }
 0x87b   : > { %v4306_v32 = vpop.f32.mrf.mxu1  ;;  %4324 = vmatpush3.bf16.xpose.msra.mxu1 %v2288_v31 }
 0x87c   : > { %4320 = vmatmul.mubr.msk.bf16.gmra.mxu0 %vm853_vm1, %v5038_v22  ;;  %4325 = vmatprep.subr.bf16.mxu1 %v4747_v42 }
 0x87d   : > { %4347 = vmatprep.mubr.msk.bf16.mxu0 %vm4748_vm2, %v4747_v42 }
 0x883   : > { %4326 = vmatpush3.bf16.xpose.msra.mxu1 %v2285_v37 }
 0x884   : > { %4327 = vmatprep.subr.bf16.mxu1 %v4747_v42 }
 0x88b   : > { %4328 = vmatpush3.bf16.xpose.msra.mxu1 %v2282_v46 }
 0x88c   : > { %4359 = vmatprep.subr.bf16.mxu1 %v4747_v42 }
 0x8fc   : > { %v5378_v48 = vpop.f32.mrf.mxu0 }
 0x8fe   : > { %v4251_v52 = vpop.f32.mrf.mxu0 }
 0x900   : > { %v5380_v54 = vpop.f32.mrf.mxu0 }
 0x902   : > { %v4252_v40 = vpop.f32.mrf.mxu0 }
 0x904   : > { %v5382_v43 = vpop.f32.mrf.mxu0 }
 0x906   : > { %v4255_v44 = vpop.f32.mrf.mxu0 }
 0x908   : > { %v5384_v47 = vpop.f32.mrf.mxu0 }
 0x90a   : > { %v4256_v49 = vpop.f32.mrf.mxu0 }
 0x90c   : > { %v5386_v51 = vpop.f32.mrf.mxu0 }
 0x90e   : > { %v4259_v53 = vpop.f32.mrf.mxu0 }
 0x910   : > { %v1952_v56 = vpop.f32.mrf.mxu0 }
 0x912   : > { %v4260_v57 = vpop.f32.mrf.mxu0 }
 0x914   : > { %v2082_v58 = vpop.f32.mrf.mxu0 }
 0x915   : > { %v2083_v63 = vadd.f32 %v3831_v59, %v2082_v58 }
 0x916   : > { %v4281_v61 = vpop.f32.mrf.mxu0 }
 0x918   : > { %v2085_v62 = vpop.f32.mrf.mxu0 }
 0x919   : > { %v2086_v39 = vadd.f32 %v3831_v59, %v2085_v62 }
 0x91a   : > { %v4282_v0 = vpop.f32.mrf.mxu0 }
 0x91b   : > { %v2266_v2 = vpack.c.bf16 %v2086_v39, %v2083_v63 }
 0x91c   : > { %v2090_v3 = vpop.f32.mrf.mxu0 }
 0x91d   : > { %4330 = vmatmul.mubr.msk.bf16.vlgmr.msra.gmra.mxu1 %vm1200_vm3, %v2266_v2  ;;  %v2091_v55 = vadd.f32 %v3831_v59, %v2090_v3 }
 0x91e   : > { %v4285_v6 = vpop.f32.mrf.mxu0  ;;  %4333 = vmatprep.mubr.msk.bf16.mxu1 %vm4748_vm2, %v4747_v42 }
 0x920   : > { %v2093_v8 = vpop.f32.mrf.mxu0 }
 0x921   : > { %v2094_v11 = vadd.f32 %v3831_v59, %v2093_v8 }
 0x922   : > { %v4286_v60 = vpop.f32.mrf.mxu0 }
 0x923   : > { %v2267_v17 = vpack.c.bf16 %v2094_v11, %v2091_v55 }
 0x924   : > { %v2098_v19 = vpop.f32.mrf.mxu0 }
 0x925   : > { %4334 = vmatmul.mubr.msk.bf16.gmra.mxu1 %vm1200_vm3, %v2267_v17  ;;  %v2099_v23 = vadd.f32 %v3831_v59, %v2098_v19 }
 0x926   : > { %v4289_v21 = vpop.f32.mrf.mxu0  ;;  %4337 = vmatprep.mubr.msk.bf16.mxu1 %vm4748_vm2, %v4747_v42 }
 0x927   : > { %v2268_v26 = vpack.c.bf16 %v2099_v23, %v2099_v23 }
 0x928   : > { %v2101_v24 = vpop.f32.mrf.mxu0 }
 0x92a   : > { %v4290_v25 = vpop.f32.mrf.mxu0 }
 0x92c   : > { %v2244_v4 = vpop.f32.mrf.mxu0 }
 0x92d   : > { %4338 = vmatmul.mubr.msk.bf16.gmra.mxu1 %vm1200_vm3, %v2268_v26  ;;  %v2245_v46 = vadd.f32 %v3853_v1, %v2244_v4 }
 0x92e   : > { %v4313_v5 = vpop.f32.mrf.mxu0  ;;  %4361 = vmatprep.mubr.msk.bf16.mxu1 %vm4748_vm2, %v4747_v42 }
 0x930   : > { %v2247_v7 = vpop.f32.mrf.mxu0 }
 0x931   : > { %v2248_v38 = vadd.f32 %v3853_v1, %v2247_v7 }
 0x932   : > { %v4314_v12 = vpop.f32.mrf.mxu0 }
 0x933   : > { %v2414_v52 = vpack.c.bf16 %v2248_v38, %v2245_v46 }
 0x934   : > { %v2252_v13 = vpop.f32.mrf.mxu0 }
 0x935   : > { %v2253_v36 = vadd.f32 %v3853_v1, %v2252_v13 }
 0x936   : > { %v4317_v15 = vpop.f32.mrf.mxu0 }
 0x938   : > { %v2255_v27 = vpop.f32.mrf.mxu0 }
 0x939   : > { %v2256_v32 = vadd.f32 %v3853_v1, %v2255_v27 }
 0x93a   : > { %v4318_v28 = vpop.f32.mrf.mxu0 }
 0x93b   : > { %v2415_v41 = vpack.c.bf16 %v2256_v32, %v2253_v36 }
 0x93c   : > { %v2260_v16 = vpop.f32.mrf.mxu0 }
 0x93d   : > { %v2261_v29 = vadd.f32 %v3853_v1, %v2260_v16 }
 0x93e   : > { %v4321_v30 = vpop.f32.mrf.mxu0 }
 0x93f   : > { %v2416_v31 = vpack.c.bf16 %v2261_v29, %v2261_v29 }
 0x940   : > { %v2263_v33 = vpop.f32.mrf.mxu0 }
 0x941   : > { %v2427_v34 = vsel %vm1356_vm4, %v2416_v31, 0 }
 0x942   : > { %v4322_v37 = vpop.f32.mrf.mxu0  ;;  %4342 = vmatpush3.bf16.msra.mxu0 %v2427_v34 }
 0x943   : > { %4343 = vmatprep.subr.bf16.mxu0 %v4747_v42 }
 0x946   : > { %4344 = vmatpush3.bf16.msra.mxu0 %v2415_v41 }
 0x947   : > { %4345 = vmatprep.subr.bf16.mxu0 %v4747_v42 }
 0x94a   : > { %4346 = vmatpush3.bf16.msra.mxu0 %v2414_v52 }
 0x94b   : > { %4373 = vmatprep.subr.bf16.mxu0 %v4747_v42 }
 0x9dd   : > { %v2324_v40 = vpop.f32.mrf.mxu1 }
 0x9de   : > { %v2346_v44 = vmul.f32 0.35355338, %v2324_v40 }
 0x9df   : > { %v4331_v49 = vpop.f32.mrf.mxu1 }
 0x9e0   : > { %v2351_v53 = vsel %vm947_vm5, %v2346_v44, -1e+30 }
 0x9e1   : > { %v2327_v56 = vpop.f32.mrf.mxu1  ;;  %v2356_v57 = vsel %vm1285_vm6, %v2351_v53, -inf }
 0x9e2   : > { %v2347_v58 = vmul.f32 0.35355338, %v2327_v56  ;;  %2357 = vmax.xlane.f32.xlu0 %v2356_v57 }
 0x9e3   : > { %v4332_v59 = vpop.f32.mrf.mxu1 }
 0x9e4   : > { %v2352_v61 = vsel %vm947_vm5, %v2347_v58, -1e+30 }
 0x9e5   : > { %v2332_v62 = vpop.f32.mrf.mxu1  ;;  %v2359_v63 = vsel %vm1285_vm6, %v2352_v61, -inf }
 0x9e6   : > { %v2348_v39 = vmul.f32 0.35355338, %v2332_v62  ;;  %2360 = vmax.xlane.f32.xlu1 %v2359_v63 }
 0x9e7   : > { %v4335_v0 = vpop.f32.mrf.mxu1 }
 0x9e8   : > { %v2353_v2 = vsel %vm947_vm5, %v2348_v39, -1e+30 }
 0x9e9   : > { %v2335_v3 = vpop.f32.mrf.mxu1  ;;  %v2362_v6 = vsel %vm1285_vm6, %v2353_v2, -inf }
 0x9ea   : > { %v2349_v8 = vmul.f32 0.35355338, %v2335_v3  ;;  %2363 = vmax.xlane.f32.xlu0 %v2362_v6  ;;  %v4576_v3 = vld [vmem:[%s4890_s25 + $0x38] sm:$0xff]  }
 0x9eb   : > { %v4336_v55 = vpop.f32.mrf.mxu1 }
 0x9ec   : > { %v2354_v11 = vsel %vm947_vm5, %v2349_v8, -1e+30  ;;  %v4577_v55 = vld [vmem:[%s4890_s25 + $0x30] sm:$0xff]  }
 0x9ed   : > { %v2340_v60 = vpop.f32.mrf.mxu1  ;;  %v2365_v17 = vsel %vm1285_vm6, %v2354_v11, -inf }
 0x9ee   : > { %v2350_v19 = vmul.f32 0.35355338, %v2340_v60  ;;  %2366 = vmax.xlane.f32.xlu1 %v2365_v17 }
 0x9ef   : > { %v4339_v21 = vpop.f32.mrf.mxu1 }
 0x9f0   : > { %v2355_v23 = vsel %vm947_vm5, %v2350_v19, -1e+30 }
 0x9f1   : > { %v2343_v24 = vpop.f32.mrf.mxu1  ;;  %v2368_v25 = vsel %vm1285_vm6, %v2355_v23, -inf }
 0x9f2   : > { %2369 = vmax.xlane.f32.xlu0 %v2368_v25  ;;  %v4578_v25 = vld [vmem:[%s4900_s23 + $0x38] sm:$0xff]  }
 0x9f3   : > { %v4340_v26 = vpop.f32.mrf.mxu1 }
 0x9f4   : > { %v4579_v26 = vld [vmem:[%s4900_s23 + $0x30] sm:$0xff]  }
 0xa6b   : > { %v2358_v4 = vpop.xlane.xlu0 %2357 }
 0xa6c   : > { %v2371_v5 = vsub.f32 %v2351_v53, %v2358_v4  ;;  %v3865_v53 = vld [vmem:[%s5796_s22 + $0x8] sm:$0xf] }
 0xa6d   : > { %v2500_v56 = vsel %vm1356_vm4, %v3865_v53, 0 }
 0xa6e   : > { %v2376_v7 = vmul.f32 1.442695, %v2371_v5  ;;  %4360 = vmatpush3.bf16.msra.mxu1 %v2500_v56 }
 0xa6f   : > { %v2361_v12 = vpop.xlane.xlu1 %2360  ;;  %4389 = vmatprep.subr.bf16.mxu1 %v4747_v42 }
 0xa70   : > { %4642 = vpow2.f32 %v2376_v7  ;;  %v2372_v13 = vsub.f32 %v2352_v61, %v2361_v12  ;;  %v4580_v12 = vld [vmem:[%s4895_s1 + $0x38] sm:$0xff]  }
 0xa72   : > { %v2378_v15 = vmul.f32 1.442695, %v2372_v13 }
 0xa73   : > { %v2364_v27 = vpop.xlane.xlu0 %2363 }
 0xa74   : > { %4644 = vpow2.f32 %v2378_v15  ;;  %v2373_v28 = vsub.f32 %v2353_v2, %v2364_v27 }
 0xa76   : > { %v2380_v1 = vmul.f32 1.442695, %v2373_v28  ;;  %v4581_v28 = vld [vmem:[%s4895_s1 + $0x30] sm:$0xff]   ;;  %s5797_s1 = scalar_lea.vmem %s5738_s10, %s4873_s30 }
 0xa77   : > { %v2367_v16 = vpop.xlane.xlu1 %2366 }
 0xa78   : > { %4646 = vpow2.f32 %v2380_v1  ;;  %v2374_v29 = vsub.f32 %v2354_v11, %v2367_v16 }
 0xa7a   : > { %v2382_v30 = vmul.f32 1.442695, %v2374_v29 }
 0xa7b   : > { %v2370_v31 = vpop.xlane.xlu0 %2369 }
 0xa7c   : > { %4648 = vpow2.f32 %v2382_v30  ;;  %v2375_v32 = vsub.f32 %v2355_v23, %v2370_v31 }
 0xa7d   : > { %v4643_v33 = vpop.eup %4642 }
 0xa7e   : > { %v2384_v34 = vmul.f32 1.442695, %v2375_v32  ;;  %v2386_v36 = vsel %vm1285_vm6, %v4643_v33, 0.0 }
 0xa7f   : > { %2387 = vadd.xlane.f32.xlu1 %v2386_v36 }
 0xa80   : > { %4650 = vpow2.f32 %v2384_v34 }
 0xa81   : > { %v4645_v37 = vpop.eup %4644 }
 0xa82   : > { %v2389_v38 = vsel %vm1285_vm6, %v4645_v37, 0.0 }
 0xa83   : > { %2390 = vadd.xlane.f32.xlu0 %v2389_v38  ;;  %v5481_v38 = vld [vmem:[%s5795_s20 + $0x3] ss:$0 sm:$0xff] }
 0xa85   : > { %v4647_v41 = vpop.eup %4646 }
 0xa86   : > { %v2392_v46 = vsel %vm1285_vm6, %v4647_v41, 0.0 }
 0xa87   : > { %2393 = vadd.xlane.f32.xlu1 %v2392_v46 }
 0xa89   : > { %v4649_v52 = vpop.eup %4648 }
 0xa8a   : > { %v2395_v40 = vsel %vm1285_vm6, %v4649_v52, 0.0 }
 0xa8b   : > { %2396 = vadd.xlane.f32.xlu0 %v2395_v40 }
 0xa8d   : > { %v4651_v44 = vpop.eup %4650 }
 0xa8e   : > { %v2398_v49 = vsel %vm1285_vm6, %v4651_v44, 0.0 }
 0xa8f   : > { %2399 = vadd.xlane.f32.xlu1 %v2398_v49 }
 0xb08   : > { %v2388_v57 = vpop.xlane.xlu1 %2387 }
 0xb09   : > { %4652 = vrcp.f32 %v2388_v57 }
 0xb0c   : > { %v2391_v58 = vpop.xlane.xlu0 %2390 }
 0xb0d   : > { %4654 = vrcp.f32 %v2391_v58 }
 0xb10   : > { %v2394_v59 = vpop.xlane.xlu1 %2393 }
 0xb11   : > { %4656 = vrcp.f32 %v2394_v59 }
 0xb14   : > { %v2397_v61 = vpop.xlane.xlu0 %2396 }
 0xb15   : > { %4658 = vrcp.f32 %v2397_v61 }
 0xb16   : > { %v4653_v62 = vpop.eup %4652 }
 0xb17   : > { %v2406_v0 = vmul.f32 %v4653_v62, %v4643_v33 }
 0xb18   : > { %v2400_v63 = vpop.xlane.xlu1 %2399 }
 0xb19   : > { %4660 = vrcp.f32 %v2400_v63 }
 0xb1a   : > { %v4655_v39 = vpop.eup %4654 }
 0xb1b   : > { %v2407_v2 = vmul.f32 %v4655_v39, %v4645_v37 }
 0xb1d   : > { %v2411_v6 = vpack.c.bf16 %v2407_v2, %v2406_v0 }
 0xb1e   : > { %v4657_v8 = vpop.eup %4656 }
 0xb1f   : > { %4348 = vmatmul.mubr.msk.bf16.vlgmr.msra.gmra.mxu0 %vm1285_vm6, %v2411_v6  ;;  %v2408_v60 = vmul.f32 %v4657_v8, %v4647_v41 }
 0xb20   : > { %4351 = vmatprep.mubr.msk.bf16.mxu0 %vm4748_vm2, %v4747_v42  ;;  %4374 = vmatpush3.bf16.msra.mxu0 %v4576_v3 }
 0xb21   : > { %4375 = vmatprep.subr.bf16.mxu0 %v4747_v42 }
 0xb22   : > { %v4659_v11 = vpop.eup %4658 }
 0xb23   : > { %v2409_v17 = vmul.f32 %v4659_v11, %v4649_v52 }
 0xb24   : > { %4376 = vmatpush3.bf16.msra.mxu0 %v4577_v55 }
 0xb25   : > { %v2412_v19 = vpack.c.bf16 %v2409_v17, %v2408_v60  ;;  %4405 = vmatprep.subr.bf16.mxu0 %v4747_v42  ;;  %v3896_v17 = vld [vmem:[%s4916_s19 + $0x3] ss:$0 sm:$0xff]  ;;  %s5798_s19 = sld [smem:[#allocation21_spill]] }
 0xb26   : > { %v4661_v21 = vpop.eup %4660 }
 0xb27   : > { %4352 = vmatmul.mubr.msk.bf16.gmra.mxu0 %vm1285_vm6, %v2412_v19  ;;  %v2410_v23 = vmul.f32 %v4661_v21, %v4651_v44 }
 0xb28   : > { %4355 = vmatprep.mubr.msk.bf16.mxu0 %vm4748_vm2, %v4747_v42 }
 0xb29   : > { %v2413_v24 = vpack.c.bf16 %v2410_v23, %v2410_v23 }
 0xb2b   : > { %s5799_s2 = scalar_lea.vmem %s5798_s19, %s4873_s30 }
 0xb2f   : > { %4356 = vmatmul.mubr.msk.bf16.gmra.mxu0 %vm1285_vm6, %v2413_v24 }
 0xb30   : > { %4377 = vmatprep.mubr.msk.bf16.mxu0 %vm4748_vm2, %v4747_v42 }
 0xb37   : > { %4378 = vmatmul.mubr.msk.bf16.vlgmr.msra.gmra.mxu0 %vm853_vm1, %v5013_v10 }
 0xb38   : > { %4381 = vmatprep.mubr.msk.bf16.mxu0 %vm4748_vm2, %v4747_v42  ;;  %4406 = vmatpush3.bf16.msra.mxu0 %v4578_v25 }
 0xb39   : > { %4407 = vmatprep.subr.bf16.mxu0 %v4747_v42 }
 0xb3c   : > { %4408 = vmatpush3.bf16.msra.mxu0 %v4579_v26 }
 0xb3d   : > { %4439 = vmatprep.subr.bf16.mxu0 %v4747_v42 }
 0xb3f   : > { %4382 = vmatmul.mubr.msk.bf16.gmra.mxu0 %vm853_vm1, %v5027_v20 }
 0xb40   : > { %4385 = vmatprep.mubr.msk.bf16.mxu0 %vm4748_vm2, %v4747_v42 }
 0xb47   : > { %4386 = vmatmul.mubr.msk.bf16.gmra.mxu0 %vm853_vm1, %v5038_v22 }
 0xb48   : > { %4409 = vmatprep.mubr.msk.bf16.mxu0 %vm4748_vm2, %v4747_v42 }
 0xb4f   : > { %4410 = vmatmul.mubr.msk.bf16.vlgmr.msra.gmra.mxu0 %vm853_vm1, %v5013_v10 }
 0xb50   : > { %4413 = vmatprep.mubr.msk.bf16.mxu0 %vm4748_vm2, %v4747_v42 }
 0xb57   : > { %4414 = vmatmul.mubr.msk.bf16.gmra.mxu0 %vm853_vm1, %v5027_v20 }
 0xb58   : > { %4417 = vmatprep.mubr.msk.bf16.mxu0 %vm4748_vm2, %v4747_v42 }
 0xb5f   : > { %4418 = vmatmul.mubr.msk.bf16.gmra.mxu0 %vm853_vm1, %v5038_v22 }
 0xb60   : > { %4445 = vmatprep.mubr.msk.bf16.mxu0 %vm4748_vm2, %v4747_v42 }
 0xbdf   : > { %v2463_v4 = vpop.f32.mrf.mxu0 }
 0xbe1   : > { %v4349_v5 = vpop.f32.mrf.mxu0 }
 0xbe3   : > { %v2466_v7 = vpop.f32.mrf.mxu0 }
 0xbe4   : > { %v2485_v13 = vpack.c.bf16 %v2466_v7, %v2463_v4 }
 0xbe5   : > { %v4350_v15 = vpop.f32.mrf.mxu0 }
 0xbe6   : > { %4362 = vmatmul.mubr.msk.bf16.vlgmr.msra.gmra.mxu1 %vm1200_vm3, %v2485_v13 }
 0xbe7   : > { %v2471_v27 = vpop.f32.mrf.mxu0  ;;  %4390 = vmatpush3.bf16.msra.mxu1 %v4580_v12  ;;  %4365 = vmatprep.mubr.msk.bf16.mxu1 %vm4748_vm2, %v4747_v42 }
 0xbe8   : > { %4391 = vmatprep.subr.bf16.mxu1 %v4747_v42 }
 0xbe9   : > { %v4353_v1 = vpop.f32.mrf.mxu0 }
 0xbeb   : > { %v2474_v16 = vpop.f32.mrf.mxu0  ;;  %4392 = vmatpush3.bf16.msra.mxu1 %v4581_v28 }
 0xbec   : > { %v2486_v29 = vpack.c.bf16 %v2474_v16, %v2471_v27  ;;  %4421 = vmatprep.subr.bf16.mxu1 %v4747_v42  ;;  %v2002_v27 = vadd.f32 %v5331_v45, %v5378_v48  ;;  %v2013_v45 = vadd.f32 %v5346_v14, %v5384_v47 }
 0xbed   : > { %v4354_v30 = vpop.f32.mrf.mxu0 }
 0xbee   : > { %4366 = vmatmul.mubr.msk.bf16.gmra.mxu1 %vm1200_vm3, %v2486_v29  ;;  %v2005_v29 = vadd.f32 %v5335_v50, %v5380_v54  ;;  %v2018_v50 = vadd.f32 %v5351_v18, %v5386_v51 }
 0xbef   : > { %v2479_v31 = vpop.f32.mrf.mxu0  ;;  %4369 = vmatprep.mubr.msk.bf16.mxu1 %vm4748_vm2, %v4747_v42 }
 0xbf0   : > { %v2487_v34 = vpack.c.bf16 %v2479_v31, %v2479_v31 }
 0xbf1   : > { %v4357_v32 = vpop.f32.mrf.mxu0 }
 0xbf3   : > { %v2482_v33 = vpop.f32.mrf.mxu0 }
 0xbf4   : > { %v2010_v33 = vadd.f32 %v5340_v9, %v5382_v43 }
 0xbf5   : > { %v4358_v36 = vpop.f32.mrf.mxu0 }
 0xbf6   : > { %4370 = vmatmul.mubr.msk.bf16.gmra.mxu1 %vm1200_vm3, %v2487_v34 }
 0xbf7   : > { %v2622_v37 = vpop.f32.mrf.mxu0  ;;  %4393 = vmatprep.mubr.msk.bf16.mxu1 %vm4748_vm2, %v4747_v42 }
 0xbf8   : > { %v5484_v52 = vadd.f32 %v5481_v38, %v2622_v37 }
 0xbf9   : > { %v4379_v41 = vpop.f32.mrf.mxu0 }
 0xbfb   : > { %v2625_v46 = vpop.f32.mrf.mxu0 }
 0xbfc   : > { %v5487_v40 = vadd.f32 %v5481_v38, %v2625_v46 }
 0xbfd   : > { %v4380_v44 = vpop.f32.mrf.mxu0 }
 0xbfe   : > { %v2806_v49 = vpack.c.bf16 %v5487_v40, %v5484_v52  ;;  %4394 = vmatmul.mubr.msk.bf16.vlgmr.msra.gmra.mxu1 %vm853_vm1, %v5013_v10 }
 0xbff   : > { %v2630_v53 = vpop.f32.mrf.mxu0  ;;  %4397 = vmatprep.mubr.msk.bf16.mxu1 %vm4748_vm2, %v4747_v42 }
 0xc00   : > { %v5496_v58 = vadd.f32 %v5481_v38, %v2630_v53 }
 0xc01   : > { %v4383_v56 = vpop.f32.mrf.mxu0 }
 0xc03   : > { %v2633_v57 = vpop.f32.mrf.mxu0 }
 0xc04   : > { %v5499_v59 = vadd.f32 %v5481_v38, %v2633_v57 }
 0xc05   : > { %v4384_v61 = vpop.f32.mrf.mxu0 }
 0xc06   : > { %v2807_v62 = vpack.c.bf16 %v5499_v59, %v5496_v58  ;;  %4398 = vmatmul.mubr.msk.bf16.gmra.mxu1 %vm853_vm1, %v5027_v20 }
 0xc07   : > { %v5505_v10 = vpop.f32.mrf.mxu0  ;;  %4401 = vmatprep.mubr.msk.bf16.mxu1 %vm4748_vm2, %v4747_v42 }
 0xc09   : > { %v4387_v63 = vpop.f32.mrf.mxu0 }
 0xc0b   : > { %v2641_v39 = vpop.f32.mrf.mxu0 }
 0xc0d   : > { %v4388_v0 = vpop.f32.mrf.mxu0 }
 0xc0e   : > { %4402 = vmatmul.mubr.msk.bf16.gmra.mxu1 %vm853_vm1, %v5038_v22 }
 0xc0f   : > { %v2784_v2 = vpop.f32.mrf.mxu0  ;;  %4427 = vmatprep.mubr.msk.bf16.mxu1 %vm4748_vm2, %v4747_v42 }
 0xc10   : > { %v2785_v13 = vadd.f32 %v3896_v17, %v2784_v2  ;;  %v3885_v2 = vld [vmem:[%s4911_s21 + $0x3] ss:$0 sm:$0xff] }
 0xc11   : > { %v4411_v3 = vpop.f32.mrf.mxu0 }
 0xc13   : > { %v2787_v6 = vpop.f32.mrf.mxu0 }
 0xc14   : > { %v2788_v7 = vadd.f32 %v3896_v17, %v2787_v6 }
 0xc15   : > { %v4412_v8 = vpop.f32.mrf.mxu0 }
 0xc16   : > { %v2954_v15 = vpack.c.bf16 %v2788_v7, %v2785_v13 }
 0xc17   : > { %v2792_v20 = vpop.f32.mrf.mxu0 }
 0xc18   : > { %v2793_v4 = vadd.f32 %v3896_v17, %v2792_v20 }
 0xc19   : > { %v4415_v55 = vpop.f32.mrf.mxu0 }
 0xc1b   : > { %v2795_v11 = vpop.f32.mrf.mxu0 }
 0xc1c   : > { %v2796_v25 = vadd.f32 %v3896_v17, %v2795_v11 }
 0xc1d   : > { %v4416_v60 = vpop.f32.mrf.mxu0 }
 0xc1e   : > { %v2955_v12 = vpack.c.bf16 %v2796_v25, %v2793_v4 }
 0xc1f   : > { %v2800_v19 = vpop.f32.mrf.mxu0 }
 0xc20   : > { %v2801_v21 = vadd.f32 %v3896_v17, %v2800_v19 }
 0xc21   : > { %v4419_v23 = vpop.f32.mrf.mxu0 }
 0xc22   : > { %v2956_v24 = vpack.c.bf16 %v2801_v21, %v2801_v21 }
 0xc23   : > { %v2803_v26 = vpop.f32.mrf.mxu0 }
 0xc24   : > { %v2967_v22 = vsel %vm1356_vm4, %v2956_v24, 0  ;;  %v2639_v26 = vadd.f32 %v5481_v38, %v5505_v10 }
 0xc25   : > { %v4420_v5 = vpop.f32.mrf.mxu0  ;;  %4440 = vmatpush3.bf16.msra.mxu0 %v2967_v22 }
 0xc26   : > { %4441 = vmatprep.subr.bf16.mxu0 %v4747_v42  ;;  %v2808_v22 = vpack.c.bf16 %v2639_v26, %v2639_v26 }
 0xc29   : > { %4442 = vmatpush3.bf16.msra.mxu0 %v2955_v12 }
 0xc2a   : > { %4443 = vmatprep.subr.bf16.mxu0 %v4747_v42 }
 0xc2d   : > { %4444 = vmatpush3.bf16.msra.mxu0 %v2954_v15 }
 0xc2e   : > { %4471 = vmatprep.subr.bf16.mxu0 %v4747_v42 }
 0xca6   : > { %v2536_v28 = vpop.f32.mrf.mxu1 }
 0xca7   : > { %v5520_v1 = vadd.f32 %v2536_v28, %v2002_v27 }
 0xca8   : > { %v4363_v16 = vpop.f32.mrf.mxu1 }
 0xcaa   : > { %v2539_v30 = vpop.f32.mrf.mxu1 }
 0xcab   : > { %v5524_v31 = vadd.f32 %v2539_v30, %v2005_v29 }
 0xcac   : > { %v4364_v32 = vpop.f32.mrf.mxu1 }
 0xcae   : > { %v2544_v34 = vpop.f32.mrf.mxu1 }
 0xcaf   : > { %v5528_v36 = vadd.f32 %v2544_v34, %v2010_v33 }
 0xcb0   : > { %v4367_v37 = vpop.f32.mrf.mxu1 }
 0xcb2   : > { %v2547_v48 = vpop.f32.mrf.mxu1 }
 0xcb3   : > { %v5532_v41 = vadd.f32 %v2547_v48, %v2013_v45 }
 0xcb4   : > { %v4368_v46 = vpop.f32.mrf.mxu1 }
 0xcb6   : > { %v2552_v54 = vpop.f32.mrf.mxu1 }
 0xcb7   : > { %v5536_v44 = vadd.f32 %v2552_v54, %v2018_v50 }
 0xcb8   : > { %v4371_v53 = vpop.f32.mrf.mxu1 }
 0xcba   : > { %v2555_v9 = vpop.f32.mrf.mxu1 }
 0xcbc   : > { %v4372_v43 = vpop.f32.mrf.mxu1 }
 0xcbe   : > { %v2703_v56 = vpop.f32.mrf.mxu1 }
 0xcbf   : > { %v2704_v23 = vadd.f32 %v3885_v2, %v2703_v56 }
 0xcc0   : > { %v4395_v57 = vpop.f32.mrf.mxu1 }
 0xcc2   : > { %v2706_v61 = vpop.f32.mrf.mxu1 }
 0xcc3   : > { %v2707_v19 = vadd.f32 %v3885_v2, %v2706_v61 }
 0xcc4   : > { %v4396_v63 = vpop.f32.mrf.mxu1 }
 0xcc5   : > { %v2809_v24 = vpack.c.bf16 %v2707_v19, %v2704_v23 }
 0xcc6   : > { %v2711_v39 = vpop.f32.mrf.mxu1 }
 0xcc7   : > { %v2712_v60 = vadd.f32 %v3885_v2, %v2711_v39  ;;  %v2822_v25 = vsel %vm1200_vm3, %v2809_v24, 0 }
 0xcc8   : > { %v4399_v14 = vpop.f32.mrf.mxu1 }
 0xcca   : > { %v2714_v47 = vpop.f32.mrf.mxu1 }
 0xccb   : > { %v2715_v51 = vadd.f32 %v3885_v2, %v2714_v47 }
 0xccc   : > { %v4400_v0 = vpop.f32.mrf.mxu1 }
 0xccd   : > { %v2810_v17 = vpack.c.bf16 %v2715_v51, %v2712_v60 }
 0xcce   : > { %v2719_v3 = vpop.f32.mrf.mxu1 }
 0xccf   : > { %v2720_v6 = vadd.f32 %v3885_v2, %v2719_v3  ;;  %v2825_v21 = vsel %vm1200_vm3, %v2810_v17, 0 }
 0xcd0   : > { %v4403_v8 = vpop.f32.mrf.mxu1 }
 0xcd1   : > { %v2811_v20 = vpack.c.bf16 %v2720_v6, %v2720_v6 }
 0xcd2   : > { %v2722_v18 = vpop.f32.mrf.mxu1 }
 0xcd3   : > { %v2828_v55 = vsel %vm1200_vm3, %v2811_v20, 0 }
 0xcd4   : > { %v4404_v11 = vpop.f32.mrf.mxu1  ;;  %4422 = vmatpush3.bf16.xpose.msra.mxu1 %v2828_v55 }
 0xcd5   : > { %4423 = vmatprep.subr.bf16.mxu1 %v4747_v42 }
 0xcdc   : > { %4424 = vmatpush3.bf16.xpose.msra.mxu1 %v2825_v21  ;;  %v3908_v21 = vld [vmem:[%s5796_s22 + $0xc] sm:$0xf] }
 0xcdd   : > { %4425 = vmatprep.subr.bf16.mxu1 %v4747_v42  ;;  %v3040_v23 = vsel %vm1356_vm4, %v3908_v21, 0 }
 0xce4   : > { %4426 = vmatpush3.bf16.xpose.msra.mxu1 %v2822_v25 }
 0xce5   : > { %4457 = vmatprep.subr.bf16.mxu1 %v4747_v42 }
 0xceb   : > { %4428 = vmatmul.mubr.msk.bf16.vlgmr.msra.gmra.mxu1 %vm1200_vm3, %v2806_v49 }
 0xcec   : > { %4431 = vmatprep.mubr.msk.bf16.mxu1 %vm4748_vm2, %v4747_v42  ;;  %4458 = vmatpush3.bf16.msra.mxu1 %v3040_v23 }
 0xced   : > { %4487 = vmatprep.subr.bf16.mxu1 %v4747_v42 }
 0xcf3   : > { %4432 = vmatmul.mubr.msk.bf16.gmra.mxu1 %vm1200_vm3, %v2807_v62 }
 0xcf4   : > { %4435 = vmatprep.mubr.msk.bf16.mxu1 %vm4748_vm2, %v4747_v42 }
 0xcfb   : > { %4436 = vmatmul.mubr.msk.bf16.gmra.mxu1 %vm1200_vm3, %v2808_v22 }
 0xcfc   : > { %4459 = vmatprep.mubr.msk.bf16.mxu1 %vm4748_vm2, %v4747_v42 }
 0xdab   : > { %v2864_v52 = vpop.f32.mrf.mxu1 }
 0xdac   : > { %v2886_v40 = vmul.f32 0.35355338, %v2864_v52 }
 0xdad   : > { %v4429_v49 = vpop.f32.mrf.mxu1 }
 0xdae   : > { %v2891_v58 = vsel %vm947_vm5, %v2886_v40, -1e+30 }
 0xdaf   : > { %v2867_v59 = vpop.f32.mrf.mxu1  ;;  %v2896_v62 = vsel %vm1285_vm6, %v2891_v58, -inf }
 0xdb0   : > { %v2887_v4 = vmul.f32 0.35355338, %v2867_v59  ;;  %2897 = vmax.xlane.f32.xlu0 %v2896_v62 }
 0xdb1   : > { %v4430_v5 = vpop.f32.mrf.mxu1 }
 0xdb2   : > { %v2892_v38 = vsel %vm947_vm5, %v2887_v4, -1e+30 }
 0xdb3   : > { %v2872_v10 = vpop.f32.mrf.mxu1  ;;  %v2899_v7 = vsel %vm1285_vm6, %v2892_v38, -inf }
 0xdb4   : > { %v2888_v12 = vmul.f32 0.35355338, %v2872_v10  ;;  %2900 = vmax.xlane.f32.xlu1 %v2899_v7 }
 0xdb5   : > { %v4433_v13 = vpop.f32.mrf.mxu1 }
 0xdb6   : > { %v2893_v15 = vsel %vm947_vm5, %v2888_v12, -1e+30 }
 0xdb7   : > { %v2875_v27 = vpop.f32.mrf.mxu1  ;;  %v2902_v28 = vsel %vm1285_vm6, %v2893_v15, -inf }
 0xdb8   : > { %v2889_v16 = vmul.f32 0.35355338, %v2875_v27  ;;  %2903 = vmax.xlane.f32.xlu0 %v2902_v28 }
 0xdb9   : > { %v4434_v29 = vpop.f32.mrf.mxu1 }
 0xdba   : > { %v2894_v30 = vsel %vm947_vm5, %v2889_v16, -1e+30 }
 0xdbb   : > { %v2880_v32 = vpop.f32.mrf.mxu1  ;;  %v2905_v33 = vsel %vm1285_vm6, %v2894_v30, -inf }
 0xdbc   : > { %v2890_v34 = vmul.f32 0.35355338, %v2880_v32  ;;  %2906 = vmax.xlane.f32.xlu1 %v2905_v33 }
 0xdbd   : > { %v4437_v37 = vpop.f32.mrf.mxu1 }
 0xdbe   : > { %v2895_v45 = vsel %vm947_vm5, %v2890_v34, -1e+30 }
 0xdbf   : > { %v2883_v48 = vpop.f32.mrf.mxu1  ;;  %v2908_v46 = vsel %vm1285_vm6, %v2895_v45, -inf }
 0xdc0   : > { %2909 = vmax.xlane.f32.xlu0 %v2908_v46 }
 0xdc1   : > { %v4438_v50 = vpop.f32.mrf.mxu1 }
 0xe39   : > { %v2898_v54 = vpop.xlane.xlu0 %2897 }
 0xe3a   : > { %v2911_v53 = vsub.f32 %v2891_v58, %v2898_v54 }
 0xe3c   : > { %v2916_v9 = vmul.f32 1.442695, %v2911_v53 }
 0xe3d   : > { %v2901_v43 = vpop.xlane.xlu1 %2900 }
 0xe3e   : > { %4662 = vpow2.f32 %v2916_v9  ;;  %v2912_v56 = vsub.f32 %v2892_v38, %v2901_v43 }
 0xe40   : > { %v2918_v57 = vmul.f32 1.442695, %v2912_v56  ;;  %v3912_v56 = vld [vmem:[%s5797_s1] ss:$0 sm:$0xff] }
 0xe41   : > { %v2904_v61 = vpop.xlane.xlu0 %2903 }
 0xe42   : > { %4664 = vpow2.f32 %v2918_v57  ;;  %v2913_v63 = vsub.f32 %v2893_v15, %v2904_v61  ;;  %v4702_v61 = vld [vmem:[#allocation2] sm:$0xff] }
 0xe44   : > { %v2920_v39 = vmul.f32 1.442695, %v2913_v63 }
 0xe45   : > { %v2907_v14 = vpop.xlane.xlu1 %2906 }
 0xe46   : > { %4666 = vpow2.f32 %v2920_v39  ;;  %v2914_v35 = vsub.f32 %v2894_v30, %v2907_v14 }
 0xe48   : > { %v2922_v47 = vmul.f32 1.442695, %v2914_v35 }
 0xe49   : > { %v2910_v0 = vpop.xlane.xlu0 %2909 }
 0xe4a   : > { %4668 = vpow2.f32 %v2922_v47  ;;  %v2915_v2 = vsub.f32 %v2895_v45, %v2910_v0  ;;  %v4703_v0 = vld [vmem:[#allocation2 + $0x8] sm:$0xff] }
 0xe4b   : > { %v4663_v3 = vpop.eup %4662 }
 0xe4c   : > { %v2924_v6 = vmul.f32 1.442695, %v2915_v2  ;;  %v2926_v8 = vsel %vm1285_vm6, %v4663_v3, 0.0 }
 0xe4d   : > { %2927 = vadd.xlane.f32.xlu1 %v2926_v8 }
 0xe4e   : > { %4670 = vpow2.f32 %v2924_v6 }
 0xe4f   : > { %v4665_v20 = vpop.eup %4664 }
 0xe50   : > { %v2929_v18 = vsel %vm1285_vm6, %v4665_v20, 0.0 }
 0xe51   : > { %2930 = vadd.xlane.f32.xlu0 %v2929_v18  ;;  %v4704_v18 = vld [vmem:[#allocation2 + $0x10] sm:$0xff] }
 0xe53   : > { %v4667_v51 = vpop.eup %4666 }
 0xe54   : > { %v2932_v55 = vsel %vm1285_vm6, %v4667_v51, 0.0 }
 0xe55   : > { %2933 = vadd.xlane.f32.xlu1 %v2932_v55 }
 0xe57   : > { %v4669_v11 = vpop.eup %4668 }
 0xe58   : > { %v2935_v60 = vsel %vm1285_vm6, %v4669_v11, 0.0 }
 0xe59   : > { %2936 = vadd.xlane.f32.xlu0 %v2935_v60 }
 0xe5b   : > { %v4671_v17 = vpop.eup %4670 }
 0xe5c   : > { %v2938_v19 = vsel %vm1285_vm6, %v4671_v17, 0.0 }
 0xe5d   : > { %2939 = vadd.xlane.f32.xlu1 %v2938_v19  ;;  %v4705_v19 = vld [vmem:[#allocation2 + $0x18] sm:$0xff] }
 0xed6   : > { %v2928_v24 = vpop.xlane.xlu1 %2927 }
 0xed7   : > { %4672 = vrcp.f32 %v2928_v24 }
 0xeda   : > { %v2931_v25 = vpop.xlane.xlu0 %2930 }
 0xedb   : > { %4674 = vrcp.f32 %v2931_v25 }
 0xede   : > { %v2934_v26 = vpop.xlane.xlu1 %2933 }
 0xedf   : > { %4676 = vrcp.f32 %v2934_v26 }
 0xee2   : > { %v2937_v22 = vpop.xlane.xlu0 %2936 }
 0xee3   : > { %4678 = vrcp.f32 %v2937_v22  ;;  %v4706_v22 = vld [vmem:[#allocation2 + $0x20] sm:$0xff] }
 0xee4   : > { %v4673_v52 = vpop.eup %4672 }
 0xee5   : > { %v2946_v58 = vmul.f32 %v4673_v52, %v4663_v3 }
 0xee6   : > { %v2940_v40 = vpop.xlane.xlu1 %2939 }
 0xee7   : > { %4680 = vrcp.f32 %v2940_v40 }
 0xee8   : > { %v4675_v49 = vpop.eup %4674 }
 0xee9   : > { %v2947_v59 = vmul.f32 %v4675_v49, %v4665_v20 }
 0xeeb   : > { %v2951_v62 = vpack.c.bf16 %v2947_v59, %v2946_v58 }
 0xeec   : > { %v4677_v4 = vpop.eup %4676 }
 0xeed   : > { %4446 = vmatmul.mubr.msk.bf16.vlgmr.msra.gmra.mxu0 %vm1285_vm6, %v2951_v62  ;;  %v2948_v38 = vmul.f32 %v4677_v4, %v4667_v51 }
 0xeee   : > { %4449 = vmatprep.mubr.msk.bf16.mxu0 %vm4748_vm2, %v4747_v42 }
 0xef0   : > { %v4679_v5 = vpop.eup %4678 }
 0xef1   : > { %v2949_v10 = vmul.f32 %v4679_v5, %v4669_v11 }
 0xef3   : > { %v2952_v7 = vpack.c.bf16 %v2949_v10, %v2948_v38 }
 0xef4   : > { %v4681_v12 = vpop.eup %4680 }
 0xef5   : > { %4450 = vmatmul.mubr.msk.bf16.gmra.mxu0 %vm1285_vm6, %v2952_v7  ;;  %v2950_v13 = vmul.f32 %v4681_v12, %v4671_v17 }
 0xef6   : > { %4453 = vmatprep.mubr.msk.bf16.mxu0 %vm4748_vm2, %v4747_v42 }
 0xef7   : > { %v2953_v15 = vpack.c.bf16 %v2950_v13, %v2950_v13 }
 0xefd   : > { %4454 = vmatmul.mubr.msk.bf16.gmra.mxu0 %vm1285_vm6, %v2953_v15 }
 0xefe   : > { %4475 = vmatprep.mubr.msk.bf16.mxu0 %vm4748_vm2, %v4747_v42 }
 0xfad   : > { %v3003_v27 = vpop.f32.mrf.mxu0 }
 0xfaf   : > { %v4447_v28 = vpop.f32.mrf.mxu0 }
 0xfb1   : > { %v3006_v16 = vpop.f32.mrf.mxu0 }
 0xfb2   : > { %v3025_v29 = vpack.c.bf16 %v3006_v16, %v3003_v27 }
 0xfb3   : > { %v4448_v30 = vpop.f32.mrf.mxu0 }
 0xfb4   : > { %4460 = vmatmul.mubr.msk.bf16.vlgmr.msra.gmra.mxu1 %vm1200_vm3, %v3025_v29 }
 0xfb5   : > { %v3011_v32 = vpop.f32.mrf.mxu0  ;;  %4463 = vmatprep.mubr.msk.bf16.mxu1 %vm4748_vm2, %v4747_v42 }
 0xfb7   : > { %v4451_v33 = vpop.f32.mrf.mxu0 }
 0xfb9   : > { %v3014_v34 = vpop.f32.mrf.mxu0 }
 0xfba   : > { %v3026_v37 = vpack.c.bf16 %v3014_v34, %v3011_v32 }
 0xfbb   : > { %v4452_v45 = vpop.f32.mrf.mxu0 }
 0xfbc   : > { %4464 = vmatmul.mubr.msk.bf16.gmra.mxu1 %vm1200_vm3, %v3026_v37 }
 0xfbd   : > { %v3019_v48 = vpop.f32.mrf.mxu0  ;;  %4467 = vmatprep.mubr.msk.bf16.mxu1 %vm4748_vm2, %v4747_v42 }
 0xfbe   : > { %v3027_v54 = vpack.c.bf16 %v3019_v48, %v3019_v48 }
 0xfbf   : > { %v4455_v46 = vpop.f32.mrf.mxu0 }
 0xfc1   : > { %v3022_v50 = vpop.f32.mrf.mxu0 }
 0xfc3   : > { %v4456_v53 = vpop.f32.mrf.mxu0 }
 0xfc4   : > { %4468 = vmatmul.mubr.msk.bf16.gmra.mxu1 %vm1200_vm3, %v3027_v54 }
 0xfc5   : > { %4503 = vmatprep.mubr.msk.bf16.mxu1 %vm4748_vm2, %v4747_v42 }
0x1074   : > { %v3076_v9 = vpop.f32.mrf.mxu1 }
0x1075   : > { %v3098_v43 = vadd.f32 %v3076_v9, %v5520_v1  ;;  %v4582_v9 = vld [vmem:[%s4939_s8 + $0x8] sm:$0xff]  }
0x1076   : > { %v4461_v57 = vpop.f32.mrf.mxu1  ;;  %4472 = vmatpush3.bf16.msra.mxu0 %v4582_v9 }
0x1077   : > { %v3103_v63 = vadd.f32 %v4702_v61, %v3098_v43  ;;  %4473 = vmatprep.subr.bf16.mxu0 %v4747_v42  ;;  %v4583_v43 = vld [vmem:[%s4939_s8] sm:$0xff]  }
0x1078   : > { %v3079_v39 = vpop.f32.mrf.mxu1 }
0x1079   : > { %v5609_v14 = vadd.f32 %v3912_v56, %v3103_v63  ;;  %v3099_v35 = vadd.f32 %v3079_v39, %v5524_v31 }
0x107a   : > { %v4462_v47 = vpop.f32.mrf.mxu1  ;;  %4474 = vmatpush3.bf16.msra.mxu0 %v4583_v43 }
0x107b   : > { %v3104_v2 = vadd.f32 %v4703_v0, %v3099_v35  ;;  %v3122_v3 = vsel %vm853_vm1, %v5609_v14, 0.0 }
0x107c   : > { %3123 = vadd.xlane.f32.xlu0 %v3122_v3  ;;  %v3084_v1 = vpop.f32.mrf.mxu1 }
0x107d   : > { %v5614_v6 = vadd.f32 %v3912_v56, %v3104_v2  ;;  %v3100_v8 = vadd.f32 %v3084_v1, %v5528_v36 }
0x107e   : > { %v4465_v20 = vpop.f32.mrf.mxu1 }
0x107f   : > { %v3105_v51 = vadd.f32 %v4704_v18, %v3100_v8  ;;  %v3125_v55 = vsel %vm853_vm1, %v5614_v6, 0.0 }
0x1080   : > { %3126 = vadd.xlane.f32.xlu1 %v3125_v55  ;;  %v3087_v31 = vpop.f32.mrf.mxu1 }
0x1081   : > { %v5619_v11 = vadd.f32 %v3912_v56, %v3105_v51  ;;  %v3101_v60 = vadd.f32 %v3087_v31, %v5532_v41 }
0x1082   : > { %v4466_v17 = vpop.f32.mrf.mxu1 }
0x1083   : > { %v3106_v21 = vadd.f32 %v4705_v19, %v3101_v60  ;;  %v3128_v23 = vsel %vm853_vm1, %v5619_v11, 0.0  ;;  %v3913_v60 = vld [vmem:[%s5799_s2] ss:$0 sm:$0xff] }
0x1084   : > { %3129 = vadd.xlane.f32.xlu0 %v3128_v23  ;;  %v3092_v36 = vpop.f32.mrf.mxu1  ;;  %v3914_v23 = vld [vmem:[%s5801_s7] ss:$0 sm:$0xff] }
0x1085   : > { %v5624_v24 = vadd.f32 %v3912_v56, %v3106_v21  ;;  %v3102_v25 = vadd.f32 %v3092_v36, %v5536_v44 }
0x1086   : > { %v4469_v26 = vpop.f32.mrf.mxu1 }
0x1087   : > { %v3107_v52 = vadd.f32 %v4706_v22, %v3102_v25  ;;  %v3131_v40 = vsel %vm853_vm1, %v5624_v24, 0.0 }
0x1088   : > { %3132 = vadd.xlane.f32.xlu1 %v3131_v40  ;;  %v3095_v41 = vpop.f32.mrf.mxu1 }
0x1089   : > { %v5629_v49 = vadd.f32 %v3912_v56, %v3107_v52 }
0x108a   : > { %v4470_v58 = vpop.f32.mrf.mxu1 }
0x108b   : > { %v3134_v59 = vsel %vm853_vm1, %v5629_v49, 0.0 }
0x108c   : > { %3135 = vadd.xlane.f32.xlu0 %v3134_v59 }
0x1105   : > { %v3124_v62 = vpop.xlane.xlu0 %3123 }
0x1106   : > { %v3137_v4 = vmul.f32 0.03125, %v3124_v62 }
0x1108   : > { %v3142_v5 = vsub.f32 %v5609_v14, %v3137_v4 }
0x1109   : > { %v3127_v44 = vpop.xlane.xlu1 %3126 }
0x110a   : > { %v3138_v38 = vmul.f32 0.03125, %v3127_v44  ;;  %v3147_v10 = vmul.f32 %v3142_v5, %v3142_v5 }
0x110c   : > { %v3143_v7 = vsub.f32 %v5614_v6, %v3138_v38  ;;  %v3152_v12 = vsel %vm853_vm1, %v3147_v10, 0.0 }
0x110d   : > { %v3130_v13 = vpop.xlane.xlu0 %3129  ;;  %3153 = vadd.xlane.f32.xlu1 %v3152_v12 }
0x110e   : > { %v3139_v15 = vmul.f32 0.03125, %v3130_v13  ;;  %v3148_v27 = vmul.f32 %v3143_v7, %v3143_v7 }
0x1110   : > { %v3144_v28 = vsub.f32 %v5619_v11, %v3139_v15  ;;  %v3155_v16 = vsel %vm853_vm1, %v3148_v27, 0.0  ;;  %v4584_v15 = vld [vmem:[%s4948_s26 + $0x38] sm:$0xff]   ;;  %v4585_v27 = vld [vmem:[%s4948_s26 + $0x30] sm:$0xff]  }
0x1111   : > { %v3133_v29 = vpop.xlane.xlu1 %3132  ;;  %3156 = vadd.xlane.f32.xlu0 %v3155_v16  ;;  %4488 = vmatpush3.bf16.msra.mxu1 %v4584_v15  ;;  %v4587_v16 = vld [vmem:[%s4948_s26 + $0x20] sm:$0xff]  }
0x1112   : > { %v3140_v30 = vmul.f32 0.03125, %v3133_v29  ;;  %v3149_v32 = vmul.f32 %v3144_v28, %v3144_v28  ;;  %4489 = vmatprep.subr.bf16.mxu1 %v4747_v42  ;;  %v4588_v29 = vld [vmem:[%s4948_s26 + $0x18] sm:$0xff]  }
0x1114   : > { %v3145_v33 = vsub.f32 %v5624_v24, %v3140_v30  ;;  %v3158_v34 = vsel %vm853_vm1, %v3149_v32, 0.0  ;;  %v4589_v30 = vld [vmem:[%s4948_s26 + $0x10] sm:$0xff]   ;;  %v4590_v32 = vld [vmem:[%s4948_s26 + $0x8] sm:$0xff]  }
0x1115   : > { %3159 = vadd.xlane.f32.xlu1 %v3158_v34  ;;  %v3136_v37 = vpop.xlane.xlu0 %3135  ;;  %4490 = vmatpush3.bf16.msra.mxu1 %v4585_v27  ;;  %v3915_v34 = vld [vmem:[%s816_s9] ss:$0 sm:$0xff] }
0x1116   : > { %v3141_v45 = vmul.f32 0.03125, %v3136_v37  ;;  %v3150_v48 = vmul.f32 %v3145_v33, %v3145_v33  ;;  %4491 = vmatprep.subr.bf16.mxu1 %v4747_v42 }
0x1118   : > { %v3146_v46 = vsub.f32 %v5629_v49, %v3141_v45  ;;  %v3161_v50 = vsel %vm853_vm1, %v3150_v48, 0.0 }
0x1119   : > { %3162 = vadd.xlane.f32.xlu0 %v3161_v50 }
0x111a   : > { %v3151_v54 = vmul.f32 %v3146_v46, %v3146_v46 }
0x111c   : > { %v3164_v53 = vsel %vm853_vm1, %v3151_v54, 0.0 }
0x111d   : > { %3165 = vadd.xlane.f32.xlu1 %v3164_v53 }
0x1196   : > { %v3154_v56 = vpop.xlane.xlu1 %3153 }
0x1197   : > { %v3167_v57 = vmul.f32 0.03125, %v3154_v56 }
0x1199   : > { %v3172_v61 = vadd.f32 1e-05, %v3167_v57 }
0x119a   : > { %v3157_v63 = vpop.xlane.xlu0 %3156 }
0x119b   : > { %4682 = vrsqrt.f32 %v3172_v61  ;;  %v3168_v39 = vmul.f32 0.03125, %v3157_v63 }
0x119d   : > { %v3173_v35 = vadd.f32 1e-05, %v3168_v39 }
0x119e   : > { %v3160_v47 = vpop.xlane.xlu1 %3159 }
0x119f   : > { %4684 = vrsqrt.f32 %v3173_v35  ;;  %v3169_v0 = vmul.f32 0.03125, %v3160_v47 }
0x11a1   : > { %v3174_v2 = vadd.f32 1e-05, %v3169_v0 }
0x11a2   : > { %v3163_v3 = vpop.xlane.xlu0 %3162 }
0x11a3   : > { %4686 = vrsqrt.f32 %v3174_v2  ;;  %v3170_v1 = vmul.f32 0.03125, %v3163_v3 }
0x11a5   : > { %v3175_v8 = vadd.f32 1e-05, %v3170_v1 }
0x11a6   : > { %v3166_v20 = vpop.xlane.xlu1 %3165 }
0x11a7   : > { %4688 = vrsqrt.f32 %v3175_v8  ;;  %v3171_v18 = vmul.f32 0.03125, %v3166_v20 }
0x11a8   : > { %v4683_v51 = vpop.eup %4682 }
0x11a9   : > { %v3182_v55 = vmul.f32 %v4683_v51, %v3142_v5  ;;  %v3176_v31 = vadd.f32 1e-05, %v3171_v18 }
0x11ab   : > { %4690 = vrsqrt.f32 %v3176_v31  ;;  %v3193_v19 = vmul.f32 %v3913_v60, %v3182_v55 }
0x11ac   : > { %v4685_v17 = vpop.eup %4684 }
0x11ad   : > { %v3183_v21 = vmul.f32 %v4685_v17, %v3143_v7  ;;  %v3204_v26 = vadd.f32 %v3914_v23, %v3193_v19 }
0x11af   : > { %v3194_v36 = vmul.f32 %v3913_v60, %v3183_v21 }
0x11b0   : > { %v4687_v25 = vpop.eup %4686 }
0x11b1   : > { %v3205_v22 = vadd.f32 %v3914_v23, %v3194_v36  ;;  %v3184_v52 = vmul.f32 %v4687_v25, %v3144_v28  ;;  %v4586_v28 = vld [vmem:[%s4948_s26 + $0x28] sm:$0xff]  }
0x11b2   : > { %4492 = vmatpush3.bf16.msra.mxu1 %v4586_v28 }
0x11b3   : > { %v3209_v40 = vpack.c.bf16 %v3205_v22, %v3204_v26  ;;  %v3195_v59 = vmul.f32 %v3913_v60, %v3184_v52  ;;  %4493 = vmatprep.subr.bf16.mxu1 %v4747_v42 }
0x11b4   : > { %v4689_v41 = vpop.eup %4688 }
0x11b5   : > { %v3185_v58 = vmul.f32 %v4689_v41, %v3145_v33  ;;  %4476 = vmatmul.mubr.msk.bf16.vlgmr.msra.gmra.mxu0 %vm853_vm1, %v3209_v40  ;;  %v3206_v44 = vadd.f32 %v3914_v23, %v3195_v59  ;;  %v4591_v33 = vld [vmem:[%s4948_s26] sm:$0xff]  }
0x11b6   : > { %4479 = vmatprep.mubr.msk.bf16.mxu0 %vm4748_vm2, %v4747_v42  ;;  %4494 = vmatpush3.bf16.msra.mxu1 %v4587_v16 }
0x11b7   : > { %v3196_v62 = vmul.f32 %v3913_v60, %v3185_v58  ;;  %4495 = vmatprep.subr.bf16.mxu1 %v4747_v42 }
0x11b8   : > { %v4691_v4 = vpop.eup %4690 }
0x11b9   : > { %v3186_v5 = vmul.f32 %v4691_v4, %v3146_v46  ;;  %v3207_v38 = vadd.f32 %v3914_v23, %v3196_v62 }
0x11ba   : > { %4496 = vmatpush3.bf16.msra.mxu1 %v4588_v29 }
0x11bb   : > { %v3210_v10 = vpack.c.bf16 %v3207_v38, %v3206_v44  ;;  %v3197_v7 = vmul.f32 %v3913_v60, %v3186_v5  ;;  %4497 = vmatprep.subr.bf16.mxu1 %v4747_v42 }
0x11bd   : > { %4480 = vmatmul.mubr.msk.bf16.gmra.mxu0 %vm853_vm1, %v3210_v10  ;;  %v3208_v12 = vadd.f32 %v3914_v23, %v3197_v7 }
0x11be   : > { %4483 = vmatprep.mubr.msk.bf16.mxu0 %vm4748_vm2, %v4747_v42  ;;  %4498 = vmatpush3.bf16.msra.mxu1 %v4589_v30 }
0x11bf   : > { %v3211_v13 = vpack.c.bf16 %v3208_v12, %v3208_v12  ;;  %4499 = vmatprep.subr.bf16.mxu1 %v4747_v42 }
0x11c2   : > { %4500 = vmatpush3.bf16.msra.mxu1 %v4590_v32 }
0x11c3   : > { %4501 = vmatprep.subr.bf16.mxu1 %v4747_v42 }
0x11c5   : > { %4484 = vmatmul.mubr.msk.bf16.gmra.mxu0 %vm853_vm1, %v3211_v13 }
0x11c6   : > { %4502 = vmatpush3.bf16.msra.mxu1 %v4591_v33 }
0x1275   : > { %v3278_v37 = vpop.f32.mrf.mxu0 }
0x1276   : > { %v3279_v45 = vadd.f32 %v3915_v34, %v3278_v37 }
0x1277   : > { %v4477_v48 = vpop.f32.mrf.mxu0 }
0x1278   : > { %v3300_v46 = vmul.f32 %v3279_v45, %v3279_v45 }
0x1279   : > { %v3281_v50 = vpop.f32.mrf.mxu0 }
0x127a   : > { %v3305_v54 = vmul.f32 %v3300_v46, %v3279_v45  ;;  %v3282_v53 = vadd.f32 %v3915_v34, %v3281_v50 }
0x127b   : > { %v4478_v9 = vpop.f32.mrf.mxu0 }
0x127c   : > { %v3310_v43 = vmul.f32 0.044715, %v3305_v54  ;;  %v3301_v56 = vmul.f32 %v3282_v53, %v3282_v53  ;;  %v3921_v9 = vld [vmem:[%s824_s11] ss:$0 sm:$0xff]  ;;  %s5803_s11 = sld [smem:[#allocation3_spill]] }
0x127d   : > { %v3286_v57 = vpop.f32.mrf.mxu0 }
0x127e   : > { %v3315_v61 = vadd.f32 %v3310_v43, %v3279_v45  ;;  %v3306_v63 = vmul.f32 %v3301_v56, %v3282_v53  ;;  %v3287_v39 = vadd.f32 %v3915_v34, %v3286_v57 }
0x127f   : > { %v4481_v35 = vpop.f32.mrf.mxu0 }
0x1280   : > { %v3320_v47 = vmul.f32 0.7978846, %v3315_v61  ;;  %v3311_v0 = vmul.f32 0.044715, %v3306_v63  ;;  %v3302_v2 = vmul.f32 %v3287_v39, %v3287_v39 }
0x1281   : > { %v3289_v3 = vpop.f32.mrf.mxu0 }
0x1282   : > { %4692 = vtanh.f32 %v3320_v47  ;;  %v3316_v1 = vadd.f32 %v3311_v0, %v3282_v53  ;;  %v3307_v8 = vmul.f32 %v3302_v2, %v3287_v39  ;;  %v3290_v20 = vadd.f32 %v3915_v34, %v3289_v3  ;;  %p3930_p8 = scmp.ne.s32.totalorder %s5803_s11, 1 }
0x1283   : > { %v4482_v18 = vpop.f32.mrf.mxu0 }
0x1284   : > { %v3321_v51 = vmul.f32 0.7978846, %v3316_v1  ;;  %v3312_v55 = vmul.f32 0.044715, %v3307_v8  ;;  %v3303_v31 = vmul.f32 %v3290_v20, %v3290_v20 }
0x1285   : > { %v3294_v60 = vpop.f32.mrf.mxu0 }
0x1286   : > { %4694 = vtanh.f32 %v3321_v51  ;;  %v3317_v17 = vadd.f32 %v3312_v55, %v3287_v39  ;;  %v3308_v19 = vmul.f32 %v3303_v31, %v3290_v20  ;;  %v3295_v21 = vadd.f32 %v3915_v34, %v3294_v60 }
0x1287   : > { %v4485_v23 = vpop.f32.mrf.mxu0 }
0x1288   : > { %v3322_v36 = vmul.f32 0.7978846, %v3317_v17  ;;  %v3313_v25 = vmul.f32 0.044715, %v3308_v19  ;;  %v3304_v26 = vmul.f32 %v3295_v21, %v3295_v21 }
0x1289   : > { %v3297_v22 = vpop.f32.mrf.mxu0 }
0x128a   : > { %4696 = vtanh.f32 %v3322_v36  ;;  %v3318_v52 = vadd.f32 %v3313_v25, %v3290_v20  ;;  %v3309_v40 = vmul.f32 %v3304_v26, %v3295_v21 }
0x128b   : > { %v4486_v41 = vpop.f32.mrf.mxu0 }
0x128c   : > { %v3323_v58 = vmul.f32 0.7978846, %v3318_v52  ;;  %v3314_v59 = vmul.f32 0.044715, %v3309_v40 }
0x128e   : > { %4698 = vtanh.f32 %v3323_v58  ;;  %v3319_v62 = vadd.f32 %v3314_v59, %v3295_v21 }
0x128f   : > { %v4693_v4 = vpop.eup %4692 }
0x1290   : > { %v3330_v5 = vadd.f32 1.0, %v4693_v4  ;;  %v3324_v44 = vmul.f32 0.7978846, %v3319_v62 }
0x1292   : > { %4700 = vtanh.f32 %v3324_v44  ;;  %v3335_v10 = vmul.f32 0.5, %v3330_v5 }
0x1293   : > { %v4695_v38 = vpop.eup %4694 }
0x1294   : > { %v3331_v7 = vadd.f32 1.0, %v4695_v38  ;;  %v3340_v15 = vmul.f32 %v3335_v10, %v3279_v45 }
0x1296   : > { %v3336_v12 = vmul.f32 0.5, %v3331_v7 }
0x1297   : > { %v4697_v13 = vpop.eup %4696 }
0x1298   : > { %v3341_v27 = vmul.f32 %v3336_v12, %v3282_v53  ;;  %v3332_v28 = vadd.f32 1.0, %v4697_v13 }
0x129a   : > { %v3345_v16 = vpack.c.bf16 %v3341_v27, %v3340_v15  ;;  %v3337_v30 = vmul.f32 0.5, %v3332_v28 }
0x129b   : > { %v4699_v29 = vpop.eup %4698 }
0x129c   : > { %v3333_v32 = vadd.f32 1.0, %v4699_v29  ;;  %4504 = vmatmul.mubr.bf16.vlgmr.msra.gmra.mxu1 %v3345_v16  ;;  %v3342_v37 = vmul.f32 %v3337_v30, %v3287_v39 }
0x129d   : > { %4507 = vmatprep.mubr.msk.bf16.mxu1 %vm4748_vm2, %v4747_v42 }
0x129e   : > { %v3338_v33 = vmul.f32 0.5, %v3333_v32 }
0x129f   : > { %v4701_v34 = vpop.eup %4700 }
0x12a0   : > { %v3343_v48 = vmul.f32 %v3338_v33, %v3290_v20  ;;  %v3334_v46 = vadd.f32 1.0, %v4701_v34 }
0x12a2   : > { %v3346_v50 = vpack.c.bf16 %v3343_v48, %v3342_v37  ;;  %v3339_v54 = vmul.f32 0.5, %v3334_v46 }
0x12a4   : > { %4508 = vmatmul.mubr.bf16.gmra.mxu1 %v3346_v50  ;;  %v3344_v45 = vmul.f32 %v3339_v54, %v3295_v21 }
0x12a5   : > { %4511 = vmatprep.mubr.msk.bf16.mxu1 %vm4748_vm2, %v4747_v42 }
0x12a6   : > { %v3347_v53 = vpack.c.bf16 %v3344_v45, %v3344_v45 }
0x12ac   : > { %4512 = vmatmul.mubr.bf16.gmra.mxu1 %v3347_v53 }
0x135c   : > { %v3453_v43 = vpop.f32.mrf.mxu1 }
0x135d   : > { %v3454_v56 = vadd.f32 %v3921_v9, %v3453_v43 }
0x135e   : > { %v4505_v57 = vpop.f32.mrf.mxu1 }
0x135f   : > { %v3475_v61 = vadd.f32 %v3454_v56, %v5609_v14 }
0x1360   : > { %v3456_v63 = vpop.f32.mrf.mxu1 }
0x1361   : > { %3480 = vst.msk [vmem:[#allocation2] sm:$0xff] %vm853_vm1, %v3475_v61  ;;  %v3457_v39 = vadd.f32 %v3921_v9, %v3456_v63 }
0x1362   : > { %v4506_v35 = vpop.f32.mrf.mxu1 }
0x1363   : > { %v3476_v42 = vadd.f32 %v3457_v39, %v5614_v6 }
0x1364   : > { %v3461_v47 = vpop.f32.mrf.mxu1 }
0x1365   : > { %3481 = vst.msk [vmem:[#allocation2 + $0x8] sm:$0xff] %vm853_vm1, %v3476_v42  ;;  %v3462_v0 = vadd.f32 %v3921_v9, %v3461_v47 }
0x1366   : > { %v4509_v2 = vpop.f32.mrf.mxu1 }
0x1367   : > { %v3477_v3 = vadd.f32 %v3462_v0, %v5619_v11 }
0x1368   : > { %v3464_v1 = vpop.f32.mrf.mxu1 }
0x1369   : > { %3482 = vst.msk [vmem:[#allocation2 + $0x10] sm:$0xff] %vm853_vm1, %v3477_v3  ;;  %v3465_v8 = vadd.f32 %v3921_v9, %v3464_v1 }
0x136a   : > { %v4510_v20 = vpop.f32.mrf.mxu1 }
0x136b   : > { %v3478_v14 = vadd.f32 %v3465_v8, %v5624_v24 }
0x136c   : > { %v3469_v18 = vpop.f32.mrf.mxu1 }
0x136d   : > { %3483 = vst.msk [vmem:[#allocation2 + $0x18] sm:$0xff] %vm853_vm1, %v3478_v14  ;;  %v3470_v51 = vadd.f32 %v3921_v9, %v3469_v18 }
0x136e   : > { %v4513_v55 = vpop.f32.mrf.mxu1  ;;  %3488 = sbr.rel (%p3930_p8) target bundleno = 4982 (0x1376), region = 96 }
0x136f   : > { %v3479_v6 = vadd.f32 %v3470_v51, %v5629_v49 }
0x1370   : > { %v3472_v31 = vpop.f32.mrf.mxu1 }
0x1371   : > { %3484 = vst.msk [vmem:[#allocation2 + $0x20] sm:$0xff] %vm853_vm1, %v3479_v6 }
0x1372   : > { %v4514_v60 = vpop.f32.mrf.mxu1 }
0x1373   : > { %3489 = vst.msk [vmem:[%s4957_s12] sm:$0xff] %vm853_vm1, %v3475_v61  ;;  %3490 = vst.msk [vmem:[%s4957_s12 + $0x8] sm:$0xff] %vm853_vm1, %v3476_v42 }
0x1374   : > { %3491 = vst.msk [vmem:[%s4957_s12 + $0x10] sm:$0xff] %vm853_vm1, %v3477_v3  ;;  %3492 = vst.msk [vmem:[%s4957_s12 + $0x18] sm:$0xff] %vm853_vm1, %v3478_v14 }
0x1375   : > { %3493 = vst.msk [vmem:[%s4957_s12 + $0x20] sm:$0xff] %vm853_vm1, %v3479_v6 }
0x1376 PF: > { %s5804_s30 = sld [smem:[#allocation6_spill]] }
0x1377   : > { %s5805_s24 = sld [smem:[#allocation4_spill]] }
0x1378   : > { %s5806_s25 = sld [smem:[#allocation5_spill]] }
0x1379   : > { %s5807_s26 = sld [smem:[#allocation7_spill]] }
0x137a   : > { %s5808_s27 = sld [smem:[#allocation8_spill]] }
0x137c   : > { %s27_s28 = sadd.s32 1, %s5804_s30  }
0x137d   : > { %p24_p9 = scmp.ge.s32.totalorder %s27_s28, 6  }
0x137f   :  { %26 = sbr.rel (!%p24_p9) target bundleno = 16 (0x10), region = 195 }

</bundles_post_ra>
